<compile_context>
chip_gen: v5e
topology: v5e:2x2
jax: 0.10.0
libtpu: 0.0.40
codegen_flags: <defaults>
</compile_context>

<pallas_src>
import jax
import jax.numpy as jnp
import numpy as np
from jax import lax
from jax.experimental import pallas as pl
from jax.experimental.pallas import tpu as pltpu


# ----------------------------- in-kernel helpers -----------------------------

def _lstm_layer(x_flat, wih_ref, whh_ref, b_ref, xp_ref, hseq_ref, T, Bb, H):
    """Single-layer LSTM, time-major, hidden sequence written to a scratch ref.

    x_flat  : (T*Bb, Din) f32 activations (time-major flattened)
    wih_ref : (Din, 4H) bf16   whh_ref : (H, 4H) bf16   b_ref : (1, 4H) f32
    xp_ref  : (T, Bb, 4H) f32 VMEM scratch (staged input projection)
    hseq_ref: (T, Bb, H)  f32 VMEM scratch (output hidden sequence)
    """
    # Lane masks / affine constants for the single-tanh activation:
    #   sigmoid(z) = 0.5 * tanh(0.5 * z) + 0.5     (i, f, o lanes)
    #   tanh(z)    = tanh(z)                       (g lanes)
    lane = lax.broadcasted_iota(jnp.int32, (1, 4 * H), 1)
    is_g = (lane >= 2 * H) & (lane < 3 * H)
    pre_scale = jnp.where(is_g, jnp.float32(1.0), jnp.float32(0.5))   # (1, 4H)
    post_mul = pre_scale
    post_add = jnp.where(is_g, jnp.float32(0.0), jnp.float32(0.5))

    # Input projection for all timesteps at once (one big MXU matmul), with the
    # 0.5 sigmoid-lane pre-scale folded in, staged into VMEM scratch.
    xp = jnp.dot(x_flat.astype(jnp.bfloat16), wih_ref[...],
                 preferred_element_type=jnp.float32) + b_ref[...]     # (T*Bb, 4H)
    xp_ref[...] = (xp * pre_scale).reshape(T, Bb, 4 * H)

    # Recurrent weight with the same pre-scale folded in (x0.5 is exact in bf16),
    # hoisted out of the time loop.
    whh = whh_ref[...] * pre_scale.astype(jnp.bfloat16)               # (H, 4H) bf16

    def step(t, carry):
        h, c = carry
        gates = xp_ref[t] + jnp.dot(h.astype(jnp.bfloat16), whh,
                                    preferred_element_type=jnp.float32)  # (Bb, 4H)
        # Single EUP tanh pass over all gates, then lane-masked affine.
        act = jnp.tanh(gates) * post_mul + post_add
        i = act[:, 0 * H:1 * H]
        f = act[:, 1 * H:2 * H]
        g = act[:, 2 * H:3 * H]
        o = act[:, 3 * H:4 * H]
        c = f * c + i * g
        h = o * jnp.tanh(c)
        hseq_ref[t] = h                          # plain leading-dim store
        return h, c

    carry = (jnp.zeros((Bb, H), jnp.float32), jnp.zeros((Bb, H), jnp.float32))
    if T <= 16:
        # Fully unrolled: lets LLO overlap EUP nonlinearities with next MXU push.
        for t in range(T):
            carry = step(t, carry)
    else:
        lax.fori_loop(0, T, step, carry, unroll=True)


# ---------------------------------- kernel -----------------------------------

def model_kernel(x_ref,
                 w1_ref, b1_ref,
                 wih2_ref, whh2_ref, b2_ref,
                 w3_ref, b3_ref,
                 wih4_ref, whh4_ref, b4_ref,
                 w5_ref, b5_ref,
                 out_ref,
                 xp2_ref, hseq2_ref, xp4_ref, hseq4_ref):
    T, Bb, Din = x_ref.shape
    Dpad = out_ref.shape[-1]

    # fc1 + relu : (T*Bb, Din) @ (Din, 32)   (x already bf16)
    x = x_ref[...].reshape(T * Bb, Din)
    h = jnp.dot(x, w1_ref[...], preferred_element_type=jnp.float32) + b1_ref[...]
    h = jnp.maximum(h, 0.0)                                           # f32

    # lstm2 : 32 -> 128
    _lstm_layer(h, wih2_ref, whh2_ref, b2_ref, xp2_ref, hseq2_ref, T, Bb, 128)

    # fc3 + relu : (T*Bb, 128) @ (128, 64)
    h = hseq2_ref[...].reshape(T * Bb, 128).astype(jnp.bfloat16)
    h = jnp.dot(h, w3_ref[...], preferred_element_type=jnp.float32) + b3_ref[...]
    h = jnp.maximum(h, 0.0)                                           # f32

    # lstm4 : 64 -> 32
    _lstm_layer(h, wih4_ref, whh4_ref, b4_ref, xp4_ref, hseq4_ref, T, Bb, 32)

    # fc5 : (T*Bb, 32) @ (32, Dpad) — lane-dense, bf16 writeback (halves HBM bytes)
    h = hseq4_ref[...].reshape(T * Bb, 32).astype(jnp.bfloat16)
    out = jnp.dot(h, w5_ref[...], preferred_element_type=jnp.float32) + b5_ref[...]
    out_ref[...] = out.reshape(T, Bb, Dpad).astype(out_ref.dtype)


# --------------------------------- wrapper ------------------------------------

_GR = 16                     # bf16 sublane granule for the batch block
_VMEM_BUDGET = 48 * 2 ** 20  # per-block budget; leaves headroom on v7x's 64 MiB


def _round_up(a, m):
    return ((a + m - 1) // m) * m


def _vmem_estimate_bytes(T, Bb, Din, Dpad):
    """Rough per-grid-step VMEM footprint (scratch + double-buffered IO + weights)."""
    rows = T * Bb
    f32, bf16 = 4, 2
    scratch = rows * (4 * 128 + 128 + 4 * 32 + 32) * f32      # xp2, hseq2, xp4, hseq4
    io = 2 * rows * Din * bf16 + 2 * rows * Dpad * bf16       # double-buffered x / out
    transient = rows * (4 * 128 + 128 + 64 + 32) * f32        # live fc/gate temporaries
    weights = 4 * (16 * 32 + 32 * 512 + 128 * 512 + 128 * 64 +
                   64 * 128 + 32 * 128 + 32 * Dpad + 4096)    # bf16 weights + biases x2
    return scratch + io + transient + weights


def modele_lstm_nn_forward(x, params, *, batch_block=256):
    """x: (B, T, input_dim) f32, batch-first like torch.nn.LSTM(batch_first=True)."""
    B, T, Din = x.shape
    Dout = params["fc5_w"].shape[-1]
    Dpad = _round_up(Dout, 128)                  # lane-dense output width

    # --- batch block selection (primary throughput knob) ---------------------
    Bb = min(_round_up(batch_block, _GR), _round_up(B, _GR))
    while Bb > _GR and _vmem_estimate_bytes(T, Bb, Din, Dpad) > _VMEM_BUDGET:
        Bb -= _GR
    # v7x has 2 TensorCores: prefer >= 2 grid steps when the batch allows it.
    if -(-B // Bb) == 1 and Bb > _GR:
        Bb = max(_GR, _round_up((Bb + 1) // 2, _GR))
    B_pad = _round_up(B, Bb)

    vmem_limit = int(min(64 * 2 ** 20,
                         max(32 * 2 ** 20, 2 * _vmem_estimate_bytes(T, Bb, Din, Dpad))))

    # Time-major, batch-padded, bf16 input (MXU operand).
    x_tm = jnp.transpose(x, (1, 0, 2))
    x_tm = jnp.pad(x_tm, ((0, 0), (0, B_pad - B), (0, 0))).astype(jnp.bfloat16)

    bf = lambda a: a.astype(jnp.bfloat16)
    w5 = bf(jnp.pad(params["fc5_w"], ((0, 0), (0, Dpad - Dout))))
    b5 = jnp.pad(params["fc5_b"], ((0, 0), (0, Dpad - Dout)))

    args = (
        x_tm,
        bf(params["fc1_w"]), params["fc1_b"],
        bf(params["lstm2_wih"]), bf(params["lstm2_whh"]), params["lstm2_b"],
        bf(params["fc3_w"]), params["fc3_b"],
        bf(params["lstm4_wih"]), bf(params["lstm4_whh"]), params["lstm4_b"],
        w5, b5,
    )

    def resident(a):
        # whole weight in VMEM, constant index map -> stays resident across grid
        return pl.BlockSpec(a.shape, lambda b: (0,) * a.ndim)

    in_specs = [pl.BlockSpec((T, Bb, Din), lambda b: (0, b, 0))]
    in_specs += [resident(a) for a in args[1:]]

    out_pad = pl.pallas_call(
        model_kernel,
        out_shape=jax.ShapeDtypeStruct((T, B_pad, Dpad), jnp.bfloat16),
        grid_spec=pltpu.PrefetchScalarGridSpec(
            num_scalar_prefetch=0,
            grid=(B_pad // Bb,),
            in_specs=in_specs,
            out_specs=pl.BlockSpec((T, Bb, Dpad), lambda b: (0, b, 0)),
            scratch_shapes=[pltpu.VMEM((T, Bb, 4 * 128), jnp.float32),   # lstm2 xp
                            pltpu.VMEM((T, Bb, 128), jnp.float32),       # lstm2 hseq
                            pltpu.VMEM((T, Bb, 4 * 32), jnp.float32),    # lstm4 xp
                            pltpu.VMEM((T, Bb, 32), jnp.float32)]),      # lstm4 hseq
        compiler_params=pltpu.CompilerParams(
            dimension_semantics=("parallel",),
            vmem_limit_bytes=vmem_limit),
    )(*args)

    # (T, B_pad, Dpad) bf16 -> (B, T, Dout) f32: drop padding / upcast outside.
    return jnp.transpose(out_pad[:, :B, :Dout].astype(jnp.float32), (1, 0, 2))


# ------------------------------ parameter setup --------------------------------

def init_params(key, input_dim, output_dim):
    """PyTorch-style uniform(-1/sqrt(fan), 1/sqrt(fan)) init; weights stored
    transposed to (in_features, out_features)."""
    keys = iter(jax.random.split(key, 32))

    def u(shape, fan):
        k = 1.0 / np.sqrt(fan)
        return jax.random.uniform(next(keys), shape, jnp.float32, -k, k)

    p = {}
    # fc1: Linear(input_dim, 32)
    p["fc1_w"] = u((input_dim, 32), input_dim)
    p["fc1_b"] = u((1, 32), input_dim)
    # lstm2: LSTM(32, 128)
    H2 = 128
    p["lstm2_wih"] = u((32, 4 * H2), H2)
    p["lstm2_whh"] = u((H2, 4 * H2), H2)
    p["lstm2_b"] = u((1, 4 * H2), H2) + u((1, 4 * H2), H2)   # b_ih + b_hh
    # fc3: Linear(128, 64)
    p["fc3_w"] = u((128, 64), 128)
    p["fc3_b"] = u((1, 64), 128)
    # lstm4: LSTM(64, 32)
    H4 = 32
    p["lstm4_wih"] = u((64, 4 * H4), H4)
    p["lstm4_whh"] = u((H4, 4 * H4), H4)
    p["lstm4_b"] = u((1, 4 * H4), H4) + u((1, 4 * H4), H4)   # b_ih + b_hh
    # fc5: Linear(32, output_dim)
    p["fc5_w"] = u((32, output_dim), 32)
    p["fc5_b"] = u((1, output_dim), 32)
    return p


# ---------------------------- pure-JAX reference --------------------------------

def reference_forward(x, p):
    B, T, _ = x.shape

    def lstm_ref(xs, wih, whh, b, H):
        xp = jnp.einsum("btd,dh->bth", xs, wih,
                        preferred_element_type=jnp.float32) + b
        h = jnp.zeros((B, H), jnp.float32)
        c = jnp.zeros((B, H), jnp.float32)
        hs = []
        for t in range(T):
            gates = xp[:, t] + jnp.dot(h, whh,
                                       preferred_element_type=jnp.float32)
            i = jax.nn.sigmoid(gates[:, 0 * H:1 * H])
            f = jax.nn.sigmoid(gates[:, 1 * H:2 * H])
            g = jnp.tanh(gates[:, 2 * H:3 * H])
            o = jax.nn.sigmoid(gates[:, 3 * H:4 * H])
            c = f * c + i * g
            h = o * jnp.tanh(c)
            hs.append(h)
        return jnp.stack(hs, axis=1)

    h = jax.nn.relu(jnp.einsum("btd,dh->bth", x, p["fc1_w"],
                               preferred_element_type=jnp.float32) + p["fc1_b"])
    h = lstm_ref(h, p["lstm2_wih"], p["lstm2_whh"], p["lstm2_b"], 128)
    h = jax.nn.relu(jnp.einsum("btd,dh->bth", h, p["fc3_w"],
                               preferred_element_type=jnp.float32) + p["fc3_b"])
    h = lstm_ref(h, p["lstm4_wih"], p["lstm4_whh"], p["lstm4_b"], 32)
    return jnp.einsum("btd,dh->bth", h, p["fc5_w"],
                      preferred_element_type=jnp.float32) + p["fc5_b"]


# ----------------------------------- main ---------------------------------------

if __name__ == "__main__":
    B, T = 2, 8
    input_dim, output_dim = 16, 4

    key = jax.random.PRNGKey(0)
    key_x, key_p = jax.random.split(key)

    x = jax.random.normal(key_x, (B, T, input_dim), jnp.float32)
    params = init_params(key_p, input_dim, output_dim)

    out = jax.block_until_ready(modele_lstm_nn_forward(x, params))
    ref = jax.block_until_ready(reference_forward(x, params))

    # Kernel uses bf16 MXU operands / f32 accumulation and a bf16 writeback;
    # reference is full f32.
    np.testing.assert_allclose(np.asarray(out), np.asarray(ref),
                               rtol=2e-2, atol=2e-2)

    assert out.shape == (B, T, output_dim)
    print("KERNEL_OK")
</pallas_src>

<mosaic_0001>
module attributes {stable_mosaic.version = 11 : i64} {
  func.func @model_kernel(%arg0: i32, %arg1: memref<8x16x16xbf16, #tpu.memory_space<vmem>>, %arg2: memref<16x32xbf16, #tpu.memory_space<vmem>>, %arg3: memref<1x32xf32, #tpu.memory_space<vmem>>, %arg4: memref<32x512xbf16, #tpu.memory_space<vmem>>, %arg5: memref<128x512xbf16, #tpu.memory_space<vmem>>, %arg6: memref<1x512xf32, #tpu.memory_space<vmem>>, %arg7: memref<128x64xbf16, #tpu.memory_space<vmem>>, %arg8: memref<1x64xf32, #tpu.memory_space<vmem>>, %arg9: memref<64x128xbf16, #tpu.memory_space<vmem>>, %arg10: memref<32x128xbf16, #tpu.memory_space<vmem>>, %arg11: memref<1x128xf32, #tpu.memory_space<vmem>>, %arg12: memref<32x128xbf16, #tpu.memory_space<vmem>>, %arg13: memref<1x128xf32, #tpu.memory_space<vmem>>, %arg14: memref<8x16x128xbf16, #tpu.memory_space<vmem>>, %arg15: memref<8x16x512xf32, #tpu.memory_space<vmem>>, %arg16: memref<8x16x128xf32, #tpu.memory_space<vmem>>, %arg17: memref<8x16x128xf32, #tpu.memory_space<vmem>>, %arg18: memref<8x16x32xf32, #tpu.memory_space<vmem>>) attributes {dimension_semantics = [#tpu.dimension_semantics<parallel>], iteration_bounds = array<i64: 1>, scalar_prefetch = 0 : i64, scratch_operands = 4 : i64, tpu.core_type = #tpu.core_type<tc>, window_params = [{transform_indices = @transform_0, window_bounds = array<i64: 8, 16, 16>}, {pipeline_mode = #tpu.pipeline_mode<synchronous>, transform_indices = @transform_1, window_bounds = array<i64: 16, 32>}, {pipeline_mode = #tpu.pipeline_mode<synchronous>, transform_indices = @transform_2, window_bounds = array<i64: 1, 32>}, {pipeline_mode = #tpu.pipeline_mode<synchronous>, transform_indices = @transform_3, window_bounds = array<i64: 32, 512>}, {pipeline_mode = #tpu.pipeline_mode<synchronous>, transform_indices = @transform_4, window_bounds = array<i64: 128, 512>}, {pipeline_mode = #tpu.pipeline_mode<synchronous>, transform_indices = @transform_5, window_bounds = array<i64: 1, 512>}, {pipeline_mode = #tpu.pipeline_mode<synchronous>, transform_indices = @transform_6, window_bounds = array<i64: 128, 64>}, {pipeline_mode = #tpu.pipeline_mode<synchronous>, transform_indices = @transform_7, window_bounds = array<i64: 1, 64>}, {pipeline_mode = #tpu.pipeline_mode<synchronous>, transform_indices = @transform_8, window_bounds = array<i64: 64, 128>}, {pipeline_mode = #tpu.pipeline_mode<synchronous>, transform_indices = @transform_9, window_bounds = array<i64: 32, 128>}, {pipeline_mode = #tpu.pipeline_mode<synchronous>, transform_indices = @transform_10, window_bounds = array<i64: 1, 128>}, {pipeline_mode = #tpu.pipeline_mode<synchronous>, transform_indices = @transform_11, window_bounds = array<i64: 32, 128>}, {pipeline_mode = #tpu.pipeline_mode<synchronous>, transform_indices = @transform_12, window_bounds = array<i64: 1, 128>}, {transform_indices = @transform_13, window_bounds = array<i64: 8, 16, 128>}]} {
    %c0 = arith.constant 0 : index
    %c0_0 = arith.constant 0 : index
    %c0_1 = arith.constant 0 : index
    %0 = vector.load %arg1[%c0, %c0_0, %c0_1] : memref<8x16x16xbf16, #tpu.memory_space<vmem>>, vector<8x16x16xbf16>
    %1 = vector.shape_cast %0 : vector<8x16x16xbf16> to vector<128x16xbf16>
    %c0_2 = arith.constant 0 : index
    %c0_3 = arith.constant 0 : index
    %2 = vector.load %arg2[%c0_2, %c0_3] : memref<16x32xbf16, #tpu.memory_space<vmem>>, vector<16x32xbf16>
    %cst = arith.constant dense<0.000000e+00> : vector<128x32xf32>
    %3 = tpu.matmul %1, %2, %cst {dimension_numbers = #tpu.dot_dimension_numbers<[1], [0], [0], [1], [0, 0, 1, 1], [], []>} : vector<128x16xbf16>, vector<16x32xbf16>, vector<128x32xf32> -> vector<128x32xf32>
    %c0_4 = arith.constant 0 : index
    %c0_5 = arith.constant 0 : index
    %4 = vector.load %arg3[%c0_4, %c0_5] : memref<1x32xf32, #tpu.memory_space<vmem>>, vector<1x32xf32>
    %5 = vector.broadcast %4 : vector<1x32xf32> to vector<128x32xf32>
    %6 = arith.addf %3, %5 : vector<128x32xf32>
    %cst_6 = arith.constant 0.000000e+00 : f32
    %7 = vector.broadcast %cst_6 : f32 to vector<128x32xf32>
    %8 = arith.maximumf %6, %7 : vector<128x32xf32>
    %9 = tpu.iota {dimensions = array<i32: 1>} : vector<1x512xi32>
    %c256_i32 = arith.constant 256 : i32
    %10 = vector.broadcast %c256_i32 : i32 to vector<1x512xi32>
    %11 = arith.cmpi sge, %9, %10 : vector<1x512xi32>
    %c384_i32 = arith.constant 384 : i32
    %12 = vector.broadcast %c384_i32 : i32 to vector<1x512xi32>
    %13 = arith.cmpi slt, %9, %12 : vector<1x512xi32>
    %14 = arith.andi %11, %13 : vector<1x512xi1>
    %cst_7 = arith.constant 1.000000e+00 : f32
    %cst_8 = arith.constant 5.000000e-01 : f32
    %15 = vector.broadcast %cst_7 : f32 to vector<1x512xf32>
    %16 = vector.broadcast %cst_8 : f32 to vector<1x512xf32>
    %17 = arith.select %14, %15, %16 : vector<1x512xi1>, vector<1x512xf32>
    %cst_9 = arith.constant 0.000000e+00 : f32
    %cst_10 = arith.constant 5.000000e-01 : f32
    %18 = vector.broadcast %cst_9 : f32 to vector<1x512xf32>
    %19 = vector.broadcast %cst_10 : f32 to vector<1x512xf32>
    %20 = arith.select %14, %18, %19 : vector<1x512xi1>, vector<1x512xf32>
    %21 = arith.truncf %8 : vector<128x32xf32> to vector<128x32xbf16>
    %c0_11 = arith.constant 0 : index
    %c0_12 = arith.constant 0 : index
    %22 = vector.load %arg4[%c0_11, %c0_12] : memref<32x512xbf16, #tpu.memory_space<vmem>>, vector<32x512xbf16>
    %cst_13 = arith.constant dense<0.000000e+00> : vector<128x512xf32>
    %23 = tpu.matmul %21, %22, %cst_13 {dimension_numbers = #tpu.dot_dimension_numbers<[1], [0], [0], [1], [0, 0, 1, 1], [], []>} : vector<128x32xbf16>, vector<32x512xbf16>, vector<128x512xf32> -> vector<128x512xf32>
    %c0_14 = arith.constant 0 : index
    %c0_15 = arith.constant 0 : index
    %24 = vector.load %arg6[%c0_14, %c0_15] : memref<1x512xf32, #tpu.memory_space<vmem>>, vector<1x512xf32>
    %25 = vector.broadcast %24 : vector<1x512xf32> to vector<128x512xf32>
    %26 = arith.addf %23, %25 : vector<128x512xf32>
    %27 = vector.broadcast %17 : vector<1x512xf32> to vector<128x512xf32>
    %28 = arith.mulf %26, %27 : vector<128x512xf32>
    %29 = vector.shape_cast %28 : vector<128x512xf32> to vector<8x16x512xf32>
    %c0_16 = arith.constant 0 : index
    %c0_17 = arith.constant 0 : index
    %c0_18 = arith.constant 0 : index
    %30 = vector.load %arg15[%c0_16, %c0_17, %c0_18] : memref<8x16x512xf32, #tpu.memory_space<vmem>>, vector<8x16x512xf32>
    tpu.vector_store %arg15[%c0_16, %c0_17, %c0_18], %29 {strides = array<i32>} : memref<8x16x512xf32, #tpu.memory_space<vmem>>, vector<8x16x512xf32>,
    %c0_19 = arith.constant 0 : index
    %c0_20 = arith.constant 0 : index
    %31 = vector.load %arg5[%c0_19, %c0_20] : memref<128x512xbf16, #tpu.memory_space<vmem>>, vector<128x512xbf16>
    %32 = arith.truncf %17 : vector<1x512xf32> to vector<1x512xbf16>
    %33 = vector.broadcast %32 : vector<1x512xbf16> to vector<128x512xbf16>
    %34 = arith.mulf %31, %33 : vector<128x512xbf16>
    %cst_21 = arith.constant 0.000000e+00 : f32
    %35 = vector.broadcast %cst_21 : f32 to vector<16x128xf32>
    %cst_22 = arith.constant 0.000000e+00 : f32
    %36 = vector.broadcast %cst_22 : f32 to vector<16x128xf32>
    %c0_23 = arith.constant 0 : index
    %c0_24 = arith.constant 0 : index
    %c0_25 = arith.constant 0 : index
    %37 = vector.load %arg15[%c0_23, %c0_24, %c0_25] : memref<8x16x512xf32, #tpu.memory_space<vmem>>, vector<1x16x512xf32>
    %38 = vector.shape_cast %37 : vector<1x16x512xf32> to vector<16x512xf32>
    %39 = arith.truncf %35 : vector<16x128xf32> to vector<16x128xbf16>
    %cst_26 = arith.constant dense<0.000000e+00> : vector<16x512xf32>
    %40 = tpu.matmul %39, %34, %cst_26 {dimension_numbers = #tpu.dot_dimension_numbers<[1], [0], [0], [1], [0, 0, 1, 1], [], []>} : vector<16x128xbf16>, vector<128x512xbf16>, vector<16x512xf32> -> vector<16x512xf32>
    %41 = arith.addf %38, %40 : vector<16x512xf32>
    %42 = math.tanh %41 : vector<16x512xf32>
    %43 = vector.broadcast %17 : vector<1x512xf32> to vector<16x512xf32>
    %44 = arith.mulf %42, %43 : vector<16x512xf32>
    %45 = vector.broadcast %20 : vector<1x512xf32> to vector<16x512xf32>
    %46 = arith.addf %44, %45 : vector<16x512xf32>
    %47 = vector.extract_strided_slice %46 {offsets = [0, 0], sizes = [16, 128], strides = [1, 1]} : vector<16x512xf32> to vector<16x128xf32>
    %48 = vector.extract_strided_slice %46 {offsets = [0, 128], sizes = [16, 128], strides = [1, 1]} : vector<16x512xf32> to vector<16x128xf32>
    %49 = vector.extract_strided_slice %46 {offsets = [0, 256], sizes = [16, 128], strides = [1, 1]} : vector<16x512xf32> to vector<16x128xf32>
    %50 = vector.extract_strided_slice %46 {offsets = [0, 384], sizes = [16, 128], strides = [1, 1]} : vector<16x512xf32> to vector<16x128xf32>
    %51 = arith.mulf %48, %36 : vector<16x128xf32>
    %52 = arith.mulf %47, %49 : vector<16x128xf32>
    %53 = arith.addf %51, %52 : vector<16x128xf32>
    %54 = math.tanh %53 : vector<16x128xf32>
    %55 = arith.mulf %50, %54 : vector<16x128xf32>
    %c0_27 = arith.constant 0 : index
    %c0_28 = arith.constant 0 : index
    %c0_29 = arith.constant 0 : index
    %56 = vector.load %arg16[%c0_27, %c0_28, %c0_29] : memref<8x16x128xf32, #tpu.memory_space<vmem>>, vector<1x16x128xf32>
    %57 = vector.shape_cast %56 : vector<1x16x128xf32> to vector<16x128xf32>
    %58 = vector.shape_cast %55 : vector<16x128xf32> to vector<1x16x128xf32>
    tpu.vector_store %arg16[%c0_27, %c0_28, %c0_29], %58 {strides = array<i32>} : memref<8x16x128xf32, #tpu.memory_space<vmem>>, vector<1x16x128xf32>,
    %c1 = arith.constant 1 : index
    %c0_30 = arith.constant 0 : index
    %c0_31 = arith.constant 0 : index
    %59 = vector.load %arg15[%c1, %c0_30, %c0_31] : memref<8x16x512xf32, #tpu.memory_space<vmem>>, vector<1x16x512xf32>
    %60 = vector.shape_cast %59 : vector<1x16x512xf32> to vector<16x512xf32>
    %61 = arith.truncf %55 : vector<16x128xf32> to vector<16x128xbf16>
    %cst_32 = arith.constant dense<0.000000e+00> : vector<16x512xf32>
    %62 = tpu.matmul %61, %34, %cst_32 {dimension_numbers = #tpu.dot_dimension_numbers<[1], [0], [0], [1], [0, 0, 1, 1], [], []>} : vector<16x128xbf16>, vector<128x512xbf16>, vector<16x512xf32> -> vector<16x512xf32>
    %63 = arith.addf %60, %62 : vector<16x512xf32>
    %64 = math.tanh %63 : vector<16x512xf32>
    %65 = vector.broadcast %17 : vector<1x512xf32> to vector<16x512xf32>
    %66 = arith.mulf %64, %65 : vector<16x512xf32>
    %67 = vector.broadcast %20 : vector<1x512xf32> to vector<16x512xf32>
    %68 = arith.addf %66, %67 : vector<16x512xf32>
    %69 = vector.extract_strided_slice %68 {offsets = [0, 0], sizes = [16, 128], strides = [1, 1]} : vector<16x512xf32> to vector<16x128xf32>
    %70 = vector.extract_strided_slice %68 {offsets = [0, 128], sizes = [16, 128], strides = [1, 1]} : vector<16x512xf32> to vector<16x128xf32>
    %71 = vector.extract_strided_slice %68 {offsets = [0, 256], sizes = [16, 128], strides = [1, 1]} : vector<16x512xf32> to vector<16x128xf32>
    %72 = vector.extract_strided_slice %68 {offsets = [0, 384], sizes = [16, 128], strides = [1, 1]} : vector<16x512xf32> to vector<16x128xf32>
    %73 = arith.mulf %70, %53 : vector<16x128xf32>
    %74 = arith.mulf %69, %71 : vector<16x128xf32>
    %75 = arith.addf %73, %74 : vector<16x128xf32>
    %76 = math.tanh %75 : vector<16x128xf32>
    %77 = arith.mulf %72, %76 : vector<16x128xf32>
    %c1_33 = arith.constant 1 : index
    %c0_34 = arith.constant 0 : index
    %c0_35 = arith.constant 0 : index
    %78 = vector.load %arg16[%c1_33, %c0_34, %c0_35] : memref<8x16x128xf32, #tpu.memory_space<vmem>>, vector<1x16x128xf32>
    %79 = vector.shape_cast %78 : vector<1x16x128xf32> to vector<16x128xf32>
    %80 = vector.shape_cast %77 : vector<16x128xf32> to vector<1x16x128xf32>
    tpu.vector_store %arg16[%c1_33, %c0_34, %c0_35], %80 {strides = array<i32>} : memref<8x16x128xf32, #tpu.memory_space<vmem>>, vector<1x16x128xf32>,
    %c2 = arith.constant 2 : index
    %c0_36 = arith.constant 0 : index
    %c0_37 = arith.constant 0 : index
    %81 = vector.load %arg15[%c2, %c0_36, %c0_37] : memref<8x16x512xf32, #tpu.memory_space<vmem>>, vector<1x16x512xf32>
    %82 = vector.shape_cast %81 : vector<1x16x512xf32> to vector<16x512xf32>
    %83 = arith.truncf %77 : vector<16x128xf32> to vector<16x128xbf16>
    %cst_38 = arith.constant dense<0.000000e+00> : vector<16x512xf32>
    %84 = tpu.matmul %83, %34, %cst_38 {dimension_numbers = #tpu.dot_dimension_numbers<[1], [0], [0], [1], [0, 0, 1, 1], [], []>} : vector<16x128xbf16>, vector<128x512xbf16>, vector<16x512xf32> -> vector<16x512xf32>
    %85 = arith.addf %82, %84 : vector<16x512xf32>
    %86 = math.tanh %85 : vector<16x512xf32>
    %87 = vector.broadcast %17 : vector<1x512xf32> to vector<16x512xf32>
    %88 = arith.mulf %86, %87 : vector<16x512xf32>
    %89 = vector.broadcast %20 : vector<1x512xf32> to vector<16x512xf32>
    %90 = arith.addf %88, %89 : vector<16x512xf32>
    %91 = vector.extract_strided_slice %90 {offsets = [0, 0], sizes = [16, 128], strides = [1, 1]} : vector<16x512xf32> to vector<16x128xf32>
    %92 = vector.extract_strided_slice %90 {offsets = [0, 128], sizes = [16, 128], strides = [1, 1]} : vector<16x512xf32> to vector<16x128xf32>
    %93 = vector.extract_strided_slice %90 {offsets = [0, 256], sizes = [16, 128], strides = [1, 1]} : vector<16x512xf32> to vector<16x128xf32>
    %94 = vector.extract_strided_slice %90 {offsets = [0, 384], sizes = [16, 128], strides = [1, 1]} : vector<16x512xf32> to vector<16x128xf32>
    %95 = arith.mulf %92, %75 : vector<16x128xf32>
    %96 = arith.mulf %91, %93 : vector<16x128xf32>
    %97 = arith.addf %95, %96 : vector<16x128xf32>
    %98 = math.tanh %97 : vector<16x128xf32>
    %99 = arith.mulf %94, %98 : vector<16x128xf32>
    %c2_39 = arith.constant 2 : index
    %c0_40 = arith.constant 0 : index
    %c0_41 = arith.constant 0 : index
    %100 = vector.load %arg16[%c2_39, %c0_40, %c0_41] : memref<8x16x128xf32, #tpu.memory_space<vmem>>, vector<1x16x128xf32>
    %101 = vector.shape_cast %100 : vector<1x16x128xf32> to vector<16x128xf32>
    %102 = vector.shape_cast %99 : vector<16x128xf32> to vector<1x16x128xf32>
    tpu.vector_store %arg16[%c2_39, %c0_40, %c0_41], %102 {strides = array<i32>} : memref<8x16x128xf32, #tpu.memory_space<vmem>>, vector<1x16x128xf32>,
    %c3 = arith.constant 3 : index
    %c0_42 = arith.constant 0 : index
    %c0_43 = arith.constant 0 : index
    %103 = vector.load %arg15[%c3, %c0_42, %c0_43] : memref<8x16x512xf32, #tpu.memory_space<vmem>>, vector<1x16x512xf32>
    %104 = vector.shape_cast %103 : vector<1x16x512xf32> to vector<16x512xf32>
    %105 = arith.truncf %99 : vector<16x128xf32> to vector<16x128xbf16>
    %cst_44 = arith.constant dense<0.000000e+00> : vector<16x512xf32>
    %106 = tpu.matmul %105, %34, %cst_44 {dimension_numbers = #tpu.dot_dimension_numbers<[1], [0], [0], [1], [0, 0, 1, 1], [], []>} : vector<16x128xbf16>, vector<128x512xbf16>, vector<16x512xf32> -> vector<16x512xf32>
    %107 = arith.addf %104, %106 : vector<16x512xf32>
    %108 = math.tanh %107 : vector<16x512xf32>
    %109 = vector.broadcast %17 : vector<1x512xf32> to vector<16x512xf32>
    %110 = arith.mulf %108, %109 : vector<16x512xf32>
    %111 = vector.broadcast %20 : vector<1x512xf32> to vector<16x512xf32>
    %112 = arith.addf %110, %111 : vector<16x512xf32>
    %113 = vector.extract_strided_slice %112 {offsets = [0, 0], sizes = [16, 128], strides = [1, 1]} : vector<16x512xf32> to vector<16x128xf32>
    %114 = vector.extract_strided_slice %112 {offsets = [0, 128], sizes = [16, 128], strides = [1, 1]} : vector<16x512xf32> to vector<16x128xf32>
    %115 = vector.extract_strided_slice %112 {offsets = [0, 256], sizes = [16, 128], strides = [1, 1]} : vector<16x512xf32> to vector<16x128xf32>
    %116 = vector.extract_strided_slice %112 {offsets = [0, 384], sizes = [16, 128], strides = [1, 1]} : vector<16x512xf32> to vector<16x128xf32>
    %117 = arith.mulf %114, %97 : vector<16x128xf32>
    %118 = arith.mulf %113, %115 : vector<16x128xf32>
    %119 = arith.addf %117, %118 : vector<16x128xf32>
    %120 = math.tanh %119 : vector<16x128xf32>
    %121 = arith.mulf %116, %120 : vector<16x128xf32>
    %c3_45 = arith.constant 3 : index
    %c0_46 = arith.constant 0 : index
    %c0_47 = arith.constant 0 : index
    %122 = vector.load %arg16[%c3_45, %c0_46, %c0_47] : memref<8x16x128xf32, #tpu.memory_space<vmem>>, vector<1x16x128xf32>
    %123 = vector.shape_cast %122 : vector<1x16x128xf32> to vector<16x128xf32>
    %124 = vector.shape_cast %121 : vector<16x128xf32> to vector<1x16x128xf32>
    tpu.vector_store %arg16[%c3_45, %c0_46, %c0_47], %124 {strides = array<i32>} : memref<8x16x128xf32, #tpu.memory_space<vmem>>, vector<1x16x128xf32>,
    %c4 = arith.constant 4 : index
    %c0_48 = arith.constant 0 : index
    %c0_49 = arith.constant 0 : index
    %125 = vector.load %arg15[%c4, %c0_48, %c0_49] : memref<8x16x512xf32, #tpu.memory_space<vmem>>, vector<1x16x512xf32>
    %126 = vector.shape_cast %125 : vector<1x16x512xf32> to vector<16x512xf32>
    %127 = arith.truncf %121 : vector<16x128xf32> to vector<16x128xbf16>
    %cst_50 = arith.constant dense<0.000000e+00> : vector<16x512xf32>
    %128 = tpu.matmul %127, %34, %cst_50 {dimension_numbers = #tpu.dot_dimension_numbers<[1], [0], [0], [1], [0, 0, 1, 1], [], []>} : vector<16x128xbf16>, vector<128x512xbf16>, vector<16x512xf32> -> vector<16x512xf32>
    %129 = arith.addf %126, %128 : vector<16x512xf32>
    %130 = math.tanh %129 : vector<16x512xf32>
    %131 = vector.broadcast %17 : vector<1x512xf32> to vector<16x512xf32>
    %132 = arith.mulf %130, %131 : vector<16x512xf32>
    %133 = vector.broadcast %20 : vector<1x512xf32> to vector<16x512xf32>
    %134 = arith.addf %132, %133 : vector<16x512xf32>
    %135 = vector.extract_strided_slice %134 {offsets = [0, 0], sizes = [16, 128], strides = [1, 1]} : vector<16x512xf32> to vector<16x128xf32>
    %136 = vector.extract_strided_slice %134 {offsets = [0, 128], sizes = [16, 128], strides = [1, 1]} : vector<16x512xf32> to vector<16x128xf32>
    %137 = vector.extract_strided_slice %134 {offsets = [0, 256], sizes = [16, 128], strides = [1, 1]} : vector<16x512xf32> to vector<16x128xf32>
    %138 = vector.extract_strided_slice %134 {offsets = [0, 384], sizes = [16, 128], strides = [1, 1]} : vector<16x512xf32> to vector<16x128xf32>
    %139 = arith.mulf %136, %119 : vector<16x128xf32>
    %140 = arith.mulf %135, %137 : vector<16x128xf32>
    %141 = arith.addf %139, %140 : vector<16x128xf32>
    %142 = math.tanh %141 : vector<16x128xf32>
    %143 = arith.mulf %138, %142 : vector<16x128xf32>
    %c4_51 = arith.constant 4 : index
    %c0_52 = arith.constant 0 : index
    %c0_53 = arith.constant 0 : index
    %144 = vector.load %arg16[%c4_51, %c0_52, %c0_53] : memref<8x16x128xf32, #tpu.memory_space<vmem>>, vector<1x16x128xf32>
    %145 = vector.shape_cast %144 : vector<1x16x128xf32> to vector<16x128xf32>
    %146 = vector.shape_cast %143 : vector<16x128xf32> to vector<1x16x128xf32>
    tpu.vector_store %arg16[%c4_51, %c0_52, %c0_53], %146 {strides = array<i32>} : memref<8x16x128xf32, #tpu.memory_space<vmem>>, vector<1x16x128xf32>,
    %c5 = arith.constant 5 : index
    %c0_54 = arith.constant 0 : index
    %c0_55 = arith.constant 0 : index
    %147 = vector.load %arg15[%c5, %c0_54, %c0_55] : memref<8x16x512xf32, #tpu.memory_space<vmem>>, vector<1x16x512xf32>
    %148 = vector.shape_cast %147 : vector<1x16x512xf32> to vector<16x512xf32>
    %149 = arith.truncf %143 : vector<16x128xf32> to vector<16x128xbf16>
    %cst_56 = arith.constant dense<0.000000e+00> : vector<16x512xf32>
    %150 = tpu.matmul %149, %34, %cst_56 {dimension_numbers = #tpu.dot_dimension_numbers<[1], [0], [0], [1], [0, 0, 1, 1], [], []>} : vector<16x128xbf16>, vector<128x512xbf16>, vector<16x512xf32> -> vector<16x512xf32>
    %151 = arith.addf %148, %150 : vector<16x512xf32>
    %152 = math.tanh %151 : vector<16x512xf32>
    %153 = vector.broadcast %17 : vector<1x512xf32> to vector<16x512xf32>
    %154 = arith.mulf %152, %153 : vector<16x512xf32>
    %155 = vector.broadcast %20 : vector<1x512xf32> to vector<16x512xf32>
    %156 = arith.addf %154, %155 : vector<16x512xf32>
    %157 = vector.extract_strided_slice %156 {offsets = [0, 0], sizes = [16, 128], strides = [1, 1]} : vector<16x512xf32> to vector<16x128xf32>
    %158 = vector.extract_strided_slice %156 {offsets = [0, 128], sizes = [16, 128], strides = [1, 1]} : vector<16x512xf32> to vector<16x128xf32>
    %159 = vector.extract_strided_slice %156 {offsets = [0, 256], sizes = [16, 128], strides = [1, 1]} : vector<16x512xf32> to vector<16x128xf32>
    %160 = vector.extract_strided_slice %156 {offsets = [0, 384], sizes = [16, 128], strides = [1, 1]} : vector<16x512xf32> to vector<16x128xf32>
    %161 = arith.mulf %158, %141 : vector<16x128xf32>
    %162 = arith.mulf %157, %159 : vector<16x128xf32>
    %163 = arith.addf %161, %162 : vector<16x128xf32>
    %164 = math.tanh %163 : vector<16x128xf32>
    %165 = arith.mulf %160, %164 : vector<16x128xf32>
    %c5_57 = arith.constant 5 : index
    %c0_58 = arith.constant 0 : index
    %c0_59 = arith.constant 0 : index
    %166 = vector.load %arg16[%c5_57, %c0_58, %c0_59] : memref<8x16x128xf32, #tpu.memory_space<vmem>>, vector<1x16x128xf32>
    %167 = vector.shape_cast %166 : vector<1x16x128xf32> to vector<16x128xf32>
    %168 = vector.shape_cast %165 : vector<16x128xf32> to vector<1x16x128xf32>
    tpu.vector_store %arg16[%c5_57, %c0_58, %c0_59], %168 {strides = array<i32>} : memref<8x16x128xf32, #tpu.memory_space<vmem>>, vector<1x16x128xf32>,
    %c6 = arith.constant 6 : index
    %c0_60 = arith.constant 0 : index
    %c0_61 = arith.constant 0 : index
    %169 = vector.load %arg15[%c6, %c0_60, %c0_61] : memref<8x16x512xf32, #tpu.memory_space<vmem>>, vector<1x16x512xf32>
    %170 = vector.shape_cast %169 : vector<1x16x512xf32> to vector<16x512xf32>
    %171 = arith.truncf %165 : vector<16x128xf32> to vector<16x128xbf16>
    %cst_62 = arith.constant dense<0.000000e+00> : vector<16x512xf32>
    %172 = tpu.matmul %171, %34, %cst_62 {dimension_numbers = #tpu.dot_dimension_numbers<[1], [0], [0], [1], [0, 0, 1, 1], [], []>} : vector<16x128xbf16>, vector<128x512xbf16>, vector<16x512xf32> -> vector<16x512xf32>
    %173 = arith.addf %170, %172 : vector<16x512xf32>
    %174 = math.tanh %173 : vector<16x512xf32>
    %175 = vector.broadcast %17 : vector<1x512xf32> to vector<16x512xf32>
    %176 = arith.mulf %174, %175 : vector<16x512xf32>
    %177 = vector.broadcast %20 : vector<1x512xf32> to vector<16x512xf32>
    %178 = arith.addf %176, %177 : vector<16x512xf32>
    %179 = vector.extract_strided_slice %178 {offsets = [0, 0], sizes = [16, 128], strides = [1, 1]} : vector<16x512xf32> to vector<16x128xf32>
    %180 = vector.extract_strided_slice %178 {offsets = [0, 128], sizes = [16, 128], strides = [1, 1]} : vector<16x512xf32> to vector<16x128xf32>
    %181 = vector.extract_strided_slice %178 {offsets = [0, 256], sizes = [16, 128], strides = [1, 1]} : vector<16x512xf32> to vector<16x128xf32>
    %182 = vector.extract_strided_slice %178 {offsets = [0, 384], sizes = [16, 128], strides = [1, 1]} : vector<16x512xf32> to vector<16x128xf32>
    %183 = arith.mulf %180, %163 : vector<16x128xf32>
    %184 = arith.mulf %179, %181 : vector<16x128xf32>
    %185 = arith.addf %183, %184 : vector<16x128xf32>
    %186 = math.tanh %185 : vector<16x128xf32>
    %187 = arith.mulf %182, %186 : vector<16x128xf32>
    %c6_63 = arith.constant 6 : index
    %c0_64 = arith.constant 0 : index
    %c0_65 = arith.constant 0 : index
    %188 = vector.load %arg16[%c6_63, %c0_64, %c0_65] : memref<8x16x128xf32, #tpu.memory_space<vmem>>, vector<1x16x128xf32>
    %189 = vector.shape_cast %188 : vector<1x16x128xf32> to vector<16x128xf32>
    %190 = vector.shape_cast %187 : vector<16x128xf32> to vector<1x16x128xf32>
    tpu.vector_store %arg16[%c6_63, %c0_64, %c0_65], %190 {strides = array<i32>} : memref<8x16x128xf32, #tpu.memory_space<vmem>>, vector<1x16x128xf32>,
    %c7 = arith.constant 7 : index
    %c0_66 = arith.constant 0 : index
    %c0_67 = arith.constant 0 : index
    %191 = vector.load %arg15[%c7, %c0_66, %c0_67] : memref<8x16x512xf32, #tpu.memory_space<vmem>>, vector<1x16x512xf32>
    %192 = vector.shape_cast %191 : vector<1x16x512xf32> to vector<16x512xf32>
    %193 = arith.truncf %187 : vector<16x128xf32> to vector<16x128xbf16>
    %cst_68 = arith.constant dense<0.000000e+00> : vector<16x512xf32>
    %194 = tpu.matmul %193, %34, %cst_68 {dimension_numbers = #tpu.dot_dimension_numbers<[1], [0], [0], [1], [0, 0, 1, 1], [], []>} : vector<16x128xbf16>, vector<128x512xbf16>, vector<16x512xf32> -> vector<16x512xf32>
    %195 = arith.addf %192, %194 : vector<16x512xf32>
    %196 = math.tanh %195 : vector<16x512xf32>
    %197 = vector.broadcast %17 : vector<1x512xf32> to vector<16x512xf32>
    %198 = arith.mulf %196, %197 : vector<16x512xf32>
    %199 = vector.broadcast %20 : vector<1x512xf32> to vector<16x512xf32>
    %200 = arith.addf %198, %199 : vector<16x512xf32>
    %201 = vector.extract_strided_slice %200 {offsets = [0, 0], sizes = [16, 128], strides = [1, 1]} : vector<16x512xf32> to vector<16x128xf32>
    %202 = vector.extract_strided_slice %200 {offsets = [0, 128], sizes = [16, 128], strides = [1, 1]} : vector<16x512xf32> to vector<16x128xf32>
    %203 = vector.extract_strided_slice %200 {offsets = [0, 256], sizes = [16, 128], strides = [1, 1]} : vector<16x512xf32> to vector<16x128xf32>
    %204 = vector.extract_strided_slice %200 {offsets = [0, 384], sizes = [16, 128], strides = [1, 1]} : vector<16x512xf32> to vector<16x128xf32>
    %205 = arith.mulf %202, %185 : vector<16x128xf32>
    %206 = arith.mulf %201, %203 : vector<16x128xf32>
    %207 = arith.addf %205, %206 : vector<16x128xf32>
    %208 = math.tanh %207 : vector<16x128xf32>
    %209 = arith.mulf %204, %208 : vector<16x128xf32>
    %c7_69 = arith.constant 7 : index
    %c0_70 = arith.constant 0 : index
    %c0_71 = arith.constant 0 : index
    %210 = vector.load %arg16[%c7_69, %c0_70, %c0_71] : memref<8x16x128xf32, #tpu.memory_space<vmem>>, vector<1x16x128xf32>
    %211 = vector.shape_cast %210 : vector<1x16x128xf32> to vector<16x128xf32>
    %212 = vector.shape_cast %209 : vector<16x128xf32> to vector<1x16x128xf32>
    tpu.vector_store %arg16[%c7_69, %c0_70, %c0_71], %212 {strides = array<i32>} : memref<8x16x128xf32, #tpu.memory_space<vmem>>, vector<1x16x128xf32>,
    %c0_72 = arith.constant 0 : index
    %c0_73 = arith.constant 0 : index
    %c0_74 = arith.constant 0 : index
    %213 = vector.load %arg16[%c0_72, %c0_73, %c0_74] : memref<8x16x128xf32, #tpu.memory_space<vmem>>, vector<8x16x128xf32>
    %214 = vector.shape_cast %213 : vector<8x16x128xf32> to vector<128x128xf32>
    %215 = arith.truncf %214 : vector<128x128xf32> to vector<128x128xbf16>
    %c0_75 = arith.constant 0 : index
    %c0_76 = arith.constant 0 : index
    %216 = vector.load %arg7[%c0_75, %c0_76] : memref<128x64xbf16, #tpu.memory_space<vmem>>, vector<128x64xbf16>
    %cst_77 = arith.constant dense<0.000000e+00> : vector<128x64xf32>
    %217 = tpu.matmul %215, %216, %cst_77 {dimension_numbers = #tpu.dot_dimension_numbers<[1], [0], [0], [1], [0, 0, 1, 1], [], []>} : vector<128x128xbf16>, vector<128x64xbf16>, vector<128x64xf32> -> vector<128x64xf32>
    %c0_78 = arith.constant 0 : index
    %c0_79 = arith.constant 0 : index
    %218 = vector.load %arg8[%c0_78, %c0_79] : memref<1x64xf32, #tpu.memory_space<vmem>>, vector<1x64xf32>
    %219 = vector.broadcast %218 : vector<1x64xf32> to vector<128x64xf32>
    %220 = arith.addf %217, %219 : vector<128x64xf32>
    %cst_80 = arith.constant 0.000000e+00 : f32
    %221 = vector.broadcast %cst_80 : f32 to vector<128x64xf32>
    %222 = arith.maximumf %220, %221 : vector<128x64xf32>
    %223 = tpu.iota {dimensions = array<i32: 1>} : vector<1x128xi32>
    %c64_i32 = arith.constant 64 : i32
    %224 = vector.broadcast %c64_i32 : i32 to vector<1x128xi32>
    %225 = arith.cmpi sge, %223, %224 : vector<1x128xi32>
    %c96_i32 = arith.constant 96 : i32
    %226 = vector.broadcast %c96_i32 : i32 to vector<1x128xi32>
    %227 = arith.cmpi slt, %223, %226 : vector<1x128xi32>
    %228 = arith.andi %225, %227 : vector<1x128xi1>
    %cst_81 = arith.constant 1.000000e+00 : f32
    %cst_82 = arith.constant 5.000000e-01 : f32
    %229 = vector.broadcast %cst_81 : f32 to vector<1x128xf32>
    %230 = vector.broadcast %cst_82 : f32 to vector<1x128xf32>
    %231 = arith.select %228, %229, %230 : vector<1x128xi1>, vector<1x128xf32>
    %cst_83 = arith.constant 0.000000e+00 : f32
    %cst_84 = arith.constant 5.000000e-01 : f32
    %232 = vector.broadcast %cst_83 : f32 to vector<1x128xf32>
    %233 = vector.broadcast %cst_84 : f32 to vector<1x128xf32>
    %234 = arith.select %228, %232, %233 : vector<1x128xi1>, vector<1x128xf32>
    %235 = arith.truncf %222 : vector<128x64xf32> to vector<128x64xbf16>
    %c0_85 = arith.constant 0 : index
    %c0_86 = arith.constant 0 : index
    %236 = vector.load %arg9[%c0_85, %c0_86] : memref<64x128xbf16, #tpu.memory_space<vmem>>, vector<64x128xbf16>
    %cst_87 = arith.constant dense<0.000000e+00> : vector<128x128xf32>
    %237 = tpu.matmul %235, %236, %cst_87 {dimension_numbers = #tpu.dot_dimension_numbers<[1], [0], [0], [1], [0, 0, 1, 1], [], []>} : vector<128x64xbf16>, vector<64x128xbf16>, vector<128x128xf32> -> vector<128x128xf32>
    %c0_88 = arith.constant 0 : index
    %c0_89 = arith.constant 0 : index
    %238 = vector.load %arg11[%c0_88, %c0_89] : memref<1x128xf32, #tpu.memory_space<vmem>>, vector<1x128xf32>
    %239 = vector.broadcast %238 : vector<1x128xf32> to vector<128x128xf32>
    %240 = arith.addf %237, %239 : vector<128x128xf32>
    %241 = vector.broadcast %231 : vector<1x128xf32> to vector<128x128xf32>
    %242 = arith.mulf %240, %241 : vector<128x128xf32>
    %243 = vector.shape_cast %242 : vector<128x128xf32> to vector<8x16x128xf32>
    %c0_90 = arith.constant 0 : index
    %c0_91 = arith.constant 0 : index
    %c0_92 = arith.constant 0 : index
    %244 = vector.load %arg17[%c0_90, %c0_91, %c0_92] : memref<8x16x128xf32, #tpu.memory_space<vmem>>, vector<8x16x128xf32>
    tpu.vector_store %arg17[%c0_90, %c0_91, %c0_92], %243 {strides = array<i32>} : memref<8x16x128xf32, #tpu.memory_space<vmem>>, vector<8x16x128xf32>,
    %c0_93 = arith.constant 0 : index
    %c0_94 = arith.constant 0 : index
    %245 = vector.load %arg10[%c0_93, %c0_94] : memref<32x128xbf16, #tpu.memory_space<vmem>>, vector<32x128xbf16>
    %246 = arith.truncf %231 : vector<1x128xf32> to vector<1x128xbf16>
    %247 = vector.broadcast %246 : vector<1x128xbf16> to vector<32x128xbf16>
    %248 = arith.mulf %245, %247 : vector<32x128xbf16>
    %cst_95 = arith.constant 0.000000e+00 : f32
    %249 = vector.broadcast %cst_95 : f32 to vector<16x32xf32>
    %cst_96 = arith.constant 0.000000e+00 : f32
    %250 = vector.broadcast %cst_96 : f32 to vector<16x32xf32>
    %c0_97 = arith.constant 0 : index
    %c0_98 = arith.constant 0 : index
    %c0_99 = arith.constant 0 : index
    %251 = vector.load %arg17[%c0_97, %c0_98, %c0_99] : memref<8x16x128xf32, #tpu.memory_space<vmem>>, vector<1x16x128xf32>
    %252 = vector.shape_cast %251 : vector<1x16x128xf32> to vector<16x128xf32>
    %253 = arith.truncf %249 : vector<16x32xf32> to vector<16x32xbf16>
    %cst_100 = arith.constant dense<0.000000e+00> : vector<16x128xf32>
    %254 = tpu.matmul %253, %248, %cst_100 {dimension_numbers = #tpu.dot_dimension_numbers<[1], [0], [0], [1], [0, 0, 1, 1], [], []>} : vector<16x32xbf16>, vector<32x128xbf16>, vector<16x128xf32> -> vector<16x128xf32>
    %255 = arith.addf %252, %254 : vector<16x128xf32>
    %256 = math.tanh %255 : vector<16x128xf32>
    %257 = vector.broadcast %231 : vector<1x128xf32> to vector<16x128xf32>
    %258 = arith.mulf %256, %257 : vector<16x128xf32>
    %259 = vector.broadcast %234 : vector<1x128xf32> to vector<16x128xf32>
    %260 = arith.addf %258, %259 : vector<16x128xf32>
    %261 = vector.extract_strided_slice %260 {offsets = [0, 0], sizes = [16, 32], strides = [1, 1]} : vector<16x128xf32> to vector<16x32xf32>
    %262 = vector.extract_strided_slice %260 {offsets = [0, 32], sizes = [16, 32], strides = [1, 1]} : vector<16x128xf32> to vector<16x32xf32>
    %263 = vector.extract_strided_slice %260 {offsets = [0, 64], sizes = [16, 32], strides = [1, 1]} : vector<16x128xf32> to vector<16x32xf32>
    %264 = vector.extract_strided_slice %260 {offsets = [0, 96], sizes = [16, 32], strides = [1, 1]} : vector<16x128xf32> to vector<16x32xf32>
    %265 = arith.mulf %262, %250 : vector<16x32xf32>
    %266 = arith.mulf %261, %263 : vector<16x32xf32>
    %267 = arith.addf %265, %266 : vector<16x32xf32>
    %268 = math.tanh %267 : vector<16x32xf32>
    %269 = arith.mulf %264, %268 : vector<16x32xf32>
    %c0_101 = arith.constant 0 : index
    %c0_102 = arith.constant 0 : index
    %c0_103 = arith.constant 0 : index
    %270 = vector.load %arg18[%c0_101, %c0_102, %c0_103] : memref<8x16x32xf32, #tpu.memory_space<vmem>>, vector<1x16x32xf32>
    %271 = vector.shape_cast %270 : vector<1x16x32xf32> to vector<16x32xf32>
    %272 = vector.shape_cast %269 : vector<16x32xf32> to vector<1x16x32xf32>
    tpu.vector_store %arg18[%c0_101, %c0_102, %c0_103], %272 {strides = array<i32>} : memref<8x16x32xf32, #tpu.memory_space<vmem>>, vector<1x16x32xf32>,
    %c1_104 = arith.constant 1 : index
    %c0_105 = arith.constant 0 : index
    %c0_106 = arith.constant 0 : index
    %273 = vector.load %arg17[%c1_104, %c0_105, %c0_106] : memref<8x16x128xf32, #tpu.memory_space<vmem>>, vector<1x16x128xf32>
    %274 = vector.shape_cast %273 : vector<1x16x128xf32> to vector<16x128xf32>
    %275 = arith.truncf %269 : vector<16x32xf32> to vector<16x32xbf16>
    %cst_107 = arith.constant dense<0.000000e+00> : vector<16x128xf32>
    %276 = tpu.matmul %275, %248, %cst_107 {dimension_numbers = #tpu.dot_dimension_numbers<[1], [0], [0], [1], [0, 0, 1, 1], [], []>} : vector<16x32xbf16>, vector<32x128xbf16>, vector<16x128xf32> -> vector<16x128xf32>
    %277 = arith.addf %274, %276 : vector<16x128xf32>
    %278 = math.tanh %277 : vector<16x128xf32>
    %279 = vector.broadcast %231 : vector<1x128xf32> to vector<16x128xf32>
    %280 = arith.mulf %278, %279 : vector<16x128xf32>
    %281 = vector.broadcast %234 : vector<1x128xf32> to vector<16x128xf32>
    %282 = arith.addf %280, %281 : vector<16x128xf32>
    %283 = vector.extract_strided_slice %282 {offsets = [0, 0], sizes = [16, 32], strides = [1, 1]} : vector<16x128xf32> to vector<16x32xf32>
    %284 = vector.extract_strided_slice %282 {offsets = [0, 32], sizes = [16, 32], strides = [1, 1]} : vector<16x128xf32> to vector<16x32xf32>
    %285 = vector.extract_strided_slice %282 {offsets = [0, 64], sizes = [16, 32], strides = [1, 1]} : vector<16x128xf32> to vector<16x32xf32>
    %286 = vector.extract_strided_slice %282 {offsets = [0, 96], sizes = [16, 32], strides = [1, 1]} : vector<16x128xf32> to vector<16x32xf32>
    %287 = arith.mulf %284, %267 : vector<16x32xf32>
    %288 = arith.mulf %283, %285 : vector<16x32xf32>
    %289 = arith.addf %287, %288 : vector<16x32xf32>
    %290 = math.tanh %289 : vector<16x32xf32>
    %291 = arith.mulf %286, %290 : vector<16x32xf32>
    %c1_108 = arith.constant 1 : index
    %c0_109 = arith.constant 0 : index
    %c0_110 = arith.constant 0 : index
    %292 = vector.load %arg18[%c1_108, %c0_109, %c0_110] : memref<8x16x32xf32, #tpu.memory_space<vmem>>, vector<1x16x32xf32>
    %293 = vector.shape_cast %292 : vector<1x16x32xf32> to vector<16x32xf32>
    %294 = vector.shape_cast %291 : vector<16x32xf32> to vector<1x16x32xf32>
    tpu.vector_store %arg18[%c1_108, %c0_109, %c0_110], %294 {strides = array<i32>} : memref<8x16x32xf32, #tpu.memory_space<vmem>>, vector<1x16x32xf32>,
    %c2_111 = arith.constant 2 : index
    %c0_112 = arith.constant 0 : index
    %c0_113 = arith.constant 0 : index
    %295 = vector.load %arg17[%c2_111, %c0_112, %c0_113] : memref<8x16x128xf32, #tpu.memory_space<vmem>>, vector<1x16x128xf32>
    %296 = vector.shape_cast %295 : vector<1x16x128xf32> to vector<16x128xf32>
    %297 = arith.truncf %291 : vector<16x32xf32> to vector<16x32xbf16>
    %cst_114 = arith.constant dense<0.000000e+00> : vector<16x128xf32>
    %298 = tpu.matmul %297, %248, %cst_114 {dimension_numbers = #tpu.dot_dimension_numbers<[1], [0], [0], [1], [0, 0, 1, 1], [], []>} : vector<16x32xbf16>, vector<32x128xbf16>, vector<16x128xf32> -> vector<16x128xf32>
    %299 = arith.addf %296, %298 : vector<16x128xf32>
    %300 = math.tanh %299 : vector<16x128xf32>
    %301 = vector.broadcast %231 : vector<1x128xf32> to vector<16x128xf32>
    %302 = arith.mulf %300, %301 : vector<16x128xf32>
    %303 = vector.broadcast %234 : vector<1x128xf32> to vector<16x128xf32>
    %304 = arith.addf %302, %303 : vector<16x128xf32>
    %305 = vector.extract_strided_slice %304 {offsets = [0, 0], sizes = [16, 32], strides = [1, 1]} : vector<16x128xf32> to vector<16x32xf32>
    %306 = vector.extract_strided_slice %304 {offsets = [0, 32], sizes = [16, 32], strides = [1, 1]} : vector<16x128xf32> to vector<16x32xf32>
    %307 = vector.extract_strided_slice %304 {offsets = [0, 64], sizes = [16, 32], strides = [1, 1]} : vector<16x128xf32> to vector<16x32xf32>
    %308 = vector.extract_strided_slice %304 {offsets = [0, 96], sizes = [16, 32], strides = [1, 1]} : vector<16x128xf32> to vector<16x32xf32>
    %309 = arith.mulf %306, %289 : vector<16x32xf32>
    %310 = arith.mulf %305, %307 : vector<16x32xf32>
    %311 = arith.addf %309, %310 : vector<16x32xf32>
    %312 = math.tanh %311 : vector<16x32xf32>
    %313 = arith.mulf %308, %312 : vector<16x32xf32>
    %c2_115 = arith.constant 2 : index
    %c0_116 = arith.constant 0 : index
    %c0_117 = arith.constant 0 : index
    %314 = vector.load %arg18[%c2_115, %c0_116, %c0_117] : memref<8x16x32xf32, #tpu.memory_space<vmem>>, vector<1x16x32xf32>
    %315 = vector.shape_cast %314 : vector<1x16x32xf32> to vector<16x32xf32>
    %316 = vector.shape_cast %313 : vector<16x32xf32> to vector<1x16x32xf32>
    tpu.vector_store %arg18[%c2_115, %c0_116, %c0_117], %316 {strides = array<i32>} : memref<8x16x32xf32, #tpu.memory_space<vmem>>, vector<1x16x32xf32>,
    %c3_118 = arith.constant 3 : index
    %c0_119 = arith.constant 0 : index
    %c0_120 = arith.constant 0 : index
    %317 = vector.load %arg17[%c3_118, %c0_119, %c0_120] : memref<8x16x128xf32, #tpu.memory_space<vmem>>, vector<1x16x128xf32>
    %318 = vector.shape_cast %317 : vector<1x16x128xf32> to vector<16x128xf32>
    %319 = arith.truncf %313 : vector<16x32xf32> to vector<16x32xbf16>
    %cst_121 = arith.constant dense<0.000000e+00> : vector<16x128xf32>
    %320 = tpu.matmul %319, %248, %cst_121 {dimension_numbers = #tpu.dot_dimension_numbers<[1], [0], [0], [1], [0, 0, 1, 1], [], []>} : vector<16x32xbf16>, vector<32x128xbf16>, vector<16x128xf32> -> vector<16x128xf32>
    %321 = arith.addf %318, %320 : vector<16x128xf32>
    %322 = math.tanh %321 : vector<16x128xf32>
    %323 = vector.broadcast %231 : vector<1x128xf32> to vector<16x128xf32>
    %324 = arith.mulf %322, %323 : vector<16x128xf32>
    %325 = vector.broadcast %234 : vector<1x128xf32> to vector<16x128xf32>
    %326 = arith.addf %324, %325 : vector<16x128xf32>
    %327 = vector.extract_strided_slice %326 {offsets = [0, 0], sizes = [16, 32], strides = [1, 1]} : vector<16x128xf32> to vector<16x32xf32>
    %328 = vector.extract_strided_slice %326 {offsets = [0, 32], sizes = [16, 32], strides = [1, 1]} : vector<16x128xf32> to vector<16x32xf32>
    %329 = vector.extract_strided_slice %326 {offsets = [0, 64], sizes = [16, 32], strides = [1, 1]} : vector<16x128xf32> to vector<16x32xf32>
    %330 = vector.extract_strided_slice %326 {offsets = [0, 96], sizes = [16, 32], strides = [1, 1]} : vector<16x128xf32> to vector<16x32xf32>
    %331 = arith.mulf %328, %311 : vector<16x32xf32>
    %332 = arith.mulf %327, %329 : vector<16x32xf32>
    %333 = arith.addf %331, %332 : vector<16x32xf32>
    %334 = math.tanh %333 : vector<16x32xf32>
    %335 = arith.mulf %330, %334 : vector<16x32xf32>
    %c3_122 = arith.constant 3 : index
    %c0_123 = arith.constant 0 : index
    %c0_124 = arith.constant 0 : index
    %336 = vector.load %arg18[%c3_122, %c0_123, %c0_124] : memref<8x16x32xf32, #tpu.memory_space<vmem>>, vector<1x16x32xf32>
    %337 = vector.shape_cast %336 : vector<1x16x32xf32> to vector<16x32xf32>
    %338 = vector.shape_cast %335 : vector<16x32xf32> to vector<1x16x32xf32>
    tpu.vector_store %arg18[%c3_122, %c0_123, %c0_124], %338 {strides = array<i32>} : memref<8x16x32xf32, #tpu.memory_space<vmem>>, vector<1x16x32xf32>,
    %c4_125 = arith.constant 4 : index
    %c0_126 = arith.constant 0 : index
    %c0_127 = arith.constant 0 : index
    %339 = vector.load %arg17[%c4_125, %c0_126, %c0_127] : memref<8x16x128xf32, #tpu.memory_space<vmem>>, vector<1x16x128xf32>
    %340 = vector.shape_cast %339 : vector<1x16x128xf32> to vector<16x128xf32>
    %341 = arith.truncf %335 : vector<16x32xf32> to vector<16x32xbf16>
    %cst_128 = arith.constant dense<0.000000e+00> : vector<16x128xf32>
    %342 = tpu.matmul %341, %248, %cst_128 {dimension_numbers = #tpu.dot_dimension_numbers<[1], [0], [0], [1], [0, 0, 1, 1], [], []>} : vector<16x32xbf16>, vector<32x128xbf16>, vector<16x128xf32> -> vector<16x128xf32>
    %343 = arith.addf %340, %342 : vector<16x128xf32>
    %344 = math.tanh %343 : vector<16x128xf32>
    %345 = vector.broadcast %231 : vector<1x128xf32> to vector<16x128xf32>
    %346 = arith.mulf %344, %345 : vector<16x128xf32>
    %347 = vector.broadcast %234 : vector<1x128xf32> to vector<16x128xf32>
    %348 = arith.addf %346, %347 : vector<16x128xf32>
    %349 = vector.extract_strided_slice %348 {offsets = [0, 0], sizes = [16, 32], strides = [1, 1]} : vector<16x128xf32> to vector<16x32xf32>
    %350 = vector.extract_strided_slice %348 {offsets = [0, 32], sizes = [16, 32], strides = [1, 1]} : vector<16x128xf32> to vector<16x32xf32>
    %351 = vector.extract_strided_slice %348 {offsets = [0, 64], sizes = [16, 32], strides = [1, 1]} : vector<16x128xf32> to vector<16x32xf32>
    %352 = vector.extract_strided_slice %348 {offsets = [0, 96], sizes = [16, 32], strides = [1, 1]} : vector<16x128xf32> to vector<16x32xf32>
    %353 = arith.mulf %350, %333 : vector<16x32xf32>
    %354 = arith.mulf %349, %351 : vector<16x32xf32>
    %355 = arith.addf %353, %354 : vector<16x32xf32>
    %356 = math.tanh %355 : vector<16x32xf32>
    %357 = arith.mulf %352, %356 : vector<16x32xf32>
    %c4_129 = arith.constant 4 : index
    %c0_130 = arith.constant 0 : index
    %c0_131 = arith.constant 0 : index
    %358 = vector.load %arg18[%c4_129, %c0_130, %c0_131] : memref<8x16x32xf32, #tpu.memory_space<vmem>>, vector<1x16x32xf32>
    %359 = vector.shape_cast %358 : vector<1x16x32xf32> to vector<16x32xf32>
    %360 = vector.shape_cast %357 : vector<16x32xf32> to vector<1x16x32xf32>
    tpu.vector_store %arg18[%c4_129, %c0_130, %c0_131], %360 {strides = array<i32>} : memref<8x16x32xf32, #tpu.memory_space<vmem>>, vector<1x16x32xf32>,
    %c5_132 = arith.constant 5 : index
    %c0_133 = arith.constant 0 : index
    %c0_134 = arith.constant 0 : index
    %361 = vector.load %arg17[%c5_132, %c0_133, %c0_134] : memref<8x16x128xf32, #tpu.memory_space<vmem>>, vector<1x16x128xf32>
    %362 = vector.shape_cast %361 : vector<1x16x128xf32> to vector<16x128xf32>
    %363 = arith.truncf %357 : vector<16x32xf32> to vector<16x32xbf16>
    %cst_135 = arith.constant dense<0.000000e+00> : vector<16x128xf32>
    %364 = tpu.matmul %363, %248, %cst_135 {dimension_numbers = #tpu.dot_dimension_numbers<[1], [0], [0], [1], [0, 0, 1, 1], [], []>} : vector<16x32xbf16>, vector<32x128xbf16>, vector<16x128xf32> -> vector<16x128xf32>
    %365 = arith.addf %362, %364 : vector<16x128xf32>
    %366 = math.tanh %365 : vector<16x128xf32>
    %367 = vector.broadcast %231 : vector<1x128xf32> to vector<16x128xf32>
    %368 = arith.mulf %366, %367 : vector<16x128xf32>
    %369 = vector.broadcast %234 : vector<1x128xf32> to vector<16x128xf32>
    %370 = arith.addf %368, %369 : vector<16x128xf32>
    %371 = vector.extract_strided_slice %370 {offsets = [0, 0], sizes = [16, 32], strides = [1, 1]} : vector<16x128xf32> to vector<16x32xf32>
    %372 = vector.extract_strided_slice %370 {offsets = [0, 32], sizes = [16, 32], strides = [1, 1]} : vector<16x128xf32> to vector<16x32xf32>
    %373 = vector.extract_strided_slice %370 {offsets = [0, 64], sizes = [16, 32], strides = [1, 1]} : vector<16x128xf32> to vector<16x32xf32>
    %374 = vector.extract_strided_slice %370 {offsets = [0, 96], sizes = [16, 32], strides = [1, 1]} : vector<16x128xf32> to vector<16x32xf32>
    %375 = arith.mulf %372, %355 : vector<16x32xf32>
    %376 = arith.mulf %371, %373 : vector<16x32xf32>
    %377 = arith.addf %375, %376 : vector<16x32xf32>
    %378 = math.tanh %377 : vector<16x32xf32>
    %379 = arith.mulf %374, %378 : vector<16x32xf32>
    %c5_136 = arith.constant 5 : index
    %c0_137 = arith.constant 0 : index
    %c0_138 = arith.constant 0 : index
    %380 = vector.load %arg18[%c5_136, %c0_137, %c0_138] : memref<8x16x32xf32, #tpu.memory_space<vmem>>, vector<1x16x32xf32>
    %381 = vector.shape_cast %380 : vector<1x16x32xf32> to vector<16x32xf32>
    %382 = vector.shape_cast %379 : vector<16x32xf32> to vector<1x16x32xf32>
    tpu.vector_store %arg18[%c5_136, %c0_137, %c0_138], %382 {strides = array<i32>} : memref<8x16x32xf32, #tpu.memory_space<vmem>>, vector<1x16x32xf32>,
    %c6_139 = arith.constant 6 : index
    %c0_140 = arith.constant 0 : index
    %c0_141 = arith.constant 0 : index
    %383 = vector.load %arg17[%c6_139, %c0_140, %c0_141] : memref<8x16x128xf32, #tpu.memory_space<vmem>>, vector<1x16x128xf32>
    %384 = vector.shape_cast %383 : vector<1x16x128xf32> to vector<16x128xf32>
    %385 = arith.truncf %379 : vector<16x32xf32> to vector<16x32xbf16>
    %cst_142 = arith.constant dense<0.000000e+00> : vector<16x128xf32>
    %386 = tpu.matmul %385, %248, %cst_142 {dimension_numbers = #tpu.dot_dimension_numbers<[1], [0], [0], [1], [0, 0, 1, 1], [], []>} : vector<16x32xbf16>, vector<32x128xbf16>, vector<16x128xf32> -> vector<16x128xf32>
    %387 = arith.addf %384, %386 : vector<16x128xf32>
    %388 = math.tanh %387 : vector<16x128xf32>
    %389 = vector.broadcast %231 : vector<1x128xf32> to vector<16x128xf32>
    %390 = arith.mulf %388, %389 : vector<16x128xf32>
    %391 = vector.broadcast %234 : vector<1x128xf32> to vector<16x128xf32>
    %392 = arith.addf %390, %391 : vector<16x128xf32>
    %393 = vector.extract_strided_slice %392 {offsets = [0, 0], sizes = [16, 32], strides = [1, 1]} : vector<16x128xf32> to vector<16x32xf32>
    %394 = vector.extract_strided_slice %392 {offsets = [0, 32], sizes = [16, 32], strides = [1, 1]} : vector<16x128xf32> to vector<16x32xf32>
    %395 = vector.extract_strided_slice %392 {offsets = [0, 64], sizes = [16, 32], strides = [1, 1]} : vector<16x128xf32> to vector<16x32xf32>
    %396 = vector.extract_strided_slice %392 {offsets = [0, 96], sizes = [16, 32], strides = [1, 1]} : vector<16x128xf32> to vector<16x32xf32>
    %397 = arith.mulf %394, %377 : vector<16x32xf32>
    %398 = arith.mulf %393, %395 : vector<16x32xf32>
    %399 = arith.addf %397, %398 : vector<16x32xf32>
    %400 = math.tanh %399 : vector<16x32xf32>
    %401 = arith.mulf %396, %400 : vector<16x32xf32>
    %c6_143 = arith.constant 6 : index
    %c0_144 = arith.constant 0 : index
    %c0_145 = arith.constant 0 : index
    %402 = vector.load %arg18[%c6_143, %c0_144, %c0_145] : memref<8x16x32xf32, #tpu.memory_space<vmem>>, vector<1x16x32xf32>
    %403 = vector.shape_cast %402 : vector<1x16x32xf32> to vector<16x32xf32>
    %404 = vector.shape_cast %401 : vector<16x32xf32> to vector<1x16x32xf32>
    tpu.vector_store %arg18[%c6_143, %c0_144, %c0_145], %404 {strides = array<i32>} : memref<8x16x32xf32, #tpu.memory_space<vmem>>, vector<1x16x32xf32>,
    %c7_146 = arith.constant 7 : index
    %c0_147 = arith.constant 0 : index
    %c0_148 = arith.constant 0 : index
    %405 = vector.load %arg17[%c7_146, %c0_147, %c0_148] : memref<8x16x128xf32, #tpu.memory_space<vmem>>, vector<1x16x128xf32>
    %406 = vector.shape_cast %405 : vector<1x16x128xf32> to vector<16x128xf32>
    %407 = arith.truncf %401 : vector<16x32xf32> to vector<16x32xbf16>
    %cst_149 = arith.constant dense<0.000000e+00> : vector<16x128xf32>
    %408 = tpu.matmul %407, %248, %cst_149 {dimension_numbers = #tpu.dot_dimension_numbers<[1], [0], [0], [1], [0, 0, 1, 1], [], []>} : vector<16x32xbf16>, vector<32x128xbf16>, vector<16x128xf32> -> vector<16x128xf32>
    %409 = arith.addf %406, %408 : vector<16x128xf32>
    %410 = math.tanh %409 : vector<16x128xf32>
    %411 = vector.broadcast %231 : vector<1x128xf32> to vector<16x128xf32>
    %412 = arith.mulf %410, %411 : vector<16x128xf32>
    %413 = vector.broadcast %234 : vector<1x128xf32> to vector<16x128xf32>
    %414 = arith.addf %412, %413 : vector<16x128xf32>
    %415 = vector.extract_strided_slice %414 {offsets = [0, 0], sizes = [16, 32], strides = [1, 1]} : vector<16x128xf32> to vector<16x32xf32>
    %416 = vector.extract_strided_slice %414 {offsets = [0, 32], sizes = [16, 32], strides = [1, 1]} : vector<16x128xf32> to vector<16x32xf32>
    %417 = vector.extract_strided_slice %414 {offsets = [0, 64], sizes = [16, 32], strides = [1, 1]} : vector<16x128xf32> to vector<16x32xf32>
    %418 = vector.extract_strided_slice %414 {offsets = [0, 96], sizes = [16, 32], strides = [1, 1]} : vector<16x128xf32> to vector<16x32xf32>
    %419 = arith.mulf %416, %399 : vector<16x32xf32>
    %420 = arith.mulf %415, %417 : vector<16x32xf32>
    %421 = arith.addf %419, %420 : vector<16x32xf32>
    %422 = math.tanh %421 : vector<16x32xf32>
    %423 = arith.mulf %418, %422 : vector<16x32xf32>
    %c7_150 = arith.constant 7 : index
    %c0_151 = arith.constant 0 : index
    %c0_152 = arith.constant 0 : index
    %424 = vector.load %arg18[%c7_150, %c0_151, %c0_152] : memref<8x16x32xf32, #tpu.memory_space<vmem>>, vector<1x16x32xf32>
    %425 = vector.shape_cast %424 : vector<1x16x32xf32> to vector<16x32xf32>
    %426 = vector.shape_cast %423 : vector<16x32xf32> to vector<1x16x32xf32>
    tpu.vector_store %arg18[%c7_150, %c0_151, %c0_152], %426 {strides = array<i32>} : memref<8x16x32xf32, #tpu.memory_space<vmem>>, vector<1x16x32xf32>,
    %c0_153 = arith.constant 0 : index
    %c0_154 = arith.constant 0 : index
    %c0_155 = arith.constant 0 : index
    %427 = vector.load %arg18[%c0_153, %c0_154, %c0_155] : memref<8x16x32xf32, #tpu.memory_space<vmem>>, vector<8x16x32xf32>
    %428 = vector.shape_cast %427 : vector<8x16x32xf32> to vector<128x32xf32>
    %429 = arith.truncf %428 : vector<128x32xf32> to vector<128x32xbf16>
    %c0_156 = arith.constant 0 : index
    %c0_157 = arith.constant 0 : index
    %430 = vector.load %arg12[%c0_156, %c0_157] : memref<32x128xbf16, #tpu.memory_space<vmem>>, vector<32x128xbf16>
    %cst_158 = arith.constant dense<0.000000e+00> : vector<128x128xf32>
    %431 = tpu.matmul %429, %430, %cst_158 {dimension_numbers = #tpu.dot_dimension_numbers<[1], [0], [0], [1], [0, 0, 1, 1], [], []>} : vector<128x32xbf16>, vector<32x128xbf16>, vector<128x128xf32> -> vector<128x128xf32>
    %c0_159 = arith.constant 0 : index
    %c0_160 = arith.constant 0 : index
    %432 = vector.load %arg13[%c0_159, %c0_160] : memref<1x128xf32, #tpu.memory_space<vmem>>, vector<1x128xf32>
    %433 = vector.broadcast %432 : vector<1x128xf32> to vector<128x128xf32>
    %434 = arith.addf %431, %433 : vector<128x128xf32>
    %435 = vector.shape_cast %434 : vector<128x128xf32> to vector<8x16x128xf32>
    %436 = arith.truncf %435 : vector<8x16x128xf32> to vector<8x16x128xbf16>
    %c0_161 = arith.constant 0 : index
    %c0_162 = arith.constant 0 : index
    %c0_163 = arith.constant 0 : index
    %437 = vector.load %arg14[%c0_161, %c0_162, %c0_163] : memref<8x16x128xbf16, #tpu.memory_space<vmem>>, vector<8x16x128xbf16>
    tpu.vector_store %arg14[%c0_161, %c0_162, %c0_163], %436 {strides = array<i32>} : memref<8x16x128xbf16, #tpu.memory_space<vmem>>, vector<8x16x128xbf16>,
    return
  }
  func.func @transform_0(%arg0: i32) -> (i32, i32, i32) {
    %c0_i32 = arith.constant 0 : i32
    %c0_i32_0 = arith.constant 0 : i32
    %c0_i32_1 = arith.constant 0 : i32
    return %c0_i32, %arg0, %c0_i32_0 : i32, i32, i32
  }
  func.func @transform_1(%arg0: i32) -> (i32, i32) {
    %c0_i32 = arith.constant 0 : i32
    %c0_i32_0 = arith.constant 0 : i32
    %c0_i32_1 = arith.constant 0 : i32
    return %c0_i32, %c0_i32_0 : i32, i32
  }
  func.func @transform_2(%arg0: i32) -> (i32, i32) {
    %c0_i32 = arith.constant 0 : i32
    %c0_i32_0 = arith.constant 0 : i32
    %c0_i32_1 = arith.constant 0 : i32
    return %c0_i32, %c0_i32_0 : i32, i32
  }
  func.func @transform_3(%arg0: i32) -> (i32, i32) {
    %c0_i32 = arith.constant 0 : i32
    %c0_i32_0 = arith.constant 0 : i32
    %c0_i32_1 = arith.constant 0 : i32
    return %c0_i32, %c0_i32_0 : i32, i32
  }
  func.func @transform_4(%arg0: i32) -> (i32, i32) {
    %c0_i32 = arith.constant 0 : i32
    %c0_i32_0 = arith.constant 0 : i32
    %c0_i32_1 = arith.constant 0 : i32
    return %c0_i32, %c0_i32_0 : i32, i32
  }
  func.func @transform_5(%arg0: i32) -> (i32, i32) {
    %c0_i32 = arith.constant 0 : i32
    %c0_i32_0 = arith.constant 0 : i32
    %c0_i32_1 = arith.constant 0 : i32
    return %c0_i32, %c0_i32_0 : i32, i32
  }
  func.func @transform_6(%arg0: i32) -> (i32, i32) {
    %c0_i32 = arith.constant 0 : i32
    %c0_i32_0 = arith.constant 0 : i32
    %c0_i32_1 = arith.constant 0 : i32
    return %c0_i32, %c0_i32_0 : i32, i32
  }
  func.func @transform_7(%arg0: i32) -> (i32, i32) {
    %c0_i32 = arith.constant 0 : i32
    %c0_i32_0 = arith.constant 0 : i32
    %c0_i32_1 = arith.constant 0 : i32
    return %c0_i32, %c0_i32_0 : i32, i32
  }
  func.func @transform_8(%arg0: i32) -> (i32, i32) {
    %c0_i32 = arith.constant 0 : i32
    %c0_i32_0 = arith.constant 0 : i32
    %c0_i32_1 = arith.constant 0 : i32
    return %c0_i32, %c0_i32_0 : i32, i32
  }
  func.func @transform_9(%arg0: i32) -> (i32, i32) {
    %c0_i32 = arith.constant 0 : i32
    %c0_i32_0 = arith.constant 0 : i32
    %c0_i32_1 = arith.constant 0 : i32
    return %c0_i32, %c0_i32_0 : i32, i32
  }
  func.func @transform_10(%arg0: i32) -> (i32, i32) {
    %c0_i32 = arith.constant 0 : i32
    %c0_i32_0 = arith.constant 0 : i32
    %c0_i32_1 = arith.constant 0 : i32
    return %c0_i32, %c0_i32_0 : i32, i32
  }
  func.func @transform_11(%arg0: i32) -> (i32, i32) {
    %c0_i32 = arith.constant 0 : i32
    %c0_i32_0 = arith.constant 0 : i32
    %c0_i32_1 = arith.constant 0 : i32
    return %c0_i32, %c0_i32_0 : i32, i32
  }
  func.func @transform_12(%arg0: i32) -> (i32, i32) {
    %c0_i32 = arith.constant 0 : i32
    %c0_i32_0 = arith.constant 0 : i32
    %c0_i32_1 = arith.constant 0 : i32
    return %c0_i32, %c0_i32_0 : i32, i32
  }
  func.func @transform_13(%arg0: i32) -> (i32, i32, i32) {
    %c0_i32 = arith.constant 0 : i32
    %c0_i32_0 = arith.constant 0 : i32
    %c0_i32_1 = arith.constant 0 : i32
    return %c0_i32, %arg0, %c0_i32_0 : i32, i32, i32
  }
}

</mosaic_0001>

<bundles_post_ra>
// kernel: tpu_custom_call.1
= control target key start
LH: loop header
LB: loop body
LE: loop exit
PB: predicated region body
PF: predicated region fallthrough
CT: control target
= control target key end

     0   :  { %18 = vsyncpa [#allocation7], 0  ;;  %s5042_s0 = inlined_call_operand.vmem [shape: bf16[8,16,16], index: 0, kind: input, shape index: {}]   ;;  %s5043_s1 = inlined_call_operand.hbm [shape: bf16[16,32], index: 1, kind: input, shape index: {}]   ;;  %s5044_s2 = inlined_call_operand.vmem [shape: f32[1,32], index: 2, kind: input, shape index: {}]   ;;  %s5045_s3 = inlined_call_operand.hbm [shape: bf16[32,512], index: 3, kind: input, shape index: {}]   ;;  %s5046_s4 = inlined_call_operand.hbm [shape: bf16[128,512], index: 4, kind: input, shape index: {}]   ;;  %s5047_s5 = inlined_call_operand.hbm [shape: f32[1,512], index: 5, kind: input, shape index: {}]   ;;  %s5048_s6 = inlined_call_operand.vmem [shape: bf16[128,64], index: 6, kind: input, shape index: {}]   ;;  %s5049_s7 = inlined_call_operand.vmem [shape: f32[1,64], index: 7, kind: input, shape index: {}]   ;;  %s5050_s8 = inlined_call_operand.vmem [shape: bf16[64,128], index: 8, kind: input, shape index: {}]   ;;  %s5051_s9 = inlined_call_operand.hbm [shape: bf16[32,128], index: 9, kind: input, shape index: {}]   ;;  %s5052_s10 = inlined_call_operand.vmem [shape: f32[1,128], index: 10, kind: input, shape index: {}]   ;;  %s5053_s11 = inlined_call_operand.hbm [shape: bf16[32,128], index: 11, kind: input, shape index: {}]   ;;  %s5054_s12 = inlined_call_operand.vmem [shape: f32[1,128], index: 12, kind: input, shape index: {}]   ;;  %s5055_s13 = inlined_call_operand.hbm [shape: bf16[8,16,128], index: 13, kind: output, shape index: {}]  }
   0x1   :  { %19 = vsyncpa [#allocation10], 0 }
   0x2   :  { %20 = vsyncpa [#allocation13], 0 }
   0x3   :  { %21 = vsyncpa [#allocation16], 0  ;;  %s44_s27 = sshll.u32 %s5045_s3, 4  ;;  %s45_s27 = int_to_ptr.hbm [resolvable:$true] %s44_s27 }
   0x4   :  { %22 = vsyncpa [#allocation8], 0  ;;  %s3665_s28 = smov [#allocation9]   ;;  %s71_s15 = sshll.u32 %s5047_s5, 4  ;;  %s72_s15 = int_to_ptr.hbm [resolvable:$true] %s71_s15 }
   0x5   :  { %s46_s29 = sshll.u32 %s3665_s28, 4  ;;  %s3666_s16 = smov 256   ;;  %s47_s29 = int_to_ptr.vmem [resolvable:$true] %s46_s29 }
   0x6   :  { %s3667_s17 = smov 16   ;;  %s3668_s18 = smov [#allocation12]  }
   0x7   :  { %52 = dma.hbm_to_vmem [thread:$0]  %s45_s27, 1024, %s47_s29, [#allocation10], %s3666_s16, %s3666_s16, %s3667_s17  }
   0x8   :  { %s73_s19 = sshll.u32 %s3668_s18, 4  ;;  %s29_s22 = sshll.u32 %s5043_s1, 4  ;;  %s74_s19 = int_to_ptr.vmem [resolvable:$true] %s73_s19  ;;  %s30_s22 = int_to_ptr.hbm [resolvable:$true] %s29_s22 }
   0x9   :  { %76 = dma.hbm_to_vmem [thread:$0]  %s72_s15, 64, %s74_s19, [#allocation13]  }
   0xa   :  { %s3669_s3 = smov [#allocation6]   ;;  %s57_s5 = sshll.u32 %s5046_s4, 4  ;;  %s58_s5 = int_to_ptr.hbm [resolvable:$true] %s57_s5 }
   0xb   :  { %s31_s23 = sshll.u32 %s3669_s3, 4  ;;  %s3670_s26 = smov 64   ;;  %s32_s23 = int_to_ptr.vmem [resolvable:$true] %s31_s23 }
   0xc   :  { %s3671_s28 = smov 4   ;;  %s3672_s27 = smov [#allocation11]  }
   0xd   :  { %37 = dma.hbm_to_vmem [thread:$0]  %s30_s22, 128, %s32_s23, [#allocation7], %s3670_s26, %s3670_s26, %s3671_s28  }
   0xe   :  { %s59_s29 = sshll.u32 %s3672_s27, 4  ;;  %s87_s14 = sshll.u32 %s5051_s9, 4  ;;  %s60_s29 = int_to_ptr.vmem [resolvable:$true] %s59_s29  ;;  %s88_s14 = int_to_ptr.hbm [resolvable:$true] %s87_s14 }
   0xf   :  { %65 = dma.hbm_to_vmem [thread:$0]  %s58_s5, 4096, %s60_s29, [#allocation10], %s3666_s16, %s3666_s16, %s3667_s17  }
  0x10   :  { %s102_s4 = sshll.u32 %s5053_s11, 4  ;;  %s3673_s19 = smov [#allocation14]   ;;  %s103_s4 = int_to_ptr.hbm [resolvable:$true] %s102_s4 }
  0x11   :  { %s89_s20 = sshll.u32 %s3673_s19, 4  ;;  %s3674_s21 = smov [#allocation15]   ;;  %s90_s20 = int_to_ptr.vmem [resolvable:$true] %s89_s20 }
  0x12   :  { %95 = dma.hbm_to_vmem [thread:$0]  %s88_s14, 256, %s90_s20, [#allocation13], %s3670_s26, %s3670_s26, %s3671_s28  }
  0x13   :  { %s104_s22 = sshll.u32 %s3674_s21, 4  ;;  %s105_s22 = int_to_ptr.vmem [resolvable:$true] %s104_s22 }
  0x14   :  { %110 = dma.hbm_to_vmem [thread:$0]  %s103_s4, 256, %s105_s22, [#allocation16], %s3670_s26, %s3670_s26, %s3671_s28  }
  0x15   :  { %3655 = dma.done.wait [#allocation7], 128  }
  0x16   :  { %3656 = vsyncadd [#allocation7], 4294967168 }
  0x17   :  { %3657 = dma.done.wait [#allocation10], 5120  }
  0x18   :  { %3658 = vsyncadd [#allocation10], 4294962176 }
  0x19   :  { %3659 = dma.done.wait [#allocation13], 320  }
  0x1a   :  { %3660 = vsyncadd [#allocation13], 4294966976 }
  0x1b   :  { %3661 = dma.done.wait [#allocation16], 256  }
  0x1c   :  { %3662 = vsyncadd [#allocation16], 4294967040  ;;  %v3155_v0 = vld [vmem:[#allocation6] sm:$0xff]  ;;  %vm206_vm0 = vcmask 130048   ;;  %v3148_v2 = vld [vmem:[%s5042_s0 + $0x8] sm:$0xff]  ;;  %vm387_vm1 = vcmask 261120  }
  0x1d   :  { %v3147_v1 = vld [vmem:[%s5042_s0] sm:$0xff]  ;;  %238 = vmatpush.bf16.msra.mxu0 %v3155_v0  ;;  %v3149_v3 = vld [vmem:[%s5042_s0 + $0x10] sm:$0xff]  ;;  %v3150_v4 = vld [vmem:[%s5042_s0 + $0x18] sm:$0xff]  ;;  %v3675_v45 = vmov 0.5|0.5   ;;  %vm2025_vm5 = vcmask 523264  }
  0x1e   :  { %v3151_v5 = vld [vmem:[%s5042_s0 + $0x20] sm:$0xff]  ;;  %v3152_v6 = vld [vmem:[%s5042_s0 + $0x28] sm:$0xff]  ;;  %v3153_v7 = vld [vmem:[%s5042_s0 + $0x30] sm:$0xff]  ;;  %v3833_v46 = vunpack.c.h.bf16 %v3675_v45  ;;  %s2912_s16 = sshll.u32 %s5055_s13, 4  ;;  %s2913_s16 = int_to_ptr.hbm [resolvable:$true] %s2912_s16 }
  0x1f   :  { %v2990_v8 = vld [vmem:[#allocation9 + $0x20] sm:$0xf]  ;;  %v3162_v9 = vld [vmem:[#allocation9 + $0x2c] sm:$0xf0]  ;;  %v3160_v10 = vld [vmem:[#allocation9 + $0x24] sm:$0xf] }
  0x20   :  { %2964 = vmatmul.msk.bf16.vlgmr.msra.gmra.mxu0 %vm206_vm0, %v3147_v1  ;;  %v2991_v11 = vor.u32 %v3162_v9, %v2990_v8  ;;  %v2992_v12 = vld [vmem:[#allocation9 + $0x30] sm:$0xf0]  ;;  %v3161_v13 = vld [vmem:[#allocation9 + $0x2c] sm:$0xf]  ;;  %v3000_v14 = vld [vmem:[#allocation9 + $0x38] sm:$0xf0] }
  0x21   :  { %v2995_v15 = vor.u32 %v3160_v10, %v2992_v12  ;;  %v3003_v16 = vor.u32 %v3161_v13, %v3000_v14  ;;  %v2974_v17 = vld [vmem:[#allocation9] sm:$0xf]  ;;  %v3158_v18 = vld [vmem:[#allocation9 + $0xc] sm:$0xf0]  ;;  %v3156_v19 = vld [vmem:[#allocation9 + $0x4] sm:$0xf] }
  0x22   :  { %418 = vmatpush.bf16.msra.mxu1 %v2991_v11  ;;  %v2975_v20 = vor.u32 %v3158_v18, %v2974_v17  ;;  %v2976_v21 = vld [vmem:[#allocation9 + $0x10] sm:$0xf0]  ;;  %v3157_v22 = vld [vmem:[#allocation9 + $0xc] sm:$0xf]  ;;  %v2984_v23 = vld [vmem:[#allocation9 + $0x18] sm:$0xf0] }
  0x23   :  { %467 = vmatpush.bf16.msra.mxu2 %v2995_v15  ;;  %565 = vmatpush.bf16.msrb.mxu0 %v3003_v16  ;;  %v2979_v24 = vor.u32 %v3156_v19, %v2976_v21  ;;  %v2987_v25 = vor.u32 %v3157_v22, %v2984_v23  ;;  %v3154_v26 = vld [vmem:[%s5042_s0 + $0x38] sm:$0xff]  ;;  %v3812_v28 = vld [vmem:[%s5044_s2] ss:$0 sm:$0xff]  ;;  %v3826_v40 = vld [vmem:[#allocation11 + $0xe0] sm:$0xff] }
  0x24   :  { %3242 = vmatpush.bf16.msra.mxu3 %v2995_v15  ;;  %v3828_v41 = vld [vmem:[#allocation11 + $0xf0] sm:$0xff]  ;;  %v827_v43 = vunpack.c.h.bf16 %v3826_v40  ;;  %v3839_v50 = vld [vmem:[#allocation11 + $0xc0] sm:$0xff] }
  0x25   :  { %v831_v44 = vunpack.c.h.bf16 %v3828_v41  ;;  %v3841_v51 = vld [vmem:[#allocation11 + $0xd0] sm:$0xff]  ;;  %v819_v53 = vunpack.c.h.bf16 %v3839_v50  ;;  %v3856_v58 = vld [vmem:[#allocation11 + $0xa0] sm:$0xff] }
  0x26   :  { %419 = vmatpush.bf16.msra.mxu1 %v2975_v20  ;;  %v895_v48 = vmul.f32 %v3833_v46, %v827_v43  ;;  %v823_v54 = vunpack.c.h.bf16 %v3841_v51  ;;  %v3858_v59 = vld [vmem:[#allocation11 + $0xb0] sm:$0xff]  ;;  %v811_v61 = vunpack.c.h.bf16 %v3856_v58  ;;  %v3880_v12 = vld [vmem:[#allocation11 + $0x60] sm:$0xff] }
  0x27   :  { %468 = vmatpush.bf16.msra.mxu2 %v2979_v24  ;;  %566 = vmatpush.bf16.msrb.mxu0 %v2987_v25  ;;  %v899_v49 = vmul.f32 %v3833_v46, %v831_v44  ;;  %v887_v56 = vmul.f32 %v3833_v46, %v819_v53  ;;  %v815_v62 = vunpack.c.h.bf16 %v3858_v59  ;;  %v3882_v13 = vld [vmem:[#allocation11 + $0x70] sm:$0xff]  ;;  %v795_v16 = vunpack.c.h.bf16 %v3880_v12  ;;  %v3893_v21 = vld [vmem:[#allocation11 + $0x40] sm:$0xff] }
  0x28   :  { %3243 = vmatpush.bf16.msra.mxu3 %v2979_v24  ;;  %v891_v57 = vmul.f32 %v3833_v46, %v823_v54  ;;  %v879_v63 = vmul.f32 %v3833_v46, %v811_v61  ;;  %v799_v17 = vunpack.c.h.bf16 %v3882_v13  ;;  %v3895_v22 = vld [vmem:[#allocation11 + $0x50] sm:$0xff]  ;;  %v787_v24 = vunpack.c.h.bf16 %v3893_v21 }
  0x29   :  { %v3847_v52 = vpack.c.bf16 %v899_v49, %v895_v48  ;;  %v883_v0 = vmul.f32 %v3833_v46, %v815_v62  ;;  %v863_v19 = vmul.f32 %v3833_v46, %v795_v16  ;;  %v791_v25 = vunpack.c.h.bf16 %v3895_v22 }
  0x2a   :  { %v3860_v60 = vpack.c.bf16 %v891_v57, %v887_v56  ;;  %v867_v20 = vmul.f32 %v3833_v46, %v799_v17  ;;  %v810_v16 = vunpack.c.l.bf16 %v3856_v58  ;;  %v814_v17 = vunpack.c.l.bf16 %v3858_v59 }
  0x2b   :  { %956 = vmatpush.bf16.msrb.mxu2 %v3847_v52 }
  0x2c   :  { %v3901_v23 = vpack.c.bf16 %v867_v20, %v863_v19 }
  0x2f   :  { %957 = vmatpush.bf16.msrb.mxu2 %v3860_v60 }
  0x30   :  { %2965 = vmatmul.msk.bf16.gmra.mxu0 %vm206_vm0, %v3148_v2  ;;  %v3868_v2 = vld [vmem:[#allocation11 + $0x80] sm:$0xff] }
  0x31   :  { %v802_v58 = vunpack.c.l.bf16 %v3868_v2 }
  0x40   :  { %2966 = vmatmul.msk.bf16.gmra.mxu0 %vm206_vm0, %v3149_v3  ;;  %v3870_v3 = vld [vmem:[#allocation11 + $0x90] sm:$0xff] }
  0x41   :  { %v806_v59 = vunpack.c.l.bf16 %v3870_v3 }
  0x50   :  { %2967 = vmatmul.msk.bf16.gmra.mxu0 %vm206_vm0, %v3150_v4  ;;  %v3872_v4 = vpack.c.bf16 %v883_v0, %v879_v63  ;;  %v826_v63 = vunpack.c.l.bf16 %v3826_v40  ;;  %v830_v0 = vunpack.c.l.bf16 %v3828_v41 }
  0x52   :  { %958 = vmatpush.bf16.msrb.mxu2 %v3872_v4 }
  0x60   :  { %2968 = vmatmul.msk.bf16.gmra.mxu0 %vm206_vm0, %v3151_v5  ;;  %v803_v5 = vunpack.c.h.bf16 %v3868_v2  ;;  %v794_v2 = vunpack.c.l.bf16 %v3880_v12 }
  0x62   :  { %v871_v9 = vmul.f32 %v3833_v46, %v803_v5  ;;  %v3163_v5 = vld [vmem:[#allocation9 + $0x34] sm:$0xf0] }
  0x70   :  { %2969 = vmatmul.msk.bf16.gmra.mxu0 %vm206_vm0, %v3152_v6  ;;  %v807_v6 = vunpack.c.h.bf16 %v3870_v3  ;;  %v798_v3 = vunpack.c.l.bf16 %v3882_v13  ;;  %v786_v13 = vunpack.c.l.bf16 %v3893_v21 }
  0x72   :  { %v875_v10 = vmul.f32 %v3833_v46, %v807_v6 }
  0x74   :  { %v3884_v15 = vpack.c.bf16 %v875_v10, %v871_v9  ;;  %v822_v9 = vunpack.c.l.bf16 %v3841_v51 }
  0x76   :  { %959 = vmatpush.bf16.msrb.mxu2 %v3884_v15 }
  0x7a   :  { %960 = vmatpush.bf16.msrb.mxu2 %v3901_v23 }
  0x80   :  { %2970 = vmatmul.msk.bf16.gmra.mxu0 %vm206_vm0, %v3153_v7 }
  0x90   :  { %2971 = vmatmul.msk.bf16.gmra.mxu0 %vm206_vm0, %v3154_v26 }
  0x9d   :  { %v240_v27 = vpop.f32.mrf.mxu0 }
  0x9e   :  { %v241_v29 = vadd.f32 %v3812_v28, %v240_v27  ;;  %v855_v27 = vmul.f32 %v3833_v46, %v787_v24 }
  0xa0   :  { %v280_v32 = vmax.f32 %v241_v29, 0.0  ;;  %v859_v29 = vmul.f32 %v3833_v46, %v791_v25 }
  0xa5   :  { %v242_v30 = vpop.f32.mrf.mxu0 }
  0xa6   :  { %v243_v31 = vadd.f32 %v3812_v28, %v242_v30  ;;  %v3910_v30 = vld [vmem:[#allocation11 + $0x20] sm:$0xff] }
  0xa7   :  { %v778_v21 = vunpack.c.l.bf16 %v3910_v30 }
  0xa8   :  { %v281_v33 = vmax.f32 %v243_v31, 0.0  ;;  %v3912_v31 = vld [vmem:[#allocation11 + $0x30] sm:$0xff] }
  0xaa   :  { %v3816_v34 = vpack.c.bf16 %v281_v33, %v280_v32  ;;  %v3914_v32 = vpack.c.bf16 %v859_v29, %v855_v27  ;;  %v779_v33 = vunpack.c.h.bf16 %v3910_v30 }
  0xac   :  { %3004 = vmatmul.msk.bf16.vlgmr.msra.gmra.mxu1 %vm387_vm1, %v3816_v34  ;;  %3012 = vmatmul.msk.bf16.vlgmr.msra.gmra.mxu2 %vm387_vm1, %v3816_v34 }
  0xad   :  { %3028 = vmatmul.msk.bf16.vlgmr.msrb.gmra.mxu0 %vm387_vm1, %v3816_v34  ;;  %v245_v35 = vpop.f32.mrf.mxu0  ;;  %961 = vmatpush.bf16.msrb.mxu2 %v3914_v32 }
  0xae   :  { %v246_v36 = vadd.f32 %v3812_v28, %v245_v35  ;;  %v783_v35 = vunpack.c.h.bf16 %v3912_v31 }
  0xb0   :  { %v282_v39 = vmax.f32 %v246_v36, 0.0  ;;  %v847_v36 = vmul.f32 %v3833_v46, %v779_v33 }
  0xb5   :  { %v247_v37 = vpop.f32.mrf.mxu0 }
  0xb6   :  { %v248_v38 = vadd.f32 %v3812_v28, %v247_v37  ;;  %v851_v37 = vmul.f32 %v3833_v46, %v783_v35 }
  0xb8   :  { %v283_v42 = vmax.f32 %v248_v38, 0.0  ;;  %v3921_v38 = vld [vmem:[#allocation11] sm:$0xff]  ;;  %v3926_v43 = vpack.c.bf16 %v851_v37, %v847_v36 }
  0xb9   :  { %v771_v44 = vunpack.c.h.bf16 %v3921_v38  ;;  %v770_v30 = vunpack.c.l.bf16 %v3921_v38 }
  0xba   :  { %v3835_v47 = vpack.c.bf16 %v283_v42, %v282_v39  ;;  %v3923_v39 = vld [vmem:[#allocation11 + $0x10] sm:$0xff]  ;;  %962 = vmatpush.bf16.msrb.mxu2 %v3926_v43 }
  0xbb   :  { %v775_v48 = vunpack.c.h.bf16 %v3923_v39  ;;  %v839_v54 = vmul.f32 %v3833_v46, %v771_v44 }
  0xbc   :  { %3005 = vmatmul.msk.bf16.gmra.mxu1 %vm387_vm1, %v3835_v47  ;;  %3013 = vmatmul.msk.bf16.gmra.mxu2 %vm387_vm1, %v3835_v47 }
  0xbd   :  { %3029 = vmatmul.msk.bf16.gmra.mxu0 %vm387_vm1, %v3835_v47  ;;  %v250_v55 = vpop.f32.mrf.mxu0 }
  0xbe   :  { %v251_v1 = vadd.f32 %v3812_v28, %v250_v55  ;;  %v843_v55 = vmul.f32 %v3833_v46, %v775_v48  ;;  %v2998_v46 = vld [vmem:[#allocation9 + $0x28] sm:$0xf]  ;;  %v790_v48 = vunpack.c.l.bf16 %v3895_v22  ;;  %v782_v22 = vunpack.c.l.bf16 %v3912_v31 }
  0xbf   :  { %v774_v31 = vunpack.c.l.bf16 %v3923_v39  ;;  %v761_v39 = vld [vmem:[#allocation11 + $0xc8] sm:$0xff] }
  0xc0   :  { %v284_v11 = vmax.f32 %v251_v1, 0.0  ;;  %v3934_v61 = vpack.c.bf16 %v843_v55, %v839_v54  ;;  %v3942_v1 = vunpack.c.l.bf16 %v3675_v45 }
  0xc2   :  { %963 = vmatpush.bf16.msrb.mxu2 %v3934_v61  ;;  %v894_v40 = vmul.f32 %v3942_v1, %v826_v63  ;;  %v898_v41 = vmul.f32 %v3942_v1, %v830_v0  ;;  %v878_v51 = vmul.f32 %v3942_v1, %v810_v16  ;;  %v882_v20 = vmul.f32 %v3942_v1, %v814_v17 }
  0xc3   :  { %v870_v29 = vmul.f32 %v3942_v1, %v802_v58  ;;  %v874_v33 = vmul.f32 %v3942_v1, %v806_v59  ;;  %v866_v44 = vmul.f32 %v3942_v1, %v798_v3  ;;  %v854_v55 = vmul.f32 %v3942_v1, %v786_v13 }
  0xc4   :  { %v3952_v45 = vpack.c.bf16 %v898_v41, %v894_v40  ;;  %v3972_v25 = vpack.c.bf16 %v882_v20, %v878_v51  ;;  %v765_v40 = vld [vmem:[#allocation11 + $0xe8] sm:$0xff]  ;;  %v767_v41 = vld [vmem:[#allocation11 + $0xf8] sm:$0xff]  ;;  %v838_v16 = vmul.f32 %v3942_v1, %v770_v30  ;;  %v842_v17 = vmul.f32 %v3942_v1, %v774_v31 }
  0xc5   :  { %v252_v7 = vpop.f32.mrf.mxu0  ;;  %v3983_v36 = vpack.c.bf16 %v874_v33, %v870_v29  ;;  %v763_v20 = vld [vmem:[#allocation11 + $0xd8] sm:$0xff]  ;;  %v5056_v59 = vmov 0  }
  0xc6   :  { %v253_v8 = vadd.f32 %v3812_v28, %v252_v7  ;;  %v2999_v7 = vor.u32 %v3163_v5, %v2998_v46  ;;  %5076 = vst [vmem:[#allocation23_spill] sm:$0xff] %v3952_v45  ;;  %942 = vmatpush.bf16.msrb.mxu1 %v3952_v45  ;;  %1052 = vmatpush.bf16.msra.mxu2 %v3952_v45  ;;  %v825_v58 = vunpack.c.h.bf16 %v763_v20  ;;  %v759_v29 = vld [vmem:[#allocation11 + $0xb8] sm:$0xff]  ;;  %v3066_v20 = vld [vmem:[#allocation11 + $0xe8] sm:$0xf] }
  0xc7   :  { %1274 = vmatpush.bf16.msra.mxu0 %v3952_v45  ;;  %5078 = vst [vmem:[#allocation25_spill] sm:$0xff] %v3972_v25  ;;  %v846_v46 = vmul.f32 %v3942_v1, %v778_v21  ;;  %v850_v5 = vmul.f32 %v3942_v1, %v782_v22  ;;  %v4029_v38 = vpack.c.bf16 %v842_v17, %v838_v16  ;;  %v747_v16 = vld [vmem:[#allocation11 + $0x58] sm:$0xff] }
  0xc8   :  { %v285_v14 = vmax.f32 %v253_v8, 0.0  ;;  %516 = vmatpush.bf16.msrb.mxu3 %v2999_v7  ;;  %v818_v8 = vunpack.c.l.bf16 %v3839_v50  ;;  %5079 = vst [vmem:[#allocation26_spill] sm:$0xff] %v3983_v36 }
  0xc9   :  { %v4018_v7 = vpack.c.bf16 %v850_v5, %v846_v46  ;;  %5083 = vst [vmem:[#allocation30_spill] sm:$0xff] %v4029_v38  ;;  %v749_v5 = vld [vmem:[#allocation11 + $0x68] sm:$0xff] }
  0xca   :  { %v3888_v18 = vpack.c.bf16 %v285_v14, %v284_v11  ;;  %v886_v10 = vmul.f32 %v3942_v1, %v818_v8  ;;  %v890_v11 = vmul.f32 %v3942_v1, %v822_v9 }
  0xcb   :  { %5082 = vst [vmem:[#allocation29_spill] sm:$0xff] %v4018_v7 }
  0xcc   :  { %3006 = vmatmul.msk.bf16.gmra.mxu1 %vm387_vm1, %v3888_v18  ;;  %3014 = vmatmul.msk.bf16.gmra.mxu2 %vm387_vm1, %v3888_v18  ;;  %v3961_v14 = vpack.c.bf16 %v890_v11, %v886_v10  ;;  %v829_v10 = vunpack.c.h.bf16 %v765_v40  ;;  %v833_v11 = vunpack.c.h.bf16 %v767_v41  ;;  %v797_v40 = vunpack.c.h.bf16 %v749_v5 }
  0xcd   :  { %3030 = vmatmul.msk.bf16.gmra.mxu0 %vm387_vm1, %v3888_v18  ;;  %v255_v26 = vpop.f32.mrf.mxu0 }
  0xce   :  { %v256_v42 = vadd.f32 %v3812_v28, %v255_v26  ;;  %5077 = vst [vmem:[#allocation24_spill] sm:$0xff] %v3961_v14  ;;  %943 = vmatpush.bf16.msrb.mxu1 %v3961_v14  ;;  %1053 = vmatpush.bf16.msra.mxu2 %v3961_v14  ;;  %v901_v51 = vmul.f32 0.5, %v833_v11  ;;  %v745_v11 = vld [vmem:[#allocation11 + $0x48] sm:$0xff] }
  0xcf   :  { %1275 = vmatpush.bf16.msra.mxu0 %v3961_v14 }
  0xd0   :  { %v286_v56 = vmax.f32 %v256_v42, 0.0  ;;  %v862_v42 = vmul.f32 %v3942_v1, %v794_v2  ;;  %v893_v2 = vmul.f32 0.5, %v825_v58 }
  0xd2   :  { %944 = vmatpush.bf16.msrb.mxu1 %v3972_v25  ;;  %1054 = vmatpush.bf16.msra.mxu2 %v3972_v25  ;;  %v3998_v12 = vpack.c.bf16 %v866_v44, %v862_v42 }
  0xd3   :  { %1276 = vmatpush.bf16.msra.mxu0 %v3972_v25 }
  0xd4   :  { %5080 = vst [vmem:[#allocation27_spill] sm:$0xff] %v3998_v12 }
  0xd5   :  { %v257_v49 = vpop.f32.mrf.mxu0 }
  0xd6   :  { %v258_v53 = vadd.f32 %v3812_v28, %v257_v49  ;;  %945 = vmatpush.bf16.msrb.mxu1 %v3983_v36  ;;  %1055 = vmatpush.bf16.msra.mxu2 %v3983_v36  ;;  %v2982_v49 = vld [vmem:[#allocation9 + $0x8] sm:$0xf] }
  0xd7   :  { %1277 = vmatpush.bf16.msra.mxu0 %v3983_v36 }
  0xd8   :  { %v287_v57 = vmax.f32 %v258_v53, 0.0  ;;  %v3159_v53 = vld [vmem:[#allocation9 + $0x14] sm:$0xf0] }
  0xd9   :  { %v2983_v54 = vor.u32 %v3159_v53, %v2982_v49  ;;  %v753_v53 = vld [vmem:[#allocation11 + $0x88] sm:$0xff] }
  0xda   :  { %v3936_v62 = vpack.c.bf16 %v287_v57, %v286_v56  ;;  %946 = vmatpush.bf16.msrb.mxu1 %v3998_v12  ;;  %v858_v56 = vmul.f32 %v3942_v1, %v790_v48  ;;  %1056 = vmatpush.bf16.msra.mxu2 %v3998_v12  ;;  %v821_v1 = vunpack.c.h.bf16 %v761_v39 }
  0xdb   :  { %1278 = vmatpush.bf16.msra.mxu0 %v3998_v12  ;;  %517 = vmatpush.bf16.msrb.mxu3 %v2983_v54  ;;  %v755_v54 = vld [vmem:[#allocation11 + $0x98] sm:$0xff] }
  0xdc   :  { %3007 = vmatmul.msk.bf16.gmra.mxu1 %vm387_vm1, %v3936_v62  ;;  %3015 = vmatmul.msk.bf16.gmra.mxu2 %vm387_vm1, %v3936_v62  ;;  %v4007_v57 = vpack.c.bf16 %v858_v56, %v854_v55  ;;  %v889_v33 = vmul.f32 0.5, %v821_v1  ;;  %v805_v55 = vunpack.c.h.bf16 %v753_v53  ;;  %v809_v56 = vunpack.c.h.bf16 %v755_v54  ;;  %v3171_v1 = vld [vmem:[#allocation11 + $0xf4] sm:$0xf0] }
  0xdd   :  { %3031 = vmatmul.msk.bf16.gmra.mxu0 %vm387_vm1, %v3936_v62  ;;  %v260_v6 = vpop.f32.mrf.mxu0  ;;  %v4072_v58 = vor.u32 %v3171_v1, %v3066_v20  ;;  %v739_v53 = vld [vmem:[#allocation11 + $0x18] sm:$0xff] }
  0xde   :  { %v261_v50 = vadd.f32 %v3812_v28, %v260_v6  ;;  %5081 = vst [vmem:[#allocation28_spill] sm:$0xff] %v4007_v57  ;;  %947 = vmatpush.bf16.msrb.mxu1 %v4007_v57  ;;  %1057 = vmatpush.bf16.msra.mxu2 %v4007_v57  ;;  %v4044_v42 = vpack.c.bf16 %v893_v2, %v889_v33  ;;  %v743_v33 = vld [vmem:[#allocation11 + $0x38] sm:$0xff] }
  0xdf   :  { %1279 = vmatpush.bf16.msra.mxu0 %v4007_v57  ;;  %v3167_v20 = vld [vmem:[#allocation11 + $0x74] sm:$0xf0] }
  0xe0   :  { %v288_v26 = vmax.f32 %v261_v50, 0.0 }
  0xe2   :  { %948 = vmatpush.bf16.msrb.mxu1 %v4018_v7  ;;  %1058 = vmatpush.bf16.msra.mxu2 %v4018_v7 }
  0xe3   :  { %1280 = vmatpush.bf16.msra.mxu0 %v4018_v7 }
  0xe5   :  { %v262_v19 = vpop.f32.mrf.mxu0 }
  0xe6   :  { %v263_v24 = vadd.f32 %v3812_v28, %v262_v19  ;;  %v897_v19 = vmul.f32 0.5, %v829_v10  ;;  %949 = vmatpush.bf16.msrb.mxu1 %v4029_v38  ;;  %1059 = vmatpush.bf16.msra.mxu2 %v4029_v38 }
  0xe7   :  { %1281 = vmatpush.bf16.msra.mxu0 %v4029_v38 }
  0xe8   :  { %v289_v27 = vmax.f32 %v263_v24, 0.0  ;;  %v4035_v24 = vpack.c.bf16 %v901_v51, %v897_v19  ;;  %v789_v19 = vunpack.c.h.bf16 %v745_v11  ;;  %v793_v51 = vunpack.c.h.bf16 %v747_v16  ;;  %v3169_v11 = vld [vmem:[#allocation11 + $0xb4] sm:$0xf0] }
  0xea   :  { %v3980_v35 = vpack.c.bf16 %v289_v27, %v288_v26  ;;  %v757_v27 = vld [vmem:[#allocation11 + $0xa8] sm:$0xff]  ;;  %984 = vmatpush.bf16.msra.mxu1 %v4035_v24 }
  0xeb   :  { %v813_v3 = vunpack.c.h.bf16 %v757_v27  ;;  %1385 = vmatpush.bf16.msrb.mxu0 %v3952_v45  ;;  %v861_v27 = vmul.f32 0.5, %v793_v51 }
  0xec   :  { %3008 = vmatmul.msk.bf16.gmra.mxu1 %vm387_vm1, %v3980_v35  ;;  %3016 = vmatmul.msk.bf16.gmra.mxu2 %vm387_vm1, %v3980_v35 }
  0xed   :  { %3032 = vmatmul.msk.bf16.gmra.mxu0 %vm387_vm1, %v3980_v35  ;;  %v265_v37 = vpop.f32.mrf.mxu0  ;;  %v881_v44 = vmul.f32 0.5, %v813_v3 }
  0xee   :  { %v266_v63 = vadd.f32 %v3812_v28, %v265_v37  ;;  %v817_v37 = vunpack.c.h.bf16 %v759_v29  ;;  %985 = vmatpush.bf16.msra.mxu1 %v4044_v42  ;;  %v741_v29 = vld [vmem:[#allocation11 + $0x28] sm:$0xff] }
  0xef   :  { %1386 = vmatpush.bf16.msrb.mxu0 %v3961_v14  ;;  %v781_v3 = vunpack.c.h.bf16 %v741_v29  ;;  %v3165_v29 = vld [vmem:[#allocation11 + $0x34] sm:$0xf0] }
  0xf0   :  { %v290_v8 = vmax.f32 %v266_v63, 0.0  ;;  %v885_v13 = vmul.f32 0.5, %v817_v37  ;;  %v873_v63 = vmul.f32 0.5, %v805_v55  ;;  %v785_v37 = vunpack.c.h.bf16 %v743_v33 }
  0xf2   :  { %v4050_v49 = vpack.c.bf16 %v885_v13, %v881_v44  ;;  %v849_v44 = vmul.f32 0.5, %v781_v3  ;;  %v853_v13 = vmul.f32 0.5, %v785_v37  ;;  %v3164_v37 = vld [vmem:[#allocation11 + $0x14] sm:$0xf0] }
  0xf3   :  { %1387 = vmatpush.bf16.msrb.mxu0 %v3972_v25 }
  0xf4   :  { %986 = vmatpush.bf16.msra.mxu1 %v4050_v49  ;;  %v4084_v55 = vpack.c.bf16 %v853_v13, %v849_v44 }
  0xf5   :  { %v267_v0 = vpop.f32.mrf.mxu0 }
  0xf6   :  { %v268_v6 = vadd.f32 %v3812_v28, %v267_v0  ;;  %v877_v0 = vmul.f32 0.5, %v809_v56 }
  0xf7   :  { %1388 = vmatpush.bf16.msrb.mxu0 %v3983_v36 }
  0xf8   :  { %v291_v9 = vmax.f32 %v268_v6, 0.0  ;;  %v751_v6 = vld [vmem:[#allocation11 + $0x78] sm:$0xff]  ;;  %v4057_v31 = vpack.c.bf16 %v877_v0, %v873_v63 }
  0xf9   :  { %v801_v41 = vunpack.c.h.bf16 %v751_v6 }
  0xfa   :  { %v4025_v50 = vpack.c.bf16 %v291_v9, %v290_v8  ;;  %v865_v9 = vmul.f32 0.5, %v797_v40  ;;  %987 = vmatpush.bf16.msra.mxu1 %v4057_v31 }
  0xfb   :  { %v869_v10 = vmul.f32 0.5, %v801_v41  ;;  %1389 = vmatpush.bf16.msrb.mxu0 %v3998_v12  ;;  %v3170_v41 = vld [vmem:[#allocation11 + $0xd4] sm:$0xf0] }
  0xfc   :  { %3009 = vmatmul.msk.bf16.gmra.mxu1 %vm387_vm1, %v4025_v50  ;;  %3017 = vmatmul.msk.bf16.vlgmr.msra.gmra.mxu3 %vm387_vm1, %v4025_v50 }
  0xfd   :  { %3033 = vmatmul.msk.bf16.gmra.mxu0 %vm387_vm1, %v4025_v50  ;;  %964 = vmatmul.bf16.vlgmr.msrb.gmra.mxu2 %v5056_v59  ;;  %v270_v26 = vpop.f32.mrf.mxu0  ;;  %v4068_v17 = vpack.c.bf16 %v869_v10, %v865_v9  ;;  %v3058_v10 = vld [vmem:[#allocation11 + $0xa8] sm:$0xf] }
  0xfe   :  { %1094 = vmatpush.bf16.msrb.mxu2 %v4035_v24  ;;  %v271_v48 = vadd.f32 %v3812_v28, %v270_v26  ;;  %v857_v26 = vmul.f32 0.5, %v789_v19  ;;  %970 = vmatpush.bf16.msra.mxu3 %v4072_v58  ;;  %v4111_v16 = vor.u32 %v3169_v11, %v3058_v10  ;;  %v3168_v19 = vld [vmem:[#allocation11 + $0x94] sm:$0xf0] }
  0xff   :  { %988 = vmatpush.bf16.msra.mxu1 %v4068_v17  ;;  %1390 = vmatpush.bf16.msrb.mxu0 %v4007_v57 }
 0x100   :  { %v292_v46 = vmax.f32 %v271_v48, 0.0  ;;  %v4078_v2 = vpack.c.bf16 %v861_v27, %v857_v26  ;;  %v737_v48 = vld [vmem:[#allocation11 + $0x8] sm:$0xff]  ;;  %v3166_v26 = vld [vmem:[#allocation11 + $0x54] sm:$0xf0] }
 0x101   :  { %v773_v56 = vunpack.c.h.bf16 %v737_v48 }
 0x102   :  { %1095 = vmatpush.bf16.msrb.mxu2 %v4044_v42 }
 0x103   :  { %989 = vmatpush.bf16.msra.mxu1 %v4078_v2  ;;  %v841_v0 = vmul.f32 0.5, %v773_v56  ;;  %1391 = vmatpush.bf16.msrb.mxu0 %v4018_v7 }
 0x105   :  { %v272_v21 = vpop.f32.mrf.mxu0 }
 0x106   :  { %v273_v22 = vadd.f32 %v3812_v28, %v272_v21  ;;  %1096 = vmatpush.bf16.msrb.mxu2 %v4050_v49  ;;  %v777_v21 = vunpack.c.h.bf16 %v739_v53 }
 0x107   :  { %990 = vmatpush.bf16.msra.mxu1 %v4084_v55  ;;  %1392 = vmatpush.bf16.msrb.mxu0 %v4029_v38 }
 0x108   :  { %v293_v30 = vmax.f32 %v273_v22, 0.0 }
 0x10a   :  { %v4060_v8 = vpack.c.bf16 %v293_v30, %v292_v46  ;;  %1097 = vmatpush.bf16.msrb.mxu2 %v4057_v31  ;;  %v845_v46 = vmul.f32 0.5, %v777_v21 }
 0x10c   :  { %3010 = vmatmul.msk.bf16.gmra.mxu1 %vm387_vm1, %v4060_v8  ;;  %3018 = vmatmul.msk.bf16.gmra.mxu3 %vm387_vm1, %v4060_v8  ;;  %v4090_v30 = vpack.c.bf16 %v845_v46, %v841_v0 }
 0x10d   :  { %3034 = vmatmul.msk.bf16.gmra.mxu0 %vm387_vm1, %v4060_v8  ;;  %v275_v39 = vpop.f32.mrf.mxu0 }
 0x10e   :  { %1098 = vmatpush.bf16.msrb.mxu2 %v4068_v17  ;;  %v276_v54 = vadd.f32 %v3812_v28, %v275_v39  ;;  %991 = vmatpush.bf16.msra.mxu1 %v4090_v30  ;;  %v3050_v39 = vld [vmem:[#allocation11 + $0x68] sm:$0xf] }
 0x10f   :  { %v4125_v1 = vor.u32 %v3167_v20, %v3050_v39 }
 0x110   :  { %v294_v5 = vmax.f32 %v276_v54, 0.0 }
 0x112   :  { %1099 = vmatpush.bf16.msrb.mxu2 %v4078_v2 }
 0x115   :  { %v277_v22 = vpop.f32.mrf.mxu0 }
 0x116   :  { %v278_v63 = vadd.f32 %v3812_v28, %v277_v22  ;;  %1100 = vmatpush.bf16.msrb.mxu2 %v4084_v55  ;;  %v3062_v28 = vld [vmem:[#allocation11 + $0xc8] sm:$0xf] }
 0x117   :  { %v4103_v9 = vor.u32 %v3170_v41, %v3062_v28 }
 0x118   :  { %v295_v6 = vmax.f32 %v278_v63, 0.0 }
 0x119   :  { %971 = vmatpush.bf16.msra.mxu3 %v4103_v9 }
 0x11a   :  { %v4092_v40 = vpack.c.bf16 %v295_v6, %v294_v5  ;;  %1101 = vmatpush.bf16.msrb.mxu2 %v4090_v30 }
 0x11c   :  { %3011 = vmatmul.msk.bf16.gmra.mxu1 %vm387_vm1, %v4092_v40  ;;  %3019 = vmatmul.msk.bf16.gmra.mxu3 %vm387_vm1, %v4092_v40 }
 0x11d   :  { %3035 = vmatmul.msk.bf16.gmra.mxu0 %vm387_vm1, %v4092_v40  ;;  %972 = vmatpush.bf16.msra.mxu3 %v4111_v16 }
 0x129   :  { %v4139_v3 = vpop.f32.mrf.mxu1 }
 0x12c   :  { %3020 = vmatmul.msk.bf16.vlgmr.msrb.gmra.mxu3 %vm387_vm1, %v3816_v34  ;;  %950 = vmatmul.bf16.vlgmr.msrb.gmra.mxu1 %v5056_v59  ;;  %v3054_v34 = vld [vmem:[#allocation11 + $0x88] sm:$0xf] }
 0x12d   :  { %1080 = vmatpush.bf16.msrb.mxu1 %v4072_v58  ;;  %v4119_v51 = vor.u32 %v3168_v19, %v3054_v34 }
 0x12f   :  { %973 = vmatpush.bf16.msra.mxu3 %v4119_v51  ;;  %v470_v6 = vpop.f32.mrf.mxu2 }
 0x131   :  { %1081 = vmatpush.bf16.msrb.mxu1 %v4103_v9 }
 0x133   :  { %974 = vmatpush.bf16.msra.mxu3 %v4125_v1 }
 0x135   :  { %1082 = vmatpush.bf16.msrb.mxu1 %v4111_v16 }
 0x137   :  { %v472_v41 = vpop.f32.mrf.mxu2 }
 0x139   :  { %1083 = vmatpush.bf16.msrb.mxu1 %v4119_v51 }
 0x13c   :  { %3021 = vmatmul.msk.bf16.gmra.mxu3 %vm387_vm1, %v3835_v47  ;;  %992 = vmatmul.bf16.vlgmr.msra.gmra.mxu1 %v5056_v59  ;;  %v3046_v47 = vld [vmem:[#allocation11 + $0x48] sm:$0xf] }
 0x13d   :  { %1084 = vmatpush.bf16.msrb.mxu1 %v4125_v1  ;;  %v4131_v27 = vor.u32 %v3166_v26, %v3046_v47 }
 0x13f   :  { %975 = vmatpush.bf16.msra.mxu3 %v4131_v27  ;;  %v4214_v34 = vpop.f32.mrf.mxu2 }
 0x141   :  { %1085 = vmatpush.bf16.msrb.mxu1 %v4131_v27 }
 0x147   :  { %v4222_v47 = vpop.f32.mrf.mxu2 }
 0x14c   :  { %3022 = vmatmul.msk.bf16.gmra.mxu3 %vm387_vm1, %v3888_v18  ;;  %v3042_v18 = vld [vmem:[#allocation11 + $0x28] sm:$0xf] }
 0x14d   :  { %v4137_v33 = vor.u32 %v3165_v29, %v3042_v18 }
 0x14f   :  { %976 = vmatpush.bf16.msra.mxu3 %v4137_v33  ;;  %1086 = vmatpush.bf16.msrb.mxu1 %v4137_v33  ;;  %v4228_v29 = vpop.f32.mrf.mxu2 }
 0x15c   :  { %3023 = vmatmul.msk.bf16.gmra.mxu3 %vm387_vm1, %v3936_v62  ;;  %v3038_v62 = vld [vmem:[#allocation11 + $0x8] sm:$0xf] }
 0x15d   :  { %v4145_v44 = vor.u32 %v3164_v37, %v3038_v62 }
 0x15f   :  { %977 = vmatpush.bf16.msra.mxu3 %v4145_v44  ;;  %1087 = vmatpush.bf16.msrb.mxu1 %v4145_v44 }
 0x163   :  { %1066 = vmatpush.bf16.msrb.mxu3 %v3847_v52  ;;  %1177 = vmatpush.bf16.msra.mxu1 %v3847_v52 }
 0x167   :  { %1067 = vmatpush.bf16.msrb.mxu3 %v3860_v60  ;;  %1178 = vmatpush.bf16.msra.mxu1 %v3860_v60 }
 0x16b   :  { %1068 = vmatpush.bf16.msrb.mxu3 %v3872_v4  ;;  %1179 = vmatpush.bf16.msra.mxu1 %v3872_v4 }
 0x16c   :  { %3024 = vmatmul.msk.bf16.gmra.mxu3 %vm387_vm1, %v3980_v35  ;;  %v4153_v35 = vpop.f32.mrf.mxu1 }
 0x16f   :  { %1069 = vmatpush.bf16.msrb.mxu3 %v3884_v15  ;;  %1180 = vmatpush.bf16.msra.mxu1 %v3884_v15 }
 0x173   :  { %1070 = vmatpush.bf16.msrb.mxu3 %v3901_v23  ;;  %1181 = vmatpush.bf16.msra.mxu1 %v3901_v23 }
 0x174   :  { %v4161_v48 = vpop.f32.mrf.mxu1 }
 0x177   :  { %1071 = vmatpush.bf16.msrb.mxu3 %v3914_v32  ;;  %1182 = vmatpush.bf16.msra.mxu1 %v3914_v32 }
 0x17b   :  { %1072 = vmatpush.bf16.msrb.mxu3 %v3926_v43  ;;  %1183 = vmatpush.bf16.msra.mxu1 %v3926_v43 }
 0x17c   :  { %3025 = vmatmul.msk.bf16.gmra.mxu3 %vm387_vm1, %v4025_v50  ;;  %v4173_v54 = vpop.f32.mrf.mxu1 }
 0x17f   :  { %v4147_v13 = vpop.f32.mrf.mxu3  ;;  %1073 = vmatpush.bf16.msrb.mxu3 %v3934_v61  ;;  %1184 = vmatpush.bf16.msra.mxu1 %v3934_v61 }
 0x180   :  { %5084 = vst [vmem:[#allocation31_spill] sm:$0xff] %v4147_v13 }
 0x184   :  { %v4185_v21 = vpop.f32.mrf.mxu1 }
 0x187   :  { %v4157_v50 = vpop.f32.mrf.mxu3 }
 0x188   :  { %5085 = vst [vmem:[#allocation32_spill] sm:$0xff] %v4157_v50 }
 0x18c   :  { %3026 = vmatmul.msk.bf16.gmra.mxu3 %vm387_vm1, %v4060_v8  ;;  %v4189_v63 = vpop.f32.mrf.mxu1 }
 0x18d   :  { %5090 = vst [vmem:[#allocation37_spill] sm:$0xff] %v4189_v63 }
 0x18f   :  { %v4167_v53 = vpop.f32.mrf.mxu3 }
 0x190   :  { %5086 = vst [vmem:[#allocation33_spill] sm:$0xff] %v4167_v53 }
 0x194   :  { %v4196_v46 = vpop.f32.mrf.mxu1 }
 0x195   :  { %5091 = vst [vmem:[#allocation38_spill] sm:$0xff] %v4196_v46  ;;  %v568_v46 = vpop.f32.mrf.mxu0 }
 0x197   :  { %v4175_v56 = vpop.f32.mrf.mxu3 }
 0x198   :  { %5087 = vst [vmem:[#allocation34_spill] sm:$0xff] %v4175_v56 }
 0x19c   :  { %3027 = vmatmul.msk.bf16.gmra.mxu3 %vm387_vm1, %v4092_v40  ;;  %v4203_v40 = vpop.f32.mrf.mxu1 }
 0x19d   :  { %5092 = vst [vmem:[#allocation39_spill] sm:$0xff] %v4203_v40 }
 0x19f   :  { %v4183_v8 = vpop.f32.mrf.mxu3 }
 0x1a0   :  { %5088 = vst [vmem:[#allocation35_spill] sm:$0xff] %v4183_v8 }
 0x1a4   :  { %v4211_v11 = vpop.f32.mrf.mxu1 }
 0x1a5   :  { %5093 = vst [vmem:[#allocation40_spill] sm:$0xff] %v4211_v11 }
 0x1a7   :  { %v4187_v22 = vpop.f32.mrf.mxu3 }
 0x1a8   :  { %5089 = vst [vmem:[#allocation36_spill] sm:$0xff] %v4187_v22 }
 0x1ac   :  { %978 = vmatmul.bf16.vlgmr.msra.gmra.mxu3 %v5056_v59  ;;  %v4218_v39 = vpop.f32.mrf.mxu1  ;;  %v4234_v59 = vpop.f32.mrf.mxu2 }
 0x1ad   :  { %1163 = vmatpush.bf16.msra.mxu3 %v3952_v45  ;;  %5094 = vst [vmem:[#allocation41_spill] sm:$0xff] %v4218_v39 }
 0x1af   :  { %v4193_v0 = vpop.f32.mrf.mxu3 }
 0x1b1   :  { %1164 = vmatpush.bf16.msra.mxu3 %v3961_v14 }
 0x1b4   :  { %v4224_v26 = vpop.f32.mrf.mxu1  ;;  %v4240_v56 = vpop.f32.mrf.mxu2 }
 0x1b5   :  { %1165 = vmatpush.bf16.msra.mxu3 %v3972_v25  ;;  %5096 = vst [vmem:[#allocation43_spill] sm:$0xff] %v4224_v26 }
 0x1b6   :  { %5102 = vst [vmem:[#allocation49_spill] sm:$0xff] %v4240_v56 }
 0x1b7   :  { %v4199_v5 = vpop.f32.mrf.mxu3 }
 0x1b9   :  { %1166 = vmatpush.bf16.msra.mxu3 %v3983_v36 }
 0x1bc   :  { %v4230_v62 = vpop.f32.mrf.mxu1  ;;  %v4248_v26 = vpop.f32.mrf.mxu2 }
 0x1bd   :  { %1167 = vmatpush.bf16.msra.mxu3 %v3998_v12  ;;  %5098 = vst [vmem:[#allocation45_spill] sm:$0xff] %v4230_v62 }
 0x1be   :  { %5106 = vst [vmem:[#allocation53_spill] sm:$0xff] %v4248_v26 }
 0x1bf   :  { %v4205_v28 = vpop.f32.mrf.mxu3 }
 0x1c1   :  { %1168 = vmatpush.bf16.msra.mxu3 %v4007_v57 }
 0x1c4   :  { %v4238_v8 = vpop.f32.mrf.mxu1  ;;  %v4254_v11 = vpop.f32.mrf.mxu2 }
 0x1c5   :  { %1169 = vmatpush.bf16.msra.mxu3 %v4018_v7  ;;  %5101 = vst [vmem:[#allocation48_spill] sm:$0xff] %v4238_v8 }
 0x1c6   :  { %5109 = vst [vmem:[#allocation56_spill] sm:$0xff] %v4254_v11 }
 0x1c7   :  { %v4209_v10 = vpop.f32.mrf.mxu3 }
 0x1c9   :  { %1170 = vmatpush.bf16.msra.mxu3 %v4029_v38 }
 0x1cc   :  { %v4244_v50 = vpop.f32.mrf.mxu1  ;;  %v4260_v8 = vpop.f32.mrf.mxu2 }
 0x1cd   :  { %5104 = vst [vmem:[#allocation51_spill] sm:$0xff] %v4244_v50  ;;  %v337_v50 = vld [vmem:[#allocation12] sm:$0xf] }
 0x1ce   :  { %5112 = vst [vmem:[#allocation59_spill] sm:$0xff] %v4260_v8  ;;  %v4264_v40 = vperm.slane %v337_v50, 1 }
 0x1cf   :  { %v4216_v19 = vpop.f32.mrf.mxu3 }
 0x1d4   :  { %v4250_v39 = vpop.f32.mrf.mxu1  ;;  %v965_v26 = vpop.f32.mrf.mxu2 }
 0x1d5   :  { %5107 = vst [vmem:[#allocation54_spill] sm:$0xff] %v4250_v39  ;;  %v471_v39 = vadd.f32 %v470_v6, %v4264_v40 }
 0x1d7   :  { %v4220_v20 = vpop.f32.mrf.mxu3  ;;  %v609_v11 = vmul.f32 0.5, %v471_v39 }
 0x1d8   :  { %5095 = vst [vmem:[#allocation42_spill] sm:$0xff] %v4220_v20 }
 0x1d9   :  { %v999_v8 = vadd.f32 %v965_v26, %v609_v11  ;;  %v4280_v26 = vperm.slane %v337_v50, 3 }
 0x1db   :  { %3263 = vtanh.f32 %v999_v8 }
 0x1dc   :  { %v967_v6 = vpop.f32.mrf.mxu2 }
 0x1df   :  { %v4226_v18 = vpop.f32.mrf.mxu3 }
 0x1e0   :  { %5097 = vst [vmem:[#allocation44_spill] sm:$0xff] %v4226_v18 }
 0x1e1   :  { %v3264_v11 = vpop.eup %3263 }
 0x1e7   :  { %v4232_v37 = vpop.f32.mrf.mxu3 }
 0x1e8   :  { %5099 = vst [vmem:[#allocation46_spill] sm:$0xff] %v4232_v37  ;;  %v4256_v37 = vpop.f32.mrf.mxu1 }
 0x1e9   :  { %5110 = vst [vmem:[#allocation57_spill] sm:$0xff] %v4256_v37 }
 0x1ef   :  { %v4236_v22 = vpop.f32.mrf.mxu3 }
 0x1f0   :  { %5100 = vst [vmem:[#allocation47_spill] sm:$0xff] %v4236_v22 }
 0x1f7   :  { %v4242_v53 = vpop.f32.mrf.mxu3 }
 0x1f8   :  { %5103 = vst [vmem:[#allocation50_spill] sm:$0xff] %v4242_v53  ;;  %v951_v53 = vpop.f32.mrf.mxu1 }
 0x1ff   :  { %v4246_v13 = vpop.f32.mrf.mxu3 }
 0x200   :  { %5105 = vst [vmem:[#allocation52_spill] sm:$0xff] %v4246_v13  ;;  %v4266_v13 = vperm.slane %v337_v50, 0 }
 0x202   :  { %v422_v37 = vadd.f32 %v4139_v3, %v4266_v13  ;;  %v424_v7 = vadd.f32 %v4153_v35, %v4266_v13 }
 0x204   :  { %v608_v56 = vmul.f32 0.5, %v422_v37  ;;  %v612_v3 = vmul.f32 0.5, %v424_v7 }
 0x206   :  { %v998_v38 = vadd.f32 %v951_v53, %v608_v56 }
 0x207   :  { %v4252_v62 = vpop.f32.mrf.mxu3 }
 0x208   :  { %5108 = vst [vmem:[#allocation55_spill] sm:$0xff] %v4252_v62  ;;  %3265 = vtanh.f32 %v998_v38  ;;  %v569_v38 = vadd.f32 %v568_v46, %v4280_v26 }
 0x20e   :  { %v3266_v35 = vpop.eup %3265 }
 0x20f   :  { %v4258_v22 = vpop.f32.mrf.mxu3  ;;  %v1014_v7 = vmul.f32 0.5, %v3266_v35 }
 0x210   :  { %5111 = vst [vmem:[#allocation58_spill] sm:$0xff] %v4258_v22  ;;  %v953_v22 = vpop.f32.mrf.mxu1 }
 0x211   :  { %v1002_v37 = vadd.f32 %v953_v22, %v612_v3  ;;  %v1022_v14 = vadd.f32 0.5, %v1014_v7 }
 0x217   :  { %v4262_v18 = vpop.f32.mrf.mxu3 }
 0x218   :  { %5113 = vst [vmem:[#allocation60_spill] sm:$0xff] %v4262_v18  ;;  %v473_v18 = vadd.f32 %v472_v41, %v4264_v40  ;;  %v993_v36 = vpop.f32.mrf.mxu1  ;;  %v570_v41 = vpop.f32.mrf.mxu0 }
 0x21a   :  { %v613_v12 = vmul.f32 0.5, %v473_v18 }
 0x21c   :  { %v1003_v39 = vadd.f32 %v967_v6, %v613_v12  ;;  %v571_v12 = vadd.f32 %v570_v41, %v4280_v26 }
 0x21e   :  { %3267 = vtanh.f32 %v1003_v39  ;;  %v615_v25 = vmul.f32 0.5, %v571_v12 }
 0x21f   :  { %v4269_v62 = vpop.f32.mrf.mxu3  ;;  %3269 = vtanh.f32 %v1002_v37 }
 0x220   :  { %5114 = vst [vmem:[#allocation61_spill] sm:$0xff] %v4269_v62  ;;  %v4278_v62 = vperm.slane %v337_v50, 2  ;;  %v611_v50 = vmul.f32 0.5, %v569_v38 }
 0x222   :  { %v520_v53 = vadd.f32 %v4193_v0, %v4278_v62  ;;  %v522_v6 = vadd.f32 %v4199_v5, %v4278_v62  ;;  %v995_v0 = vpop.f32.mrf.mxu1 }
 0x224   :  { %v3268_v18 = vpop.eup %3267 }
 0x225   :  { %v3270_v3 = vpop.eup %3269  ;;  %v1019_v46 = vmul.f32 0.5, %v3268_v18 }
 0x226   :  { %v1018_v35 = vmul.f32 0.5, %v3270_v3 }
 0x227   :  { %v4276_v57 = vpop.f32.mrf.mxu3  ;;  %v1027_v41 = vadd.f32 0.5, %v1019_v46  ;;  %v525_v46 = vadd.f32 %v4205_v28, %v4278_v62 }
 0x228   :  { %5115 = vst [vmem:[#allocation62_spill] sm:$0xff] %v4276_v57  ;;  %v1015_v57 = vmul.f32 0.5, %v3264_v11  ;;  %v1001_v11 = vadd.f32 %v993_v36, %v611_v50  ;;  %v1026_v5 = vadd.f32 0.5, %v1018_v35 }
 0x229   :  { %v1031_v20 = vmul.f32 0.0, %v1027_v41  ;;  %v429_v41 = vadd.f32 %v4173_v54, %v4266_v13  ;;  %v527_v54 = vadd.f32 %v4209_v10, %v4278_v62 }
 0x22a   :  { %v1023_v22 = vadd.f32 0.5, %v1015_v57 }
 0x22f   :  { %v979_v56 = vpop.f32.mrf.mxu3 }
 0x230   :  { %v1000_v8 = vadd.f32 %v979_v56, %v520_v53  ;;  %v1030_v56 = vmul.f32 0.0, %v1023_v22 }
 0x232   :  { %3271 = vtanh.f32 %v1000_v8  ;;  %v1005_v8 = vadd.f32 %v995_v0, %v615_v25 }
 0x237   :  { %v981_v39 = vpop.f32.mrf.mxu3 }
 0x238   :  { %v3272_v53 = vpop.eup %3271  ;;  %v1004_v37 = vadd.f32 %v981_v39, %v522_v6 }
 0x239   :  { %v1032_v45 = vmul.f32 %v3272_v53, %v1022_v14 }
 0x23a   :  { %3273 = vtanh.f32 %v1004_v37 }
 0x23b   :  { %v4288_v57 = vadd.f32 %v1032_v45, %v1030_v56  ;;  %3275 = vtanh.f32 %v1001_v11 }
 0x23c   :  { %3277 = vtanh.f32 %v1005_v8 }
 0x23d   :  { %3279 = vtanh.f32 %v4288_v57 }
 0x240   :  { %v3274_v38 = vpop.eup %3273 }
 0x241   :  { %v1033_v12 = vmul.f32 %v3274_v38, %v1026_v5  ;;  %v3276_v7 = vpop.eup %3275  ;;  %v478_v5 = vadd.f32 %v4222_v47, %v4264_v40  ;;  %v620_v38 = vmul.f32 0.5, %v429_v41 }
 0x242   :  { %v3278_v63 = vpop.eup %3277  ;;  %v1017_v14 = vmul.f32 0.5, %v3276_v7 }
 0x243   :  { %v4291_v36 = vadd.f32 %v1033_v12, %v1031_v20  ;;  %v1021_v25 = vmul.f32 0.5, %v3278_v63  ;;  %v3280_v22 = vpop.eup %3279  ;;  %v427_v63 = vadd.f32 %v4161_v48, %v4266_v13  ;;  %v476_v20 = vadd.f32 %v4214_v34, %v4264_v40  ;;  %v573_v34 = vpop.f32.mrf.mxu0 }
 0x244   :  { %v1025_v45 = vadd.f32 0.5, %v1017_v14  ;;  %v621_v12 = vmul.f32 0.5, %v478_v5  ;;  %v574_v47 = vadd.f32 %v573_v34, %v4280_v26 }
 0x245   :  { %3281 = vtanh.f32 %v4291_v36  ;;  %v1029_v18 = vadd.f32 0.5, %v1021_v25  ;;  %v616_v39 = vmul.f32 0.5, %v427_v63  ;;  %v617_v53 = vmul.f32 0.5, %v476_v20 }
 0x246   :  { %v1038_v6 = vmul.f32 %v3280_v22, %v1025_v45 }
 0x24b   :  { %v3282_v50 = vpop.eup %3281 }
 0x24c   :  { %v1039_v0 = vmul.f32 %v3282_v50, %v1029_v18 }
 0x24e   :  { %v4294_v3 = vpack.c.bf16 %v1039_v0, %v1038_v6 }
 0x250   :  { %5116 = vst [vmem:[#allocation63_spill] sm:$0xff] %v4294_v3  ;;  %1060 = vmatmul.bf16.vlgmr.msra.gmra.mxu2 %v4294_v3  ;;  %1074 = vmatmul.bf16.vlgmr.msrb.gmra.mxu3 %v4294_v3 }
 0x251   :  { %1088 = vmatmul.bf16.vlgmr.msrb.gmra.mxu1 %v4294_v3  ;;  %1191 = vmatpush.bf16.msra.mxu2 %v4072_v58 }
 0x252   :  { %1205 = vmatpush.bf16.msrb.mxu3 %v4035_v24  ;;  %1288 = vmatpush.bf16.msrb.mxu1 %v3847_v52 }
 0x255   :  { %1192 = vmatpush.bf16.msra.mxu2 %v4103_v9 }
 0x256   :  { %1206 = vmatpush.bf16.msrb.mxu3 %v4044_v42  ;;  %1289 = vmatpush.bf16.msrb.mxu1 %v3860_v60 }
 0x259   :  { %1193 = vmatpush.bf16.msra.mxu2 %v4111_v16 }
 0x25a   :  { %1207 = vmatpush.bf16.msrb.mxu3 %v4050_v49  ;;  %1290 = vmatpush.bf16.msrb.mxu1 %v3872_v4 }
 0x25d   :  { %1194 = vmatpush.bf16.msra.mxu2 %v4119_v51 }
 0x25e   :  { %1208 = vmatpush.bf16.msrb.mxu3 %v4057_v31  ;;  %1291 = vmatpush.bf16.msrb.mxu1 %v3884_v15 }
 0x260   :  { %1102 = vmatmul.bf16.vlgmr.msrb.gmra.mxu2 %v4294_v3 }
 0x261   :  { %1195 = vmatpush.bf16.msra.mxu2 %v4125_v1 }
 0x262   :  { %1209 = vmatpush.bf16.msrb.mxu3 %v4068_v17  ;;  %1292 = vmatpush.bf16.msrb.mxu1 %v3901_v23 }
 0x265   :  { %1196 = vmatpush.bf16.msra.mxu2 %v4131_v27 }
 0x266   :  { %1210 = vmatpush.bf16.msrb.mxu3 %v4078_v2  ;;  %1293 = vmatpush.bf16.msrb.mxu1 %v3914_v32 }
 0x269   :  { %1197 = vmatpush.bf16.msra.mxu2 %v4137_v33 }
 0x26a   :  { %1211 = vmatpush.bf16.msrb.mxu3 %v4084_v55  ;;  %1294 = vmatpush.bf16.msrb.mxu1 %v3926_v43 }
 0x26d   :  { %1198 = vmatpush.bf16.msra.mxu2 %v4145_v44 }
 0x26e   :  { %1212 = vmatpush.bf16.msrb.mxu3 %v4090_v30  ;;  %1295 = vmatpush.bf16.msrb.mxu1 %v3934_v61 }
 0x271   :  { %1302 = vmatpush.bf16.msrb.mxu2 %v4072_v58 }
 0x275   :  { %1303 = vmatpush.bf16.msrb.mxu2 %v4103_v9 }
 0x279   :  { %1304 = vmatpush.bf16.msrb.mxu2 %v4111_v16 }
 0x27d   :  { %1305 = vmatpush.bf16.msrb.mxu2 %v4119_v51 }
 0x281   :  { %1306 = vmatpush.bf16.msrb.mxu2 %v4125_v1 }
 0x285   :  { %1307 = vmatpush.bf16.msrb.mxu2 %v4131_v27 }
 0x289   :  { %1308 = vmatpush.bf16.msrb.mxu2 %v4137_v33 }
 0x28d   :  { %1309 = vmatpush.bf16.msrb.mxu2 %v4145_v44 }
 0x2ce   :  { %v1089_v11 = vpop.f32.mrf.mxu1 }
 0x2cf   :  { %v1110_v48 = vadd.f32 %v1089_v11, %v525_v46 }
 0x2d3   :  { %v1061_v37 = vpop.f32.mrf.mxu2  ;;  %v1075_v56 = vpop.f32.mrf.mxu3 }
 0x2d4   :  { %v1108_v8 = vadd.f32 %v1061_v37, %v616_v39  ;;  %v1109_v35 = vadd.f32 %v1075_v56, %v617_v53  ;;  %v619_v37 = vmul.f32 0.5, %v574_v47  ;;  %v575_v56 = vpop.f32.mrf.mxu0 }
 0x2d6   :  { %3283 = vtanh.f32 %v1108_v8  ;;  %v1091_v50 = vpop.f32.mrf.mxu1 }
 0x2d7   :  { %3285 = vtanh.f32 %v1109_v35  ;;  %v1114_v39 = vadd.f32 %v1091_v50, %v527_v54 }
 0x2d8   :  { %3287 = vtanh.f32 %v1110_v48  ;;  %v576_v48 = vadd.f32 %v575_v56, %v4280_v26 }
 0x2db   :  { %v1063_v7 = vpop.f32.mrf.mxu2  ;;  %v1077_v14 = vpop.f32.mrf.mxu3 }
 0x2dc   :  { %v3284_v25 = vpop.eup %3283  ;;  %v1112_v22 = vadd.f32 %v1063_v7, %v620_v38  ;;  %v1113_v28 = vadd.f32 %v1077_v14, %v621_v12  ;;  %v623_v14 = vmul.f32 0.5, %v576_v48  ;;  %v530_v48 = vadd.f32 %v4216_v19, %v4278_v62 }
 0x2dd   :  { %v3286_v45 = vpop.eup %3285  ;;  %v1124_v18 = vmul.f32 0.5, %v3284_v25 }
 0x2de   :  { %v1125_v6 = vmul.f32 0.5, %v3286_v45  ;;  %3289 = vtanh.f32 %v1112_v22  ;;  %v3288_v63 = vpop.eup %3287 }
 0x2df   :  { %v1132_v0 = vadd.f32 0.5, %v1124_v18  ;;  %3291 = vtanh.f32 %v1113_v28 }
 0x2e0   :  { %v1133_v20 = vadd.f32 0.5, %v1125_v6  ;;  %3293 = vtanh.f32 %v1114_v39 }
 0x2e1   :  { %v1142_v53 = vmul.f32 %v3288_v63, %v1132_v0 }
 0x2e2   :  { %v1140_v11 = vmul.f32 %v1133_v20, %v4288_v57 }
 0x2e3   :  { %v1103_v46 = vpop.f32.mrf.mxu2 }
 0x2e4   :  { %v3290_v8 = vpop.eup %3289  ;;  %v4346_v35 = vadd.f32 %v1142_v53, %v1140_v11  ;;  %v1111_v5 = vadd.f32 %v1103_v46, %v619_v37  ;;  %v481_v11 = vadd.f32 %v4228_v29, %v4264_v40  ;;  %v432_v46 = vadd.f32 %v4185_v21, %v4266_v13 }
 0x2e5   :  { %v3292_v10 = vpop.eup %3291  ;;  %v1128_v41 = vmul.f32 0.5, %v3290_v8 }
 0x2e6   :  { %v1129_v34 = vmul.f32 0.5, %v3292_v10  ;;  %3295 = vtanh.f32 %v1111_v5  ;;  %v3294_v7 = vpop.eup %3293  ;;  %v625_v37 = vmul.f32 0.5, %v481_v11  ;;  %v483_v10 = vadd.f32 %v4234_v59, %v4264_v40 }
 0x2e7   :  { %v1136_v38 = vadd.f32 0.5, %v1128_v41  ;;  %v624_v41 = vmul.f32 0.5, %v432_v46 }
 0x2e8   :  { %v1137_v12 = vadd.f32 0.5, %v1129_v34 }
 0x2e9   :  { %v1143_v25 = vmul.f32 %v3294_v7, %v1136_v38 }
 0x2ea   :  { %v1141_v57 = vmul.f32 %v1137_v12, %v4291_v36  ;;  %v629_v12 = vmul.f32 0.5, %v483_v10 }
 0x2eb   :  { %v1105_v22 = vpop.f32.mrf.mxu2 }
 0x2ec   :  { %v1115_v28 = vadd.f32 %v1105_v22, %v623_v14  ;;  %v3296_v45 = vpop.eup %3295  ;;  %v4350_v18 = vadd.f32 %v1143_v25, %v1141_v57  ;;  %v5118_v14 = vld [vmem:[#allocation37_spill] sm:$0xff]  ;;  %v578_v22 = vpop.f32.mrf.mxu0 }
 0x2ed   :  { %v1127_v50 = vmul.f32 0.5, %v3296_v45  ;;  %v434_v25 = vadd.f32 %v5118_v14, %v4266_v13 }
 0x2ee   :  { %3297 = vtanh.f32 %v1115_v28 }
 0x2ef   :  { %3299 = vtanh.f32 %v4346_v35  ;;  %v1135_v6 = vadd.f32 0.5, %v1127_v50  ;;  %v628_v45 = vmul.f32 0.5, %v434_v25 }
 0x2f0   :  { %3301 = vtanh.f32 %v4350_v18 }
 0x2f4   :  { %v3298_v54 = vpop.eup %3297  ;;  %v580_v10 = vpop.f32.mrf.mxu0 }
 0x2f5   :  { %v1131_v47 = vmul.f32 0.5, %v3298_v54  ;;  %v3300_v0 = vpop.eup %3299 }
 0x2f6   :  { %v3302_v20 = vpop.eup %3301  ;;  %v1148_v39 = vmul.f32 %v3300_v0, %v1135_v6  ;;  %v5119_v6 = vld [vmem:[#allocation42_spill] sm:$0xff] }
 0x2f7   :  { %v1139_v63 = vadd.f32 0.5, %v1131_v47  ;;  %v532_v47 = vadd.f32 %v5119_v6, %v4278_v62 }
 0x2f9   :  { %v1149_v53 = vmul.f32 %v3302_v20, %v1139_v63  ;;  %v579_v20 = vadd.f32 %v578_v22, %v4280_v26 }
 0x2fb   :  { %v4354_v36 = vpack.c.bf16 %v1149_v53, %v1148_v39 }
 0x2fd   :  { %5117 = vst [vmem:[#allocation64_spill] sm:$0xff] %v4354_v36  ;;  %1171 = vmatmul.bf16.vlgmr.msra.gmra.mxu3 %v4354_v36  ;;  %1185 = vmatmul.bf16.vlgmr.msra.gmra.mxu1 %v4354_v36 }
 0x2fe   :  { %1199 = vmatmul.bf16.vlgmr.msra.gmra.mxu2 %v4354_v36  ;;  %1316 = vmatpush.bf16.msra.mxu3 %v4035_v24 }
 0x2ff   :  { %1399 = vmatpush.bf16.msra.mxu1 %v3847_v52  ;;  %1413 = vmatpush.bf16.msra.mxu2 %v4072_v58 }
 0x302   :  { %1317 = vmatpush.bf16.msra.mxu3 %v4044_v42 }
 0x303   :  { %1400 = vmatpush.bf16.msra.mxu1 %v3860_v60  ;;  %1414 = vmatpush.bf16.msra.mxu2 %v4103_v9 }
 0x306   :  { %1318 = vmatpush.bf16.msra.mxu3 %v4050_v49 }
 0x307   :  { %1401 = vmatpush.bf16.msra.mxu1 %v3872_v4  ;;  %1415 = vmatpush.bf16.msra.mxu2 %v4111_v16 }
 0x30a   :  { %1319 = vmatpush.bf16.msra.mxu3 %v4057_v31 }
 0x30b   :  { %1402 = vmatpush.bf16.msra.mxu1 %v3884_v15  ;;  %1416 = vmatpush.bf16.msra.mxu2 %v4119_v51 }
 0x30d   :  { %1213 = vmatmul.bf16.vlgmr.msrb.gmra.mxu3 %v4354_v36 }
 0x30e   :  { %1320 = vmatpush.bf16.msra.mxu3 %v4068_v17 }
 0x30f   :  { %1403 = vmatpush.bf16.msra.mxu1 %v3901_v23  ;;  %1417 = vmatpush.bf16.msra.mxu2 %v4125_v1 }
 0x312   :  { %1321 = vmatpush.bf16.msra.mxu3 %v4078_v2 }
 0x313   :  { %1404 = vmatpush.bf16.msra.mxu1 %v3914_v32  ;;  %1418 = vmatpush.bf16.msra.mxu2 %v4131_v27 }
 0x316   :  { %1322 = vmatpush.bf16.msra.mxu3 %v4084_v55 }
 0x317   :  { %1405 = vmatpush.bf16.msra.mxu1 %v3926_v43  ;;  %1419 = vmatpush.bf16.msra.mxu2 %v4137_v33 }
 0x31a   :  { %1323 = vmatpush.bf16.msra.mxu3 %v4090_v30 }
 0x31b   :  { %1406 = vmatpush.bf16.msra.mxu1 %v3934_v61  ;;  %1420 = vmatpush.bf16.msra.mxu2 %v4145_v44 }
 0x31e   :  { %1427 = vmatpush.bf16.msrb.mxu3 %v4035_v24 }
 0x322   :  { %1428 = vmatpush.bf16.msrb.mxu3 %v4044_v42 }
 0x326   :  { %1429 = vmatpush.bf16.msrb.mxu3 %v4050_v49 }
 0x32a   :  { %1430 = vmatpush.bf16.msrb.mxu3 %v4057_v31 }
 0x32e   :  { %1431 = vmatpush.bf16.msrb.mxu3 %v4068_v17 }
 0x332   :  { %1432 = vmatpush.bf16.msrb.mxu3 %v4078_v2 }
 0x336   :  { %1433 = vmatpush.bf16.msrb.mxu3 %v4084_v55 }
 0x33a   :  { %1434 = vmatpush.bf16.msrb.mxu3 %v4090_v30 }
 0x37a   :  { %v1186_v56 = vpop.f32.mrf.mxu1 }
 0x37b   :  { %v1220_v8 = vadd.f32 %v1186_v56, %v625_v37 }
 0x37d   :  { %3303 = vtanh.f32 %v1220_v8  ;;  %v627_v8 = vmul.f32 0.5, %v579_v20 }
 0x380   :  { %v1172_v5 = vpop.f32.mrf.mxu3 }
 0x381   :  { %v1219_v34 = vadd.f32 %v1172_v5, %v624_v41  ;;  %v1200_v38 = vpop.f32.mrf.mxu2 }
 0x382   :  { %v1188_v7 = vpop.f32.mrf.mxu1  ;;  %v1221_v21 = vadd.f32 %v1200_v38, %v530_v48 }
 0x383   :  { %v3304_v29 = vpop.eup %3303  ;;  %3305 = vtanh.f32 %v1219_v34  ;;  %v1224_v57 = vadd.f32 %v1188_v7, %v629_v12  ;;  %v581_v7 = vadd.f32 %v580_v10, %v4280_v26  ;;  %v5127_v10 = vld [vmem:[#allocation29_spill] sm:$0xff] }
 0x384   :  { %v1236_v28 = vmul.f32 0.5, %v3304_v29  ;;  %3307 = vtanh.f32 %v1221_v21 }
 0x385   :  { %3309 = vtanh.f32 %v1224_v57  ;;  %v631_v21 = vmul.f32 0.5, %v581_v7 }
 0x386   :  { %v1244_v0 = vadd.f32 0.5, %v1236_v28 }
 0x388   :  { %v1174_v59 = vpop.f32.mrf.mxu3  ;;  %v1251_v56 = vmul.f32 %v1244_v0, %v4346_v35 }
 0x389   :  { %v3306_v50 = vpop.eup %3305  ;;  %v1223_v54 = vadd.f32 %v1174_v59, %v628_v45  ;;  %v1202_v19 = vpop.f32.mrf.mxu2 }
 0x38a   :  { %v1235_v63 = vmul.f32 0.5, %v3306_v50  ;;  %v1225_v53 = vadd.f32 %v1202_v19, %v532_v47  ;;  %v3308_v11 = vpop.eup %3307 }
 0x38b   :  { %3311 = vtanh.f32 %v1223_v54  ;;  %v3310_v37 = vpop.eup %3309 }
 0x38c   :  { %v1243_v39 = vadd.f32 0.5, %v1235_v63  ;;  %3313 = vtanh.f32 %v1225_v53  ;;  %v1240_v34 = vmul.f32 0.5, %v3310_v37  ;;  %v5123_v37 = vld [vmem:[#allocation25_spill] sm:$0xff] }
 0x38e   :  { %v1253_v46 = vmul.f32 %v3308_v11, %v1243_v39  ;;  %v1248_v14 = vadd.f32 0.5, %v1240_v34  ;;  %v5122_v11 = vld [vmem:[#allocation24_spill] sm:$0xff] }
 0x390   :  { %v4406_v41 = vadd.f32 %v1253_v46, %v1251_v56  ;;  %v1214_v5 = vpop.f32.mrf.mxu3  ;;  %v1252_v22 = vmul.f32 %v1248_v14, %v4350_v18  ;;  %v5121_v18 = vld [vmem:[#allocation23_spill] sm:$0xff]  ;;  %v5124_v56 = vld [vmem:[#allocation26_spill] sm:$0xff] }
 0x391   :  { %v3312_v48 = vpop.eup %3311  ;;  %v1222_v38 = vadd.f32 %v1214_v5, %v627_v8  ;;  %v5125_v46 = vld [vmem:[#allocation27_spill] sm:$0xff]  ;;  %v5126_v8 = vld [vmem:[#allocation28_spill] sm:$0xff]  ;;  %v583_v5 = vpop.f32.mrf.mxu0 }
 0x392   :  { %v1239_v12 = vmul.f32 0.5, %v3312_v48  ;;  %v3314_v25 = vpop.eup %3313  ;;  %v5128_v48 = vld [vmem:[#allocation30_spill] sm:$0xff] }
 0x393   :  { %3315 = vtanh.f32 %v1222_v38 }
 0x394   :  { %v1247_v29 = vadd.f32 0.5, %v1239_v12 }
 0x396   :  { %v1254_v57 = vmul.f32 %v3314_v25, %v1247_v29 }
 0x398   :  { %v1216_v35 = vpop.f32.mrf.mxu3  ;;  %v4410_v59 = vadd.f32 %v1254_v57, %v1252_v22 }
 0x399   :  { %v1226_v28 = vadd.f32 %v1216_v35, %v631_v21  ;;  %v3316_v45 = vpop.eup %3315  ;;  %v585_v34 = vpop.f32.mrf.mxu0  ;;  %v5134_v35 = vld [vmem:[#allocation38_spill] sm:$0xff] }
 0x39a   :  { %v1238_v50 = vmul.f32 0.5, %v3316_v45  ;;  %v437_v22 = vadd.f32 %v5134_v35, %v4266_v13 }
 0x39b   :  { %3317 = vtanh.f32 %v1226_v28  ;;  %v5135_v28 = vld [vmem:[#allocation49_spill] sm:$0xff] }
 0x39c   :  { %3319 = vtanh.f32 %v4406_v41  ;;  %v1246_v19 = vadd.f32 0.5, %v1238_v50  ;;  %v486_v45 = vadd.f32 %v5135_v28, %v4264_v40  ;;  %v632_v50 = vmul.f32 0.5, %v437_v22 }
 0x39d   :  { %3321 = vtanh.f32 %v4410_v59 }
 0x3a1   :  { %v3318_v54 = vpop.eup %3317  ;;  %v4452_v38 = vpop.f32.mrf.mxu0 }
 0x3a2   :  { %v1242_v6 = vmul.f32 0.5, %v3318_v54  ;;  %v3320_v47 = vpop.eup %3319  ;;  %v633_v54 = vmul.f32 0.5, %v486_v45 }
 0x3a3   :  { %v3322_v63 = vpop.eup %3321  ;;  %v1259_v20 = vmul.f32 %v3320_v47, %v1246_v19 }
 0x3a4   :  { %v1250_v0 = vadd.f32 0.5, %v1242_v6 }
 0x3a6   :  { %v1260_v39 = vmul.f32 %v3322_v63, %v1250_v0  ;;  %v5136_v63 = vld [vmem:[#allocation39_spill] sm:$0xff] }
 0x3a8   :  { %v4414_v53 = vpack.c.bf16 %v1260_v39, %v1259_v20  ;;  %v439_v20 = vadd.f32 %v5136_v63, %v4266_v13  ;;  %v5137_v39 = vld [vmem:[#allocation53_spill] sm:$0xff]  ;;  %v584_v63 = vadd.f32 %v583_v5, %v4280_v26 }
 0x3a9   :  { %v4454_v12 = vpop.f32.mrf.mxu0 }
 0x3aa   :  { %5120 = vst [vmem:[#allocation37_spill] sm:$0xff] %v4414_v53  ;;  %1282 = vmatmul.bf16.vlgmr.msra.gmra.mxu0 %v4414_v53  ;;  %1296 = vmatmul.bf16.vlgmr.msrb.gmra.mxu1 %v4414_v53 }
 0x3ab   :  { %1310 = vmatmul.bf16.vlgmr.msrb.gmra.mxu2 %v4414_v53  ;;  %1324 = vmatmul.bf16.vlgmr.msra.gmra.mxu3 %v4414_v53  ;;  %v636_v53 = vmul.f32 0.5, %v439_v20  ;;  %v5139_v20 = vld [vmem:[#allocation46_spill] sm:$0xff] }
 0x3ac   :  { %1496 = vmatpush.bf16.msra.mxu0 %v5121_v18  ;;  %1510 = vmatpush.bf16.msrb.mxu1 %v3847_v52 }
 0x3ad   :  { %1524 = vmatpush.bf16.msrb.mxu2 %v4072_v58  ;;  %1538 = vmatpush.bf16.msra.mxu3 %v4035_v24 }
 0x3b0   :  { %1497 = vmatpush.bf16.msra.mxu0 %v5122_v11  ;;  %1511 = vmatpush.bf16.msrb.mxu1 %v3860_v60 }
 0x3b1   :  { %1525 = vmatpush.bf16.msrb.mxu2 %v4103_v9  ;;  %1539 = vmatpush.bf16.msra.mxu3 %v4044_v42  ;;  %v4456_v7 = vpop.f32.mrf.mxu0 }
 0x3b4   :  { %1498 = vmatpush.bf16.msra.mxu0 %v5123_v37  ;;  %1512 = vmatpush.bf16.msrb.mxu1 %v3872_v4 }
 0x3b5   :  { %1526 = vmatpush.bf16.msrb.mxu2 %v4111_v16  ;;  %1540 = vmatpush.bf16.msra.mxu3 %v4050_v49 }
 0x3b8   :  { %1499 = vmatpush.bf16.msra.mxu0 %v5124_v56  ;;  %1513 = vmatpush.bf16.msrb.mxu1 %v3884_v15 }
 0x3b9   :  { %1527 = vmatpush.bf16.msrb.mxu2 %v4119_v51  ;;  %1541 = vmatpush.bf16.msra.mxu3 %v4057_v31  ;;  %v4458_v29 = vpop.f32.mrf.mxu0 }
 0x3ba   :  { %5129 = vst [vmem:[#allocation42_spill] sm:$0xff] %v4458_v29 }
 0x3bc   :  { %1500 = vmatpush.bf16.msra.mxu0 %v5125_v46  ;;  %1514 = vmatpush.bf16.msrb.mxu1 %v3901_v23 }
 0x3bd   :  { %1528 = vmatpush.bf16.msrb.mxu2 %v4125_v1  ;;  %1542 = vmatpush.bf16.msra.mxu3 %v4068_v17 }
 0x3c0   :  { %1501 = vmatpush.bf16.msra.mxu0 %v5126_v8  ;;  %1515 = vmatpush.bf16.msrb.mxu1 %v3914_v32 }
 0x3c1   :  { %1529 = vmatpush.bf16.msrb.mxu2 %v4131_v27  ;;  %1543 = vmatpush.bf16.msra.mxu3 %v4078_v2  ;;  %v4460_v14 = vpop.f32.mrf.mxu0 }
 0x3c2   :  { %5130 = vst [vmem:[#allocation23_spill] sm:$0xff] %v4460_v14 }
 0x3c4   :  { %1502 = vmatpush.bf16.msra.mxu0 %v5127_v10  ;;  %1516 = vmatpush.bf16.msrb.mxu1 %v3926_v43 }
 0x3c5   :  { %1530 = vmatpush.bf16.msrb.mxu2 %v4137_v33  ;;  %1544 = vmatpush.bf16.msra.mxu3 %v4084_v55 }
 0x3c8   :  { %1503 = vmatpush.bf16.msra.mxu0 %v5128_v48  ;;  %1517 = vmatpush.bf16.msrb.mxu1 %v3934_v61 }
 0x3c9   :  { %1531 = vmatpush.bf16.msrb.mxu2 %v4145_v44  ;;  %1545 = vmatpush.bf16.msra.mxu3 %v4090_v30  ;;  %v4462_v25 = vpop.f32.mrf.mxu0 }
 0x3ca   :  { %5131 = vst [vmem:[#allocation24_spill] sm:$0xff] %v4462_v25 }
 0x3d1   :  { %v4464_v21 = vpop.f32.mrf.mxu0 }
 0x3d2   :  { %5132 = vst [vmem:[#allocation25_spill] sm:$0xff] %v4464_v21  ;;  %v488_v21 = vadd.f32 %v5137_v39, %v4264_v40 }
 0x3d4   :  { %v637_v36 = vmul.f32 0.5, %v488_v21  ;;  %v635_v21 = vmul.f32 0.5, %v584_v63 }
 0x3d9   :  { %v4466_v57 = vpop.f32.mrf.mxu0 }
 0x3da   :  { %5133 = vst [vmem:[#allocation26_spill] sm:$0xff] %v4466_v57  ;;  %v5138_v57 = vld [vmem:[#allocation44_spill] sm:$0xff] }
 0x3db   :  { %v535_v35 = vadd.f32 %v5138_v57, %v4278_v62 }
 0x427   :  { %v1283_v19 = vpop.f32.mrf.mxu0  ;;  %v1297_v6 = vpop.f32.mrf.mxu1 }
 0x428   :  { %v1330_v47 = vadd.f32 %v1283_v19, %v632_v50  ;;  %v1331_v0 = vadd.f32 %v1297_v6, %v633_v54 }
 0x42a   :  { %3323 = vtanh.f32 %v1330_v47  ;;  %v586_v47 = vadd.f32 %v585_v34, %v4280_v26 }
 0x42b   :  { %3325 = vtanh.f32 %v1331_v0 }
 0x42e   :  { %v1311_v28 = vpop.f32.mrf.mxu2  ;;  %v1325_v22 = vpop.f32.mrf.mxu3 }
 0x42f   :  { %v1332_v45 = vadd.f32 %v1311_v28, %v535_v35  ;;  %v1285_v3 = vpop.f32.mrf.mxu0  ;;  %v1299_v25 = vpop.f32.mrf.mxu1  ;;  %v537_v35 = vadd.f32 %v5139_v20, %v4278_v62  ;;  %v639_v28 = vmul.f32 0.5, %v586_v47 }
 0x430   :  { %v3324_v50 = vpop.eup %3323  ;;  %v1334_v54 = vadd.f32 %v1285_v3, %v636_v53  ;;  %v1335_v19 = vadd.f32 %v1299_v25, %v637_v36  ;;  %v1333_v53 = vadd.f32 %v1325_v22, %v635_v21 }
 0x431   :  { %v3326_v6 = vpop.eup %3325  ;;  %3327 = vtanh.f32 %v1332_v45  ;;  %v1346_v0 = vmul.f32 0.5, %v3324_v50 }
 0x432   :  { %v1347_v39 = vmul.f32 0.5, %v3326_v6  ;;  %3329 = vtanh.f32 %v1334_v54 }
 0x433   :  { %3331 = vtanh.f32 %v1335_v19  ;;  %v1354_v14 = vadd.f32 0.5, %v1346_v0 }
 0x434   :  { %v1355_v57 = vadd.f32 0.5, %v1347_v39 }
 0x436   :  { %v1313_v29 = vpop.f32.mrf.mxu2  ;;  %v1327_v3 = vpop.f32.mrf.mxu3  ;;  %v1362_v5 = vmul.f32 %v1355_v57, %v4406_v41 }
 0x437   :  { %v3328_v36 = vpop.eup %3327  ;;  %v1336_v25 = vadd.f32 %v1313_v29, %v537_v35  ;;  %v1337_v34 = vadd.f32 %v1327_v3, %v639_v28 }
 0x438   :  { %v1364_v45 = vmul.f32 %v3328_v36, %v1354_v14  ;;  %v3330_v50 = vpop.eup %3329 }
 0x439   :  { %3333 = vtanh.f32 %v1336_v25  ;;  %v3332_v54 = vpop.eup %3331  ;;  %v1350_v19 = vmul.f32 0.5, %v3330_v50 }
 0x43a   :  { %v4483_v6 = vadd.f32 %v1364_v45, %v1362_v5  ;;  %3335 = vtanh.f32 %v1333_v53  ;;  %v1351_v63 = vmul.f32 0.5, %v3332_v54 }
 0x43b   :  { %3337 = vtanh.f32 %v1337_v34  ;;  %v1358_v0 = vadd.f32 0.5, %v1350_v19  ;;  %v5141_v34 = vld [vmem:[#allocation56_spill] sm:$0xff] }
 0x43c   :  { %v1359_v47 = vadd.f32 0.5, %v1351_v63  ;;  %3339 = vtanh.f32 %v4483_v6  ;;  %v491_v50 = vadd.f32 %v5141_v34, %v4264_v40 }
 0x43e   :  { %v1363_v20 = vmul.f32 %v1359_v47, %v4410_v59  ;;  %v5140_v59 = vld [vmem:[#allocation40_spill] sm:$0xff]  ;;  %v641_v19 = vmul.f32 0.5, %v491_v50 }
 0x43f   :  { %v3334_v39 = vpop.eup %3333  ;;  %v442_v45 = vadd.f32 %v5140_v59, %v4266_v13 }
 0x440   :  { %v1365_v22 = vmul.f32 %v3334_v39, %v1358_v0  ;;  %v3336_v29 = vpop.eup %3335 }
 0x441   :  { %v3338_v21 = vpop.eup %3337  ;;  %v1349_v14 = vmul.f32 0.5, %v3336_v29  ;;  %v640_v54 = vmul.f32 0.5, %v442_v45  ;;  %v5143_v29 = vld [vmem:[#allocation59_spill] sm:$0xff] }
 0x442   :  { %v4487_v41 = vadd.f32 %v1365_v22, %v1363_v20  ;;  %v1353_v57 = vmul.f32 0.5, %v3338_v21  ;;  %v3340_v35 = vpop.eup %3339  ;;  %v5142_v20 = vld [vmem:[#allocation41_spill] sm:$0xff]  ;;  %v493_v21 = vadd.f32 %v5143_v29, %v4264_v40 }
 0x443   :  { %v1357_v28 = vadd.f32 0.5, %v1349_v14  ;;  %v444_v22 = vadd.f32 %v5142_v20, %v4266_v13  ;;  %v5144_v14 = vld [vmem:[#allocation47_spill] sm:$0xff] }
 0x444   :  { %3341 = vtanh.f32 %v4487_v41  ;;  %v1361_v3 = vadd.f32 0.5, %v1353_v57  ;;  %v540_v57 = vadd.f32 %v5144_v14, %v4278_v62 }
 0x445   :  { %v1370_v53 = vmul.f32 %v3340_v35, %v1357_v28  ;;  %v644_v35 = vmul.f32 0.5, %v444_v22  ;;  %v645_v28 = vmul.f32 0.5, %v493_v21  ;;  %v5145_v22 = vld [vmem:[#allocation50_spill] sm:$0xff] }
 0x446   :  { %v542_v29 = vadd.f32 %v5145_v22, %v4278_v62 }
 0x44a   :  { %v3342_v36 = vpop.eup %3341 }
 0x44b   :  { %v1371_v25 = vmul.f32 %v3342_v36, %v1361_v3 }
 0x44d   :  { %v4490_v5 = vpack.c.bf16 %v1371_v25, %v1370_v53 }
 0x44f   :  { %1393 = vmatmul.bf16.vlgmr.msrb.gmra.mxu0 %v4490_v5  ;;  %1407 = vmatmul.bf16.vlgmr.msra.gmra.mxu1 %v4490_v5 }
 0x450   :  { %1421 = vmatmul.bf16.vlgmr.msra.gmra.mxu2 %v4490_v5  ;;  %1435 = vmatmul.bf16.vlgmr.msrb.gmra.mxu3 %v4490_v5 }
 0x451   :  { %1607 = vmatpush.bf16.msrb.mxu0 %v5121_v18  ;;  %1621 = vmatpush.bf16.msra.mxu1 %v3847_v52 }
 0x452   :  { %1635 = vmatpush.bf16.msra.mxu2 %v4072_v58  ;;  %1649 = vmatpush.bf16.msrb.mxu3 %v4035_v24 }
 0x455   :  { %1608 = vmatpush.bf16.msrb.mxu0 %v5122_v11  ;;  %1622 = vmatpush.bf16.msra.mxu1 %v3860_v60 }
 0x456   :  { %1636 = vmatpush.bf16.msra.mxu2 %v4103_v9  ;;  %1650 = vmatpush.bf16.msrb.mxu3 %v4044_v42 }
 0x459   :  { %1609 = vmatpush.bf16.msrb.mxu0 %v5123_v37  ;;  %1623 = vmatpush.bf16.msra.mxu1 %v3872_v4 }
 0x45a   :  { %1637 = vmatpush.bf16.msra.mxu2 %v4111_v16  ;;  %1651 = vmatpush.bf16.msrb.mxu3 %v4050_v49 }
 0x45d   :  { %1610 = vmatpush.bf16.msrb.mxu0 %v5124_v56  ;;  %1624 = vmatpush.bf16.msra.mxu1 %v3884_v15 }
 0x45e   :  { %1638 = vmatpush.bf16.msra.mxu2 %v4119_v51  ;;  %1652 = vmatpush.bf16.msrb.mxu3 %v4057_v31 }
 0x461   :  { %1611 = vmatpush.bf16.msrb.mxu0 %v5125_v46  ;;  %1625 = vmatpush.bf16.msra.mxu1 %v3901_v23 }
 0x462   :  { %1639 = vmatpush.bf16.msra.mxu2 %v4125_v1  ;;  %1653 = vmatpush.bf16.msrb.mxu3 %v4068_v17 }
 0x465   :  { %1612 = vmatpush.bf16.msrb.mxu0 %v5126_v8  ;;  %1626 = vmatpush.bf16.msra.mxu1 %v3914_v32 }
 0x466   :  { %1640 = vmatpush.bf16.msra.mxu2 %v4131_v27  ;;  %1654 = vmatpush.bf16.msrb.mxu3 %v4078_v2 }
 0x469   :  { %1613 = vmatpush.bf16.msrb.mxu0 %v5127_v10  ;;  %1627 = vmatpush.bf16.msra.mxu1 %v3926_v43 }
 0x46a   :  { %1641 = vmatpush.bf16.msra.mxu2 %v4137_v33  ;;  %1655 = vmatpush.bf16.msrb.mxu3 %v4084_v55 }
 0x46d   :  { %1614 = vmatpush.bf16.msrb.mxu0 %v5128_v48  ;;  %1628 = vmatpush.bf16.msra.mxu1 %v3934_v61 }
 0x46e   :  { %1642 = vmatpush.bf16.msra.mxu2 %v4145_v44  ;;  %1656 = vmatpush.bf16.msrb.mxu3 %v4090_v30 }
 0x4cc   :  { %v1394_v63 = vpop.f32.mrf.mxu0  ;;  %v1408_v47 = vpop.f32.mrf.mxu1 }
 0x4cd   :  { %v1441_v0 = vadd.f32 %v1394_v63, %v640_v54  ;;  %v1442_v39 = vadd.f32 %v1408_v47, %v641_v19  ;;  %v589_v19 = vadd.f32 %v4452_v38, %v4280_v26  ;;  %v591_v63 = vadd.f32 %v4454_v12, %v4280_v26 }
 0x4cf   :  { %3343 = vtanh.f32 %v1441_v0  ;;  %v643_v20 = vmul.f32 0.5, %v589_v19  ;;  %v647_v21 = vmul.f32 0.5, %v591_v63 }
 0x4d0   :  { %3345 = vtanh.f32 %v1442_v39 }
 0x4d3   :  { %v1422_v3 = vpop.f32.mrf.mxu2  ;;  %v1436_v36 = vpop.f32.mrf.mxu3 }
 0x4d4   :  { %v1443_v53 = vadd.f32 %v1422_v3, %v540_v57  ;;  %v1396_v25 = vpop.f32.mrf.mxu0  ;;  %v1410_v59 = vpop.f32.mrf.mxu1  ;;  %v1444_v3 = vadd.f32 %v1436_v36, %v643_v20 }
 0x4d5   :  { %v3344_v45 = vpop.eup %3343  ;;  %v1445_v34 = vadd.f32 %v1396_v25, %v644_v35  ;;  %v1446_v50 = vadd.f32 %v1410_v59, %v645_v28 }
 0x4d6   :  { %v3346_v54 = vpop.eup %3345  ;;  %3347 = vtanh.f32 %v1443_v53  ;;  %v1457_v47 = vmul.f32 0.5, %v3344_v45 }
 0x4d7   :  { %v1458_v0 = vmul.f32 0.5, %v3346_v54  ;;  %3349 = vtanh.f32 %v1445_v34 }
 0x4d8   :  { %3351 = vtanh.f32 %v1446_v50  ;;  %v1465_v14 = vadd.f32 0.5, %v1457_v47 }
 0x4d9   :  { %v1466_v39 = vadd.f32 0.5, %v1458_v0 }
 0x4db   :  { %v1424_v57 = vpop.f32.mrf.mxu2  ;;  %v1438_v35 = vpop.f32.mrf.mxu3  ;;  %v1473_v53 = vmul.f32 %v1466_v39, %v4483_v6 }
 0x4dc   :  { %v3348_v28 = vpop.eup %3347  ;;  %v1447_v38 = vadd.f32 %v1424_v57, %v542_v29  ;;  %v1448_v12 = vadd.f32 %v1438_v35, %v647_v21 }
 0x4dd   :  { %v1475_v25 = vmul.f32 %v3348_v28, %v1465_v14  ;;  %v3350_v59 = vpop.eup %3349 }
 0x4de   :  { %3353 = vtanh.f32 %v1447_v38  ;;  %v3352_v45 = vpop.eup %3351  ;;  %v1461_v50 = vmul.f32 0.5, %v3350_v59 }
 0x4df   :  { %v4545_v34 = vadd.f32 %v1475_v25, %v1473_v53  ;;  %3355 = vtanh.f32 %v1444_v3  ;;  %v1462_v54 = vmul.f32 0.5, %v3352_v45  ;;  %v5152_v25 = vld [vmem:[#allocation55_spill] sm:$0xff] }
 0x4e0   :  { %3357 = vtanh.f32 %v1448_v12  ;;  %v1469_v63 = vadd.f32 0.5, %v1461_v50  ;;  %v547_v12 = vadd.f32 %v5152_v25, %v4278_v62 }
 0x4e1   :  { %v1470_v19 = vadd.f32 0.5, %v1462_v54  ;;  %3359 = vtanh.f32 %v4545_v34 }
 0x4e3   :  { %v1474_v0 = vmul.f32 %v1470_v19, %v4487_v41 }
 0x4e4   :  { %v3354_v47 = vpop.eup %3353 }
 0x4e5   :  { %v1476_v36 = vmul.f32 %v3354_v47, %v1469_v63  ;;  %v3356_v20 = vpop.eup %3355 }
 0x4e6   :  { %v3358_v22 = vpop.eup %3357  ;;  %v1460_v39 = vmul.f32 0.5, %v3356_v20 }
 0x4e7   :  { %v4549_v6 = vadd.f32 %v1476_v36, %v1474_v0  ;;  %v1464_v29 = vmul.f32 0.5, %v3358_v22  ;;  %v3360_v21 = vpop.eup %3359 }
 0x4e8   :  { %v1468_v14 = vadd.f32 0.5, %v1460_v39 }
 0x4e9   :  { %3361 = vtanh.f32 %v4549_v6  ;;  %v1472_v57 = vadd.f32 0.5, %v1464_v29 }
 0x4ea   :  { %v1481_v28 = vmul.f32 %v3360_v21, %v1468_v14 }
 0x4ef   :  { %v3362_v35 = vpop.eup %3361 }
 0x4f0   :  { %v1482_v3 = vmul.f32 %v3362_v35, %v1472_v57 }
 0x4f2   :  { %v4552_v38 = vpack.c.bf16 %v1482_v3, %v1481_v28 }
 0x4f4   :  { %1504 = vmatmul.bf16.vlgmr.msra.gmra.mxu0 %v4552_v38  ;;  %1518 = vmatmul.bf16.vlgmr.msrb.gmra.mxu1 %v4552_v38 }
 0x4f5   :  { %1532 = vmatmul.bf16.vlgmr.msrb.gmra.mxu2 %v4552_v38  ;;  %1546 = vmatmul.bf16.vlgmr.msra.gmra.mxu3 %v4552_v38 }
 0x4f6   :  { %1718 = vmatpush.bf16.msra.mxu0 %v5121_v18  ;;  %1732 = vmatpush.bf16.msrb.mxu1 %v3847_v52  ;;  %v5146_v52 = vld [vmem:[#allocation43_spill] sm:$0xff] }
 0x4f7   :  { %1746 = vmatpush.bf16.msrb.mxu2 %v4072_v58  ;;  %1760 = vmatpush.bf16.msra.mxu3 %v4035_v24 }
 0x4fa   :  { %1719 = vmatpush.bf16.msra.mxu0 %v5122_v11  ;;  %1733 = vmatpush.bf16.msrb.mxu1 %v3860_v60  ;;  %v447_v60 = vadd.f32 %v5146_v52, %v4266_v13 }
 0x4fb   :  { %1747 = vmatpush.bf16.msrb.mxu2 %v4103_v9  ;;  %1761 = vmatpush.bf16.msra.mxu3 %v4044_v42 }
 0x4fe   :  { %1720 = vmatpush.bf16.msra.mxu0 %v5123_v37  ;;  %1734 = vmatpush.bf16.msrb.mxu1 %v3872_v4  ;;  %v5147_v4 = vld [vmem:[#allocation31_spill] sm:$0xff] }
 0x4ff   :  { %1748 = vmatpush.bf16.msrb.mxu2 %v4111_v16  ;;  %1762 = vmatpush.bf16.msra.mxu3 %v4050_v49 }
 0x502   :  { %1721 = vmatpush.bf16.msra.mxu0 %v5124_v56  ;;  %1735 = vmatpush.bf16.msrb.mxu1 %v3884_v15  ;;  %v496_v15 = vadd.f32 %v5147_v4, %v4264_v40  ;;  %v594_v56 = vadd.f32 %v4456_v7, %v4280_v26 }
 0x503   :  { %1749 = vmatpush.bf16.msrb.mxu2 %v4119_v51  ;;  %1763 = vmatpush.bf16.msra.mxu3 %v4057_v31  ;;  %v5148_v31 = vld [vmem:[#allocation45_spill] sm:$0xff] }
 0x504   :  { %v651_v53 = vmul.f32 0.5, %v594_v56  ;;  %v3176_v56 = vld [vmem:[%s5048_s6 + $0x20] sm:$0xff] }
 0x506   :  { %1722 = vmatpush.bf16.msra.mxu0 %v5125_v46  ;;  %1736 = vmatpush.bf16.msrb.mxu1 %v3901_v23  ;;  %v648_v23 = vmul.f32 0.5, %v447_v60  ;;  %v5151_v46 = vld [vmem:[#allocation42_spill] sm:$0xff] }
 0x507   :  { %1750 = vmatpush.bf16.msrb.mxu2 %v4125_v1  ;;  %1764 = vmatpush.bf16.msra.mxu3 %v4068_v17  ;;  %v449_v17 = vadd.f32 %v5148_v31, %v4266_v13 }
 0x50a   :  { %1723 = vmatpush.bf16.msra.mxu0 %v5126_v8  ;;  %1737 = vmatpush.bf16.msrb.mxu1 %v3914_v32  ;;  %v649_v32 = vmul.f32 0.5, %v496_v15  ;;  %v596_v8 = vadd.f32 %v5151_v46, %v4280_v26  ;;  %v5157_v46 = vld [vmem:[#allocation58_spill] sm:$0xff] }
 0x50b   :  { %1751 = vmatpush.bf16.msrb.mxu2 %v4131_v27  ;;  %1765 = vmatpush.bf16.msra.mxu3 %v4078_v2  ;;  %v5150_v2 = vld [vmem:[#allocation52_spill] sm:$0xff] }
 0x50c   :  { %v655_v59 = vmul.f32 0.5, %v596_v8  ;;  %v550_v8 = vadd.f32 %v5157_v46, %v4278_v62 }
 0x50e   :  { %1724 = vmatpush.bf16.msra.mxu0 %v5127_v10  ;;  %1738 = vmatpush.bf16.msrb.mxu1 %v3926_v43 }
 0x50f   :  { %1752 = vmatpush.bf16.msrb.mxu2 %v4137_v33  ;;  %1766 = vmatpush.bf16.msra.mxu3 %v4084_v55  ;;  %v545_v55 = vadd.f32 %v5150_v2, %v4278_v62 }
 0x512   :  { %1725 = vmatpush.bf16.msra.mxu0 %v5128_v48  ;;  %1739 = vmatpush.bf16.msrb.mxu1 %v3934_v61  ;;  %v5149_v61 = vld [vmem:[#allocation32_spill] sm:$0xff] }
 0x513   :  { %1753 = vmatpush.bf16.msrb.mxu2 %v4145_v44  ;;  %1767 = vmatpush.bf16.msra.mxu3 %v4090_v30  ;;  %v498_v58 = vadd.f32 %v5149_v61, %v4264_v40  ;;  %v652_v30 = vmul.f32 0.5, %v449_v17  ;;  %v5153_v17 = vld [vmem:[#allocation48_spill] sm:$0xff] }
 0x514   :  { %v452_v61 = vadd.f32 %v5153_v17, %v4266_v13 }
 0x515   :  { %v653_v9 = vmul.f32 0.5, %v498_v58  ;;  %v5154_v58 = vld [vmem:[#allocation33_spill] sm:$0xff] }
 0x516   :  { %v501_v2 = vadd.f32 %v5154_v58, %v4264_v40 }
 0x571   :  { %v1505_v43 = vpop.f32.mrf.mxu0  ;;  %v1519_v24 = vpop.f32.mrf.mxu1 }
 0x572   :  { %v1552_v42 = vadd.f32 %v1505_v43, %v648_v23  ;;  %v1553_v49 = vadd.f32 %v1519_v24, %v649_v32 }
 0x574   :  { %3363 = vtanh.f32 %v1552_v42 }
 0x575   :  { %3365 = vtanh.f32 %v1553_v49 }
 0x578   :  { %v1533_v16 = vpop.f32.mrf.mxu2  ;;  %v1547_v51 = vpop.f32.mrf.mxu3 }
 0x579   :  { %v1554_v1 = vadd.f32 %v1533_v16, %v545_v55  ;;  %v1507_v27 = vpop.f32.mrf.mxu0  ;;  %v1521_v33 = vpop.f32.mrf.mxu1  ;;  %v1555_v63 = vadd.f32 %v1547_v51, %v651_v53  ;;  %v3178_v55 = vld [vmem:[%s5048_s6 + $0x30] sm:$0xff] }
 0x57a   :  { %v3364_v44 = vpop.eup %3363  ;;  %v1556_v18 = vadd.f32 %v1507_v27, %v652_v30  ;;  %v1557_v11 = vadd.f32 %v1521_v33, %v653_v9  ;;  %v656_v30 = vmul.f32 0.5, %v452_v61  ;;  %v657_v9 = vmul.f32 0.5, %v501_v2 }
 0x57b   :  { %v3366_v37 = vpop.eup %3365  ;;  %3367 = vtanh.f32 %v1554_v1  ;;  %v1568_v10 = vmul.f32 0.5, %v3364_v44  ;;  %v3177_v1 = vld [vmem:[%s5048_s6 + $0x28] sm:$0xff] }
 0x57c   :  { %v1569_v48 = vmul.f32 0.5, %v3366_v37  ;;  %3369 = vtanh.f32 %v1556_v18  ;;  %v5155_v44 = vld [vmem:[#allocation51_spill] sm:$0xff] }
 0x57d   :  { %3371 = vtanh.f32 %v1557_v11  ;;  %v1576_v45 = vadd.f32 0.5, %v1568_v10  ;;  %v454_v18 = vadd.f32 %v5155_v44, %v4266_v13  ;;  %v5156_v11 = vld [vmem:[#allocation34_spill] sm:$0xff] }
 0x57e   :  { %v1577_v41 = vadd.f32 0.5, %v1569_v48  ;;  %v503_v37 = vadd.f32 %v5156_v11, %v4264_v40 }
 0x57f   :  { %v660_v10 = vmul.f32 0.5, %v454_v18 }
 0x580   :  { %v1535_v50 = vpop.f32.mrf.mxu2  ;;  %v1549_v54 = vpop.f32.mrf.mxu3  ;;  %v1584_v47 = vmul.f32 %v1577_v41, %v4545_v34  ;;  %v661_v48 = vmul.f32 0.5, %v503_v37 }
 0x581   :  { %v3368_v19 = vpop.eup %3367  ;;  %v1558_v7 = vadd.f32 %v1535_v50, %v547_v12  ;;  %v1559_v36 = vadd.f32 %v1549_v54, %v655_v59 }
 0x582   :  { %v1586_v0 = vmul.f32 %v3368_v19, %v1576_v45  ;;  %v3370_v20 = vpop.eup %3369  ;;  %v3175_v45 = vld [vmem:[%s5048_s6 + $0x18] sm:$0xff] }
 0x583   :  { %3373 = vtanh.f32 %v1558_v7  ;;  %v3372_v22 = vpop.eup %3371  ;;  %v1572_v29 = vmul.f32 0.5, %v3370_v20  ;;  %v5158_v7 = vld [vmem:[#allocation23_spill] sm:$0xff] }
 0x584   :  { %v4607_v39 = vadd.f32 %v1586_v0, %v1584_v47  ;;  %3375 = vtanh.f32 %v1555_v63  ;;  %v1573_v21 = vmul.f32 0.5, %v3372_v22  ;;  %v599_v47 = vadd.f32 %v5158_v7, %v4280_v26  ;;  %v3174_v0 = vld [vmem:[%s5048_s6 + $0x10] sm:$0xff] }
 0x585   :  { %3377 = vtanh.f32 %v1559_v36  ;;  %v1580_v57 = vadd.f32 0.5, %v1572_v29  ;;  %v5159_v36 = vld [vmem:[#allocation24_spill] sm:$0xff] }
 0x586   :  { %v1581_v14 = vadd.f32 0.5, %v1573_v21  ;;  %3379 = vtanh.f32 %v4607_v39  ;;  %v601_v20 = vadd.f32 %v5159_v36, %v4280_v26 }
 0x588   :  { %v1585_v28 = vmul.f32 %v1581_v14, %v4549_v6  ;;  %v3179_v6 = vld [vmem:[%s5048_s6 + $0x38] sm:$0xff]  ;;  %v659_v14 = vmul.f32 0.5, %v599_v47 }
 0x589   :  { %v3374_v35 = vpop.eup %3373 }
 0x58a   :  { %v1587_v3 = vmul.f32 %v3374_v35, %v1580_v57  ;;  %v3376_v52 = vpop.eup %3375  ;;  %v5160_v57 = vld [vmem:[#allocation60_spill] sm:$0xff] }
 0x58b   :  { %v3378_v60 = vpop.eup %3377  ;;  %v1571_v4 = vmul.f32 0.5, %v3376_v52  ;;  %v552_v35 = vadd.f32 %v5160_v57, %v4278_v62  ;;  %v5167_v57 = vld [vmem:[#allocation54_spill] sm:$0xff] }
 0x58c   :  { %v4611_v34 = vadd.f32 %v1587_v3, %v1585_v28  ;;  %v1575_v15 = vmul.f32 0.5, %v3378_v60  ;;  %v3380_v23 = vpop.eup %3379  ;;  %v3173_v28 = vld [vmem:[%s5048_s6 + $0x8] sm:$0xff]  ;;  %v663_v3 = vmul.f32 0.5, %v601_v20 }
 0x58d   :  { %v1579_v32 = vadd.f32 0.5, %v1571_v4 }
 0x58e   :  { %3381 = vtanh.f32 %v4611_v34  ;;  %v1583_v43 = vadd.f32 0.5, %v1575_v15 }
 0x58f   :  { %v1592_v42 = vmul.f32 %v3380_v23, %v1579_v32 }
 0x594   :  { %v3382_v24 = vpop.eup %3381 }
 0x595   :  { %v1593_v49 = vmul.f32 %v3382_v24, %v1583_v43 }
 0x597   :  { %v4614_v31 = vpack.c.bf16 %v1593_v49, %v1592_v42 }
 0x599   :  { %1615 = vmatmul.bf16.vlgmr.msrb.gmra.mxu0 %v4614_v31  ;;  %1629 = vmatmul.bf16.vlgmr.msra.gmra.mxu1 %v4614_v31 }
 0x59a   :  { %1643 = vmatmul.bf16.vlgmr.msra.gmra.mxu2 %v4614_v31  ;;  %1657 = vmatmul.bf16.vlgmr.msrb.gmra.mxu3 %v4614_v31 }
 0x59b   :  { %1911 = vmatpush.bf16.msrb.mxu0 %v3179_v6  ;;  %v3172_v6 = vld [vmem:[%s5048_s6] sm:$0xff] }
 0x59f   :  { %1912 = vmatpush.bf16.msrb.mxu0 %v3178_v55 }
 0x5a3   :  { %1913 = vmatpush.bf16.msrb.mxu0 %v3177_v1 }
 0x5a7   :  { %1914 = vmatpush.bf16.msrb.mxu0 %v3176_v56 }
 0x5ab   :  { %1915 = vmatpush.bf16.msrb.mxu0 %v3175_v45 }
 0x5af   :  { %1916 = vmatpush.bf16.msrb.mxu0 %v3174_v0  ;;  %v3183_v0 = vld [vmem:[%s5050_s8 + $0x18] sm:$0xff] }
 0x5b0   :  { %2054 = vmatpush.bf16.msra.mxu1 %v3183_v0 }
 0x5b3   :  { %1917 = vmatpush.bf16.msrb.mxu0 %v3173_v28  ;;  %v5168_v28 = vld [vmem:[#allocation35_spill] sm:$0xff] }
 0x5b7   :  { %1918 = vmatpush.bf16.msrb.mxu0 %v3172_v6 }
 0x616   :  { %v1616_v16 = vpop.f32.mrf.mxu0  ;;  %v1630_v51 = vpop.f32.mrf.mxu1 }
 0x617   :  { %v1663_v27 = vadd.f32 %v1616_v16, %v656_v30  ;;  %v1664_v33 = vadd.f32 %v1630_v51, %v657_v9 }
 0x619   :  { %3383 = vtanh.f32 %v1663_v27 }
 0x61a   :  { %3385 = vtanh.f32 %v1664_v33 }
 0x61d   :  { %v1644_v41 = vpop.f32.mrf.mxu2  ;;  %v1658_v53 = vpop.f32.mrf.mxu3 }
 0x61e   :  { %v1665_v25 = vadd.f32 %v1644_v41, %v550_v8  ;;  %v1618_v12 = vpop.f32.mrf.mxu0  ;;  %v1632_v59 = vpop.f32.mrf.mxu1  ;;  %v1666_v23 = vadd.f32 %v1658_v53, %v659_v14  ;;  %v5163_v41 = vld [vmem:[#allocation37_spill] sm:$0xff]  ;;  %v296_v53 = vlaneseq  ;;  %v3181_v14 = vld [vmem:[%s5050_s8 + $0x8] sm:$0xff] }
 0x61f   :  { %v3384_v50 = vpop.eup %3383  ;;  %v1667_v54 = vadd.f32 %v1618_v12, %v660_v10  ;;  %v1668_v19 = vadd.f32 %v1632_v59, %v661_v48  ;;  %v5162_v48 = vld [vmem:[#allocation64_spill] sm:$0xff] }
 0x620   :  { %v3386_v63 = vpop.eup %3385  ;;  %3387 = vtanh.f32 %v1665_v25  ;;  %v1679_v22 = vmul.f32 0.5, %v3384_v50  ;;  %v297_v25 = vand.u32 127, %v296_v53  ;;  %v3234_v12 = vld [vmem:[#allocation14 + $0x8] sm:$0xff]  }
 0x621   :  { %v1680_v29 = vmul.f32 0.5, %v3386_v63  ;;  %3389 = vtanh.f32 %v1667_v54  ;;  %v3192_v45 = vunpack.c.l.bf16 %v3234_v12  ;;  %v3193_v50 = vunpack.c.h.bf16 %v3234_v12 }
 0x622   :  { %3391 = vtanh.f32 %v1668_v19  ;;  %v1687_v52 = vadd.f32 0.5, %v1679_v22  ;;  %vm1976_vm2 = vcmp.ge.s32.totalorder %v297_v25, 64  ;;  %vm1977_vm3 = vcmp.lt.s32.totalorder %v297_v25, 96  ;;  %v3187_v19 = vld [vmem:[#allocation14] sm:$0xff]  }
 0x623   :  { %v1688_v21 = vadd.f32 0.5, %v1680_v29  ;;  %vm4674_vm4 = vmand %vm1976_vm2, %vm1977_vm3  ;;  %v3677_v54 = vmov 0.5   ;;  %v3188_v7 = vunpack.c.l.bf16 %v3187_v19  ;;  %v3189_v47 = vunpack.c.h.bf16 %v3187_v19  ;;  %v3182_v29 = vld [vmem:[%s5050_s8 + $0x10] sm:$0xff] }
 0x624   :  { %2055 = vmatpush.bf16.msra.mxu1 %v3182_v29 }
 0x625   :  { %v1646_v60 = vpop.f32.mrf.mxu2  ;;  %v1660_v4 = vpop.f32.mrf.mxu3  ;;  %v1695_v43 = vmul.f32 %v1688_v21, %v4607_v39  ;;  %v5166_v21 = vmov 0  }
 0x626   :  { %v3388_v15 = vpop.eup %3387  ;;  %v1669_v32 = vadd.f32 %v1646_v60, %v552_v35  ;;  %v1670_v42 = vadd.f32 %v1660_v4, %v663_v3  ;;  %v457_v35 = vadd.f32 %v5167_v57, %v4266_v13  ;;  %v506_v3 = vadd.f32 %v5168_v28, %v4264_v40 }
 0x627   :  { %v1697_v24 = vmul.f32 %v3388_v15, %v1687_v52  ;;  %v3390_v49 = vpop.eup %3389  ;;  %v3180_v52 = vld [vmem:[%s5050_s8] sm:$0xff] }
 0x628   :  { %3393 = vtanh.f32 %v1669_v32  ;;  %v3392_v17 = vpop.eup %3391  ;;  %v1683_v58 = vmul.f32 0.5, %v3390_v49  ;;  %2056 = vmatpush.bf16.msra.mxu1 %v3181_v14  ;;  %v664_v60 = vmul.f32 0.5, %v457_v35  ;;  %v665_v4 = vmul.f32 0.5, %v506_v3  ;;  %v5170_v49 = vld [vmem:[#allocation57_spill] sm:$0xff] }
 0x629   :  { %v4661_v61 = vadd.f32 %v1697_v24, %v1695_v43  ;;  %3395 = vtanh.f32 %v1666_v23  ;;  %v1684_v2 = vmul.f32 0.5, %v3392_v17  ;;  %v5169_v24 = vld [vmem:[#allocation25_spill] sm:$0xff]  ;;  %v459_v6 = vadd.f32 %v5170_v49, %v4266_v13  ;;  %v5171_v17 = vld [vmem:[#allocation36_spill] sm:$0xff] }
 0x62a   :  { %3397 = vtanh.f32 %v1670_v42  ;;  %v1691_v30 = vadd.f32 0.5, %v1683_v58  ;;  %v604_v42 = vadd.f32 %v5169_v24, %v4280_v26  ;;  %v508_v58 = vadd.f32 %v5171_v17, %v4264_v40  ;;  %v5173_v40 = vld [vmem:[#allocation26_spill] sm:$0xff] }
 0x62b   :  { %v1692_v55 = vadd.f32 0.5, %v1684_v2  ;;  %3399 = vtanh.f32 %v4661_v61 }
 0x62c   :  { %2057 = vmatpush.bf16.msra.mxu1 %v3180_v52  ;;  %v667_v2 = vmul.f32 0.5, %v604_v42 }
 0x62d   :  { %v1696_v9 = vmul.f32 %v1692_v55, %v4611_v34  ;;  %v5161_v34 = vld [vmem:[#allocation63_spill] sm:$0xff]  ;;  %v5172_v55 = vld [vmem:[#allocation61_spill] sm:$0xff] }
 0x62e   :  { %v3394_v39 = vpop.eup %3393 }
 0x62f   :  { %v1698_v16 = vmul.f32 %v3394_v39, %v1691_v30  ;;  %v3396_v51 = vpop.eup %3395  ;;  %v555_v30 = vadd.f32 %v5172_v55, %v4278_v62  ;;  %v668_v39 = vmul.f32 0.5, %v459_v6 }
 0x630   :  { %v3398_v1 = vpop.eup %3397  ;;  %v1682_v33 = vmul.f32 0.5, %v3396_v51 }
 0x631   :  { %v4665_v27 = vadd.f32 %v1698_v16, %v1696_v9  ;;  %v1686_v44 = vmul.f32 0.5, %v3398_v1  ;;  %v3400_v18 = vpop.eup %3399  ;;  %v669_v9 = vmul.f32 0.5, %v508_v58 }
 0x632   :  { %v1690_v11 = vadd.f32 0.5, %v1682_v33 }
 0x633   :  { %3401 = vtanh.f32 %v4665_v27  ;;  %v1694_v37 = vadd.f32 0.5, %v1686_v44 }
 0x634   :  { %v1703_v46 = vmul.f32 %v3400_v18, %v1690_v11 }
 0x639   :  { %v3402_v56 = vpop.eup %3401 }
 0x63a   :  { %v1704_v8 = vmul.f32 %v3402_v56, %v1694_v37 }
 0x63c   :  { %v1717_v10 = vpack.c.bf16 %v1704_v8, %v1703_v46  ;;  %v606_v46 = vadd.f32 %v5173_v40, %v4280_v26 }
 0x63e   :  { %1726 = vmatmul.bf16.vlgmr.msra.gmra.mxu0 %v1717_v10  ;;  %1740 = vmatmul.bf16.vlgmr.msrb.gmra.mxu1 %v1717_v10 }
 0x63f   :  { %1754 = vmatmul.bf16.vlgmr.msrb.gmra.mxu2 %v1717_v10  ;;  %1768 = vmatmul.bf16.vlgmr.msra.gmra.mxu3 %v1717_v10 }
 0x64e   :  { %1919 = vmatmul.bf16.vlgmr.msrb.gmra.mxu0 %v5161_v34 }
 0x65e   :  { %1924 = vmatmul.bf16.gmra.mxu0 %v5162_v48  ;;  %v671_v48 = vmul.f32 0.5, %v606_v46 }
 0x66e   :  { %1929 = vmatmul.bf16.gmra.mxu0 %v5163_v41  ;;  %v5174_v41 = vld [vmem:[#allocation62_spill] sm:$0xff] }
 0x66f   :  { %v557_v53 = vadd.f32 %v5174_v41, %v4278_v62  ;;  %v4734_v62 = vld [vmem:[%s5049_s7] ss:$0 sm:$0xff] }
 0x67e   :  { %1934 = vmatmul.bf16.gmra.mxu0 %v4490_v5  ;;  %v4681_v5 = vsel %vm4674_vm4, 1.0, %v3677_v54 }
 0x67f   :  { %v2141_v36 = vmul.f32 %v3188_v7, %v4681_v5  ;;  %v2142_v20 = vmul.f32 %v3189_v47, %v4681_v5 }
 0x681   :  { %v4694_v22 = vpack.c.bf16 %v2142_v20, %v2141_v36 }
 0x68e   :  { %1939 = vmatmul.bf16.gmra.mxu0 %v4552_v38  ;;  %v2143_v38 = vmul.f32 %v3192_v45, %v4681_v5 }
 0x69e   :  { %1944 = vmatmul.bf16.gmra.mxu0 %v4614_v31  ;;  %v2144_v31 = vmul.f32 %v3193_v50, %v4681_v5 }
 0x6a0   :  { %v4685_v63 = vpack.c.bf16 %v2144_v31, %v2143_v38 }
 0x6a2   :  { %2158 = vmatpush.bf16.msrb.mxu3 %v4685_v63  ;;  %2311 = vmatpush.bf16.msra.mxu2 %v4685_v63 }
 0x6a6   :  { %2159 = vmatpush.bf16.msrb.mxu3 %v4694_v22  ;;  %2312 = vmatpush.bf16.msra.mxu2 %v4694_v22 }
 0x6a9   :  { %2160 = vmatmul.bf16.vlgmr.msrb.gmra.mxu3 %v5166_v21 }
 0x6aa   :  { %2234 = vmatpush.bf16.msra.mxu3 %v4685_v63  ;;  %2465 = vmatpush.bf16.msrb.mxu2 %v4685_v63 }
 0x6ae   :  { %1949 = vmatmul.bf16.gmra.mxu0 %v1717_v10  ;;  %2235 = vmatpush.bf16.msra.mxu3 %v4694_v22 }
 0x6af   :  { %2466 = vmatpush.bf16.msrb.mxu2 %v4694_v22 }
 0x6b2   :  { %2388 = vmatpush.bf16.msrb.mxu3 %v4685_v63 }
 0x6b6   :  { %2389 = vmatpush.bf16.msrb.mxu3 %v4694_v22 }
 0x6bb   :  { %v1727_v15 = vpop.f32.mrf.mxu0  ;;  %v1741_v23 = vpop.f32.mrf.mxu1 }
 0x6bc   :  { %v1774_v32 = vadd.f32 %v1727_v15, %v664_v60  ;;  %v1775_v43 = vadd.f32 %v1741_v23, %v665_v4 }
 0x6be   :  { %3403 = vtanh.f32 %v1774_v32 }
 0x6bf   :  { %3405 = vtanh.f32 %v1775_v43 }
 0x6c2   :  { %v1755_v16 = vpop.f32.mrf.mxu2  ;;  %v1769_v51 = vpop.f32.mrf.mxu3 }
 0x6c3   :  { %v1776_v1 = vadd.f32 %v1755_v16, %v555_v30  ;;  %v1777_v33 = vadd.f32 %v1769_v51, %v667_v2  ;;  %v1729_v44 = vpop.f32.mrf.mxu0  ;;  %v1743_v18 = vpop.f32.mrf.mxu1 }
 0x6c4   :  { %v3404_v11 = vpop.eup %3403  ;;  %v1778_v37 = vadd.f32 %v1729_v44, %v668_v39  ;;  %v1779_v13 = vadd.f32 %v1743_v18, %v669_v9 }
 0x6c5   :  { %v3406_v56 = vpop.eup %3405  ;;  %3407 = vtanh.f32 %v1776_v1  ;;  %v1790_v8 = vmul.f32 0.5, %v3404_v11 }
 0x6c6   :  { %v1791_v10 = vmul.f32 0.5, %v3406_v56  ;;  %3409 = vtanh.f32 %v1777_v33 }
 0x6c7   :  { %3411 = vtanh.f32 %v1778_v37  ;;  %v1798_v25 = vadd.f32 0.5, %v1790_v8 }
 0x6c8   :  { %v1799_v34 = vadd.f32 0.5, %v1791_v10  ;;  %3413 = vtanh.f32 %v1779_v13 }
 0x6ca   :  { %v1757_v12 = vpop.f32.mrf.mxu2  ;;  %v1771_v45 = vpop.f32.mrf.mxu3  ;;  %v1806_v26 = vmul.f32 %v1799_v34, %v4661_v61 }
 0x6cb   :  { %v3408_v50 = vpop.eup %3407  ;;  %v1780_v38 = vadd.f32 %v1757_v12, %v557_v53  ;;  %v1781_v31 = vadd.f32 %v1771_v45, %v671_v48  ;;  %v1920_v19 = vpop.f32.mrf.mxu0 }
 0x6cc   :  { %v3410_v7 = vpop.eup %3409  ;;  %v1808_v47 = vmul.f32 %v3408_v50, %v1798_v25  ;;  %v1921_v28 = vadd.f32 %v4734_v62, %v1920_v19 }
 0x6cd   :  { %v3412_v0 = vpop.eup %3411  ;;  %3415 = vtanh.f32 %v1780_v38  ;;  %v1793_v14 = vmul.f32 0.5, %v3410_v7 }
 0x6ce   :  { %v3414_v36 = vpop.eup %3413  ;;  %v1810_v20 = vadd.f32 %v1808_v47, %v1806_v26  ;;  %v1794_v29 = vmul.f32 0.5, %v3412_v0  ;;  %3417 = vtanh.f32 %v1781_v31  ;;  %v1960_v24 = vmax.f32 %v1921_v28, 0.0 }
 0x6cf   :  { %v1795_v21 = vmul.f32 0.5, %v3414_v36  ;;  %v1801_v23 = vadd.f32 0.5, %v1793_v14 }
 0x6d0   :  { %3419 = vtanh.f32 %v1810_v20  ;;  %v1802_v35 = vadd.f32 0.5, %v1794_v29 }
 0x6d1   :  { %v1803_v57 = vadd.f32 0.5, %v1795_v21 }
 0x6d3   :  { %v3416_v61 = vpop.eup %3415  ;;  %v1922_v3 = vpop.f32.mrf.mxu0  ;;  %v1807_v52 = vmul.f32 %v1803_v57, %v4665_v27 }
 0x6d4   :  { %v1809_v60 = vmul.f32 %v3416_v61, %v1802_v35  ;;  %v1923_v4 = vadd.f32 %v4734_v62, %v1922_v3  ;;  %v3418_v15 = vpop.eup %3417 }
 0x6d5   :  { %v1797_v17 = vmul.f32 0.5, %v3418_v15 }
 0x6d6   :  { %v3420_v32 = vpop.eup %3419  ;;  %v1811_v43 = vadd.f32 %v1809_v60, %v1807_v52  ;;  %v1961_v42 = vmax.f32 %v1923_v4, 0.0  ;;  %v4761_v52 = vld [vmem:[%s5052_s10] ss:$0 sm:$0xff]  ;;  %s3678_s10 = smov 32  }
 0x6d7   :  { %v1814_v49 = vmul.f32 %v3420_v32, %v1801_v23  ;;  %v1805_v2 = vadd.f32 0.5, %v1797_v17 }
 0x6d8   :  { %3421 = vtanh.f32 %v1811_v43  ;;  %v1981_v6 = vpack.c.bf16 %v1961_v42, %v1960_v24 }
 0x6da   :  { %3116 = vmatmul.msk.bf16.vlgmr.msra.gmra.mxu1 %vm2025_vm5, %v1981_v6 }
 0x6db   :  { %v1925_v58 = vpop.f32.mrf.mxu0 }
 0x6dc   :  { %v1926_v39 = vadd.f32 %v4734_v62, %v1925_v58 }
 0x6de   :  { %v3422_v55 = vpop.eup %3421  ;;  %v1962_v51 = vmax.f32 %v1926_v39, 0.0 }
 0x6df   :  { %v1815_v27 = vmul.f32 %v3422_v55, %v1805_v2  ;;  %v4770_v2 = vsel %vm4674_vm4, 0.0, %v3677_v54 }
 0x6e1   :  { %v1842_v30 = vpack.c.bf16 %v1815_v27, %v1814_v49 }
 0x6e3   :  { %1954 = vmatmul.bf16.gmra.mxu0 %v1842_v30  ;;  %v1927_v9 = vpop.f32.mrf.mxu0 }
 0x6e4   :  { %v1928_v16 = vadd.f32 %v4734_v62, %v1927_v9 }
 0x6e6   :  { %v1963_v1 = vmax.f32 %v1928_v16, 0.0 }
 0x6e8   :  { %v1982_v33 = vpack.c.bf16 %v1963_v1, %v1962_v51 }
 0x6ea   :  { %3117 = vmatmul.msk.bf16.gmra.mxu1 %vm2025_vm5, %v1982_v33 }
 0x6eb   :  { %v1930_v44 = vpop.f32.mrf.mxu0 }
 0x6ec   :  { %v1931_v18 = vadd.f32 %v4734_v62, %v1930_v44 }
 0x6ee   :  { %v1964_v13 = vmax.f32 %v1931_v18, 0.0 }
 0x6f3   :  { %v1932_v11 = vpop.f32.mrf.mxu0 }
 0x6f4   :  { %v1933_v37 = vadd.f32 %v4734_v62, %v1932_v11 }
 0x6f6   :  { %v1965_v56 = vmax.f32 %v1933_v37, 0.0 }
 0x6f8   :  { %v1983_v40 = vpack.c.bf16 %v1965_v56, %v1964_v13 }
 0x6fa   :  { %3118 = vmatmul.msk.bf16.gmra.mxu1 %vm2025_vm5, %v1983_v40 }
 0x6fb   :  { %v1935_v46 = vpop.f32.mrf.mxu0 }
 0x6fc   :  { %v1936_v8 = vadd.f32 %v4734_v62, %v1935_v46 }
 0x6fe   :  { %v1966_v48 = vmax.f32 %v1936_v8, 0.0 }
 0x703   :  { %v1937_v10 = vpop.f32.mrf.mxu0 }
 0x704   :  { %v1938_v34 = vadd.f32 %v4734_v62, %v1937_v10 }
 0x706   :  { %v1967_v41 = vmax.f32 %v1938_v34, 0.0 }
 0x708   :  { %v1984_v53 = vpack.c.bf16 %v1967_v41, %v1966_v48 }
 0x70a   :  { %3119 = vmatmul.msk.bf16.gmra.mxu1 %vm2025_vm5, %v1984_v53 }
 0x70b   :  { %v1940_v25 = vpop.f32.mrf.mxu0 }
 0x70c   :  { %v1941_v12 = vadd.f32 %v4734_v62, %v1940_v25 }
 0x70e   :  { %v1968_v38 = vmax.f32 %v1941_v12, 0.0 }
 0x713   :  { %v1942_v45 = vpop.f32.mrf.mxu0 }
 0x714   :  { %v1943_v50 = vadd.f32 %v4734_v62, %v1942_v45 }
 0x716   :  { %v1969_v31 = vmax.f32 %v1943_v50, 0.0 }
 0x718   :  { %v1985_v19 = vpack.c.bf16 %v1969_v31, %v1968_v38 }
 0x71a   :  { %3120 = vmatmul.msk.bf16.gmra.mxu1 %vm2025_vm5, %v1985_v19 }
 0x71b   :  { %v1945_v7 = vpop.f32.mrf.mxu0 }
 0x71c   :  { %v1946_v26 = vadd.f32 %v4734_v62, %v1945_v7 }
 0x71e   :  { %v1970_v36 = vmax.f32 %v1946_v26, 0.0 }
 0x723   :  { %v1947_v47 = vpop.f32.mrf.mxu0 }
 0x724   :  { %v1948_v0 = vadd.f32 %v4734_v62, %v1947_v47 }
 0x726   :  { %v1971_v20 = vmax.f32 %v1948_v0, 0.0 }
 0x728   :  { %v1986_v29 = vpack.c.bf16 %v1971_v20, %v1970_v36 }
 0x72a   :  { %3121 = vmatmul.msk.bf16.gmra.mxu1 %vm2025_vm5, %v1986_v29 }
 0x72b   :  { %v1950_v21 = vpop.f32.mrf.mxu0 }
 0x72c   :  { %v1951_v14 = vadd.f32 %v4734_v62, %v1950_v21  ;;  %v2161_v15 = vpop.f32.mrf.mxu3 }
 0x72e   :  { %v1972_v28 = vmax.f32 %v1951_v14, 0.0 }
 0x733   :  { %v1952_v57 = vpop.f32.mrf.mxu0 }
 0x734   :  { %v1953_v35 = vadd.f32 %v4734_v62, %v1952_v57  ;;  %v2163_v6 = vpop.f32.mrf.mxu3 }
 0x736   :  { %v1973_v61 = vmax.f32 %v1953_v35, 0.0 }
 0x738   :  { %v1987_v3 = vpack.c.bf16 %v1973_v61, %v1972_v28 }
 0x73a   :  { %3122 = vmatmul.msk.bf16.gmra.mxu1 %vm2025_vm5, %v1987_v3 }
 0x757   :  { %v2059_v60 = vpop.f32.mrf.mxu1 }
 0x758   :  { %v2060_v4 = vadd.f32 %v4761_v52, %v2059_v60 }
 0x75a   :  { %v2099_v23 = vmul.f32 %v2060_v4, %v4681_v5 }
 0x75c   :  { %v2166_v32 = vadd.f32 %v2161_v15, %v2099_v23 }
 0x75e   :  { %3423 = vtanh.f32 %v2166_v32 }
 0x75f   :  { %v2061_v43 = vpop.f32.mrf.mxu1 }
 0x760   :  { %v1955_v24 = vpop.f32.mrf.mxu0  ;;  %v2062_v42 = vadd.f32 %v4761_v52, %v2061_v43 }
 0x761   :  { %v1956_v27 = vadd.f32 %v4734_v62, %v1955_v24 }
 0x762   :  { %v2100_v49 = vmul.f32 %v2062_v42, %v4681_v5 }
 0x763   :  { %v1974_v16 = vmax.f32 %v1956_v27, 0.0 }
 0x764   :  { %v3424_v17 = vpop.eup %3423  ;;  %v2167_v58 = vadd.f32 %v2163_v6, %v2100_v49 }
 0x765   :  { %v2170_v55 = vmul.f32 %v3424_v17, %v4681_v5 }
 0x766   :  { %3425 = vtanh.f32 %v2167_v58 }
 0x767   :  { %v2172_v30 = vadd.f32 %v2170_v55, %v4770_v2  ;;  %v2064_v50 = vpop.f32.mrf.mxu1 }
 0x768   :  { %v1957_v39 = vpop.f32.mrf.mxu0  ;;  %v2065_v38 = vadd.f32 %v4761_v52, %v2064_v50 }
 0x769   :  { %v1958_v9 = vadd.f32 %v4734_v62, %v1957_v39  ;;  %2178 = vrot.lane.b32.xlu0 %v2172_v30, %s3670_s26  ;;  %v2174_v37 = vmul.f32 0.0, %v2172_v30 }
 0x76a   :  { %v2101_v31 = vmul.f32 %v2065_v38, %v4681_v5 }
 0x76b   :  { %v1975_v51 = vmax.f32 %v1958_v9, 0.0 }
 0x76c   :  { %v3426_v1 = vpop.eup %3425 }
 0x76d   :  { %v1988_v33 = vpack.c.bf16 %v1975_v51, %v1974_v16  ;;  %v2171_v59 = vmul.f32 %v3426_v1, %v4681_v5 }
 0x76f   :  { %3123 = vmatmul.msk.bf16.gmra.mxu1 %vm2025_vm5, %v1988_v33  ;;  %v2173_v54 = vadd.f32 %v2171_v59, %v4770_v2  ;;  %v2066_v19 = vpop.f32.mrf.mxu1 }
 0x770   :  { %v2067_v47 = vadd.f32 %v4761_v52, %v2066_v19 }
 0x771   :  { %2180 = vrot.lane.b32.xlu0 %v2173_v54, %s3670_s26  ;;  %v2175_v40 = vmul.f32 0.0, %v2173_v54 }
 0x772   :  { %v2102_v0 = vmul.f32 %v2067_v47, %v4681_v5 }
 0x777   :  { %v2069_v9 = vpop.f32.mrf.mxu1 }
 0x778   :  { %v2070_v16 = vadd.f32 %v4761_v52, %v2069_v9 }
 0x77a   :  { %v2103_v51 = vmul.f32 %v2070_v16, %v4681_v5 }
 0x77f   :  { %v2071_v1 = vpop.f32.mrf.mxu1 }
 0x7db   :  { %v2179_v44 = vpop.permute.xlu0 %2178 }
 0x7dc   :  { %v2184_v18 = vmul.f32 %v2179_v44, %v2172_v30 }
 0x7de   :  { %2188 = vrot.lane.b32.xlu1 %v2184_v18, %s3678_s10 }
 0x7e3   :  { %v2181_v62 = vpop.permute.xlu0 %2180 }
 0x7e4   :  { %v2185_v11 = vmul.f32 %v2181_v62, %v2173_v54 }
 0x7e6   :  { %2190 = vrot.lane.b32.xlu1 %v2185_v11, %s3678_s10 }
 0x850   :  { %v2189_v13 = vpop.permute.xlu1 %2188 }
 0x851   :  { %v2194_v56 = vadd.f32 %v2189_v13, %v2174_v37 }
 0x853   :  { %3427 = vtanh.f32 %v2194_v56 }
 0x858   :  { %v2191_v46 = vpop.permute.xlu1 %2190 }
 0x859   :  { %v3428_v8 = vpop.eup %3427  ;;  %v2195_v10 = vadd.f32 %v2191_v46, %v2175_v40 }
 0x85a   :  { %2200 = vrot.lane.b32.xlu2 %v3428_v8, %s3670_s26 }
 0x85b   :  { %3429 = vtanh.f32 %v2195_v10 }
 0x861   :  { %v3430_v34 = vpop.eup %3429 }
 0x862   :  { %2202 = vrot.lane.b32.xlu2 %v3430_v34, %s3670_s26 }
 0x8b4   :  { %v2201_v48 = vpop.permute.xlu2 %2200 }
 0x8b5   :  { %v4785_v53 = vmul.f32 %v2201_v48, %v2172_v30 }
 0x8bc   :  { %v2203_v41 = vpop.permute.xlu2 %2202 }
 0x8bd   :  { %v4787_v25 = vmul.f32 %v2203_v41, %v2173_v54  ;;  %v2072_v54 = vadd.f32 %v4761_v52, %v2071_v1 }
 0x8bf   :  { %v2221_v12 = vpack.c.bf16 %v4787_v25, %v4785_v53  ;;  %v2104_v44 = vmul.f32 %v2072_v54, %v4681_v5 }
 0x8c1   :  { %2223 = vrot.lane.b32.xlu0 %v2221_v12, %s3678_s10 }
 0x933   :  { %v2224_v45 = vpop.permute.xlu0 %2223 }
 0x934   :  { %3124 = vmatmul.msk.bf16.vlgmr.msra.gmra.mxu3 %vm387_vm1, %v2224_v45 }
 0x935   :  { %2542 = vmatpush.bf16.msra.mxu3 %v4685_v63 }
 0x939   :  { %2543 = vmatpush.bf16.msra.mxu3 %v4694_v22 }
 0x9b7   :  { %v2237_v7 = vpop.f32.mrf.mxu3 }
 0x9b8   :  { %v2242_v26 = vadd.f32 %v2237_v7, %v2101_v31 }
 0x9ba   :  { %3431 = vtanh.f32 %v2242_v26 }
 0x9bf   :  { %v2239_v36 = vpop.f32.mrf.mxu3 }
 0x9c0   :  { %v3432_v20 = vpop.eup %3431  ;;  %v2243_v29 = vadd.f32 %v2239_v36, %v2102_v0 }
 0x9c1   :  { %v2246_v21 = vmul.f32 %v3432_v20, %v4681_v5 }
 0x9c2   :  { %3433 = vtanh.f32 %v2243_v29 }
 0x9c3   :  { %v2248_v14 = vadd.f32 %v2246_v21, %v4770_v2  ;;  %v2074_v21 = vpop.f32.mrf.mxu1 }
 0x9c5   :  { %2254 = vrot.lane.b32.xlu1 %v2248_v14, %s3670_s26  ;;  %v2250_v24 = vmul.f32 %v2248_v14, %v2194_v56 }
 0x9c8   :  { %v3434_v57 = vpop.eup %3433 }
 0x9c9   :  { %v2247_v35 = vmul.f32 %v3434_v57, %v4681_v5 }
 0x9cb   :  { %v2249_v28 = vadd.f32 %v2247_v35, %v4770_v2  ;;  %v2076_v35 = vpop.f32.mrf.mxu1 }
 0x9cd   :  { %2256 = vrot.lane.b32.xlu2 %v2249_v28, %s3670_s26  ;;  %v2251_v15 = vmul.f32 %v2249_v28, %v2195_v10 }
 0xa27   :  { %v2257_v61 = vpop.permute.xlu2 %2256 }
 0xa28   :  { %v2261_v3 = vmul.f32 %v2257_v61, %v2249_v28 }
 0xa2a   :  { %2266 = vrot.lane.b32.xlu1 %v2261_v3, %s3678_s10  ;;  %v2077_v3 = vadd.f32 %v4761_v52, %v2076_v35 }
 0xa37   :  { %v2255_v60 = vpop.permute.xlu1 %2254 }
 0xa38   :  { %v2260_v4 = vmul.f32 %v2255_v60, %v2248_v14  ;;  %v2106_v60 = vmul.f32 %v2077_v3, %v4681_v5 }
 0xa3a   :  { %2264 = vrot.lane.b32.xlu0 %v2260_v4, %s3678_s10 }
 0xa9c   :  { %v2267_v23 = vpop.permute.xlu1 %2266 }
 0xa9d   :  { %v2271_v32 = vadd.f32 %v2267_v23, %v2251_v15 }
 0xa9f   :  { %3435 = vtanh.f32 %v2271_v32 }
 0xaa5   :  { %v3436_v43 = vpop.eup %3435 }
 0xaa6   :  { %2278 = vrot.lane.b32.xlu0 %v3436_v43, %s3670_s26 }
 0xaac   :  { %v2265_v42 = vpop.permute.xlu0 %2264 }
 0xaad   :  { %v2270_v49 = vadd.f32 %v2265_v42, %v2250_v24 }
 0xaaf   :  { %3437 = vtanh.f32 %v2270_v49 }
 0xab5   :  { %v3438_v6 = vpop.eup %3437 }
 0xab6   :  { %2276 = vrot.lane.b32.xlu2 %v3438_v6, %s3670_s26 }
 0xb10   :  { %v2277_v17 = vpop.permute.xlu2 %2276 }
 0xb11   :  { %v4809_v55 = vmul.f32 %v2277_v17, %v2248_v14  ;;  %v2075_v14 = vadd.f32 %v4761_v52, %v2074_v21 }
 0xb13   :  { %v2105_v57 = vmul.f32 %v2075_v14, %v4681_v5 }
 0xb18   :  { %v2279_v58 = vpop.permute.xlu0 %2278 }
 0xb19   :  { %v4811_v27 = vmul.f32 %v2279_v58, %v2249_v28 }
 0xb1b   :  { %v2298_v30 = vpack.c.bf16 %v4811_v27, %v4809_v55 }
 0xb1d   :  { %2300 = vrot.lane.b32.xlu1 %v2298_v30, %s3678_s10 }
 0xb8f   :  { %v2301_v39 = vpop.permute.xlu1 %2300 }
 0xb90   :  { %3125 = vmatmul.msk.bf16.vlgmr.msra.gmra.mxu2 %vm387_vm1, %v2301_v39 }
 0xb91   :  { %2619 = vmatpush.bf16.msra.mxu2 %v4685_v63 }
 0xb95   :  { %2620 = vmatpush.bf16.msra.mxu2 %v4694_v22 }
 0xc13   :  { %v2314_v33 = vpop.f32.mrf.mxu2 }
 0xc14   :  { %v2319_v59 = vadd.f32 %v2314_v33, %v2103_v51 }
 0xc16   :  { %3439 = vtanh.f32 %v2319_v59 }
 0xc1b   :  { %v2316_v18 = vpop.f32.mrf.mxu2 }
 0xc1c   :  { %v3440_v62 = vpop.eup %3439  ;;  %v2320_v11 = vadd.f32 %v2316_v18, %v2104_v44 }
 0xc1d   :  { %v2323_v37 = vmul.f32 %v3440_v62, %v4681_v5 }
 0xc1e   :  { %3441 = vtanh.f32 %v2320_v11 }
 0xc1f   :  { %v2325_v13 = vadd.f32 %v2323_v37, %v4770_v2  ;;  %v2079_v37 = vpop.f32.mrf.mxu1 }
 0xc21   :  { %2331 = vrot.lane.b32.xlu2 %v2325_v13, %s3670_s26  ;;  %v2327_v41 = vmul.f32 %v2325_v13, %v2270_v49 }
 0xc24   :  { %v3442_v56 = vpop.eup %3441 }
 0xc25   :  { %v2324_v40 = vmul.f32 %v3442_v56, %v4681_v5 }
 0xc27   :  { %v2326_v46 = vadd.f32 %v2324_v40, %v4770_v2  ;;  %v2081_v40 = vpop.f32.mrf.mxu1 }
 0xc29   :  { %2333 = vrot.lane.b32.xlu0 %v2326_v46, %s3670_s26  ;;  %v2328_v50 = vmul.f32 %v2326_v46, %v2271_v32 }
 0xc7b   :  { %v2332_v8 = vpop.permute.xlu2 %2331 }
 0xc7c   :  { %v2337_v10 = vmul.f32 %v2332_v8, %v2325_v13 }
 0xc7e   :  { %2341 = vrot.lane.b32.xlu1 %v2337_v10, %s3678_s10  ;;  %v2082_v10 = vadd.f32 %v4761_v52, %v2081_v40 }
 0xc9b   :  { %v2334_v34 = vpop.permute.xlu0 %2333 }
 0xc9c   :  { %v2338_v48 = vmul.f32 %v2334_v34, %v2326_v46  ;;  %v2108_v34 = vmul.f32 %v2082_v10, %v4681_v5 }
 0xc9e   :  { %2343 = vrot.lane.b32.xlu2 %v2338_v48, %s3678_s10 }
 0xcf0   :  { %v2342_v12 = vpop.permute.xlu1 %2341 }
 0xcf1   :  { %v2347_v45 = vadd.f32 %v2342_v12, %v2327_v41 }
 0xcf3   :  { %3443 = vtanh.f32 %v2347_v45 }
 0xcf8   :  { %v2344_v38 = vpop.permute.xlu2 %2343 }
 0xcf9   :  { %v3444_v31 = vpop.eup %3443  ;;  %v2348_v19 = vadd.f32 %v2344_v38, %v2328_v50 }
 0xcfa   :  { %2353 = vrot.lane.b32.xlu0 %v3444_v31, %s3670_s26 }
 0xcfb   :  { %3445 = vtanh.f32 %v2348_v19 }
 0xd01   :  { %v3446_v7 = vpop.eup %3445 }
 0xd02   :  { %2355 = vrot.lane.b32.xlu1 %v3446_v7, %s3670_s26 }
 0xd6c   :  { %v2354_v26 = vpop.permute.xlu0 %2353 }
 0xd6d   :  { %v4833_v0 = vmul.f32 %v2354_v26, %v2325_v13  ;;  %v2080_v13 = vadd.f32 %v4761_v52, %v2079_v37 }
 0xd6f   :  { %v2107_v56 = vmul.f32 %v2080_v13, %v4681_v5 }
 0xd74   :  { %v2356_v47 = vpop.permute.xlu1 %2355 }
 0xd75   :  { %v4835_v36 = vmul.f32 %v2356_v47, %v2326_v46 }
 0xd77   :  { %v2375_v20 = vpack.c.bf16 %v4835_v36, %v4833_v0 }
 0xd79   :  { %2377 = vrot.lane.b32.xlu2 %v2375_v20, %s3678_s10 }
 0xdd3   :  { %v2378_v29 = vpop.permute.xlu2 %2377 }
 0xdd4   :  { %3126 = vmatmul.msk.bf16.vlgmr.msrb.gmra.mxu3 %vm387_vm1, %v2378_v29 }
 0xdd5   :  { %2696 = vmatpush.bf16.msrb.mxu3 %v4685_v63 }
 0xdd9   :  { %2697 = vmatpush.bf16.msrb.mxu3 %v4694_v22 }
 0xe57   :  { %v2391_v28 = vpop.f32.mrf.mxu3 }
 0xe58   :  { %v2396_v61 = vadd.f32 %v2391_v28, %v2105_v57 }
 0xe5a   :  { %3447 = vtanh.f32 %v2396_v61 }
 0xe5f   :  { %v2393_v4 = vpop.f32.mrf.mxu3 }
 0xe60   :  { %v3448_v15 = vpop.eup %3447  ;;  %v2397_v23 = vadd.f32 %v2393_v4, %v2106_v60 }
 0xe61   :  { %v2400_v63 = vmul.f32 %v3448_v15, %v4681_v5 }
 0xe62   :  { %3449 = vtanh.f32 %v2397_v23 }
 0xe63   :  { %v2402_v22 = vadd.f32 %v2400_v63, %v4770_v2 }
 0xe65   :  { %2408 = vrot.lane.b32.xlu0 %v2402_v22, %s3670_s26  ;;  %v2404_v58 = vmul.f32 %v2402_v22, %v2347_v45 }
 0xe68   :  { %v3450_v32 = vpop.eup %3449 }
 0xe69   :  { %v2401_v43 = vmul.f32 %v3450_v32, %v4681_v5  ;;  %v2084_v32 = vpop.f32.mrf.mxu1 }
 0xe6b   :  { %v2403_v24 = vadd.f32 %v2401_v43, %v4770_v2  ;;  %v2085_v43 = vadd.f32 %v4761_v52, %v2084_v32 }
 0xe6d   :  { %2410 = vrot.lane.b32.xlu1 %v2403_v24, %s3670_s26  ;;  %v2405_v16 = vmul.f32 %v2403_v24, %v2348_v19 }
 0xed7   :  { %v2409_v42 = vpop.permute.xlu0 %2408 }
 0xed8   :  { %v2414_v49 = vmul.f32 %v2409_v42, %v2402_v22  ;;  %v2086_v42 = vpop.f32.mrf.mxu1 }
 0xeda   :  { %2418 = vrot.lane.b32.xlu2 %v2414_v49, %s3678_s10 }
 0xedf   :  { %v2411_v6 = vpop.permute.xlu1 %2410 }
 0xee0   :  { %v2415_v17 = vmul.f32 %v2411_v6, %v2403_v24 }
 0xee2   :  { %2420 = vrot.lane.b32.xlu0 %v2415_v17, %s3678_s10  ;;  %v2087_v17 = vadd.f32 %v4761_v52, %v2086_v42 }
 0xf34   :  { %v2419_v30 = vpop.permute.xlu2 %2418 }
 0xf35   :  { %v2424_v39 = vadd.f32 %v2419_v30, %v2404_v58  ;;  %v2110_v58 = vmul.f32 %v2087_v17, %v4681_v5 }
 0xf37   :  { %3451 = vtanh.f32 %v2424_v39 }
 0xf3d   :  { %v3452_v9 = vpop.eup %3451 }
 0xf3e   :  { %2430 = vrot.lane.b32.xlu1 %v3452_v9, %s3670_s26 }
 0xf54   :  { %v2421_v51 = vpop.permute.xlu0 %2420 }
 0xf55   :  { %v2425_v1 = vadd.f32 %v2421_v51, %v2405_v16 }
 0xf57   :  { %3453 = vtanh.f32 %v2425_v1 }
 0xf5d   :  { %v3454_v33 = vpop.eup %3453 }
 0xf5e   :  { %2432 = vrot.lane.b32.xlu2 %v3454_v33, %s3670_s26 }
 0xfb0   :  { %v2431_v59 = vpop.permute.xlu1 %2430 }
 0xfb1   :  { %v4857_v44 = vmul.f32 %v2431_v59, %v2402_v22 }
 0xfb8   :  { %v2433_v54 = vpop.permute.xlu2 %2432 }
 0xfb9   :  { %v4859_v18 = vmul.f32 %v2433_v54, %v2403_v24  ;;  %v2109_v24 = vmul.f32 %v2085_v43, %v4681_v5 }
 0xfbb   :  { %v2452_v62 = vpack.c.bf16 %v4859_v18, %v4857_v44 }
 0xfbd   :  { %2454 = vrot.lane.b32.xlu0 %v2452_v62, %s3678_s10 }
0x102f   :  { %v2455_v11 = vpop.permute.xlu0 %2454 }
0x1030   :  { %3127 = vmatmul.msk.bf16.vlgmr.msrb.gmra.mxu2 %vm387_vm1, %v2455_v11 }
0x10b3   :  { %v2468_v46 = vpop.f32.mrf.mxu2 }
0x10b4   :  { %v2473_v8 = vadd.f32 %v2468_v46, %v2107_v56 }
0x10b6   :  { %3455 = vtanh.f32 %v2473_v8 }
0x10bb   :  { %v2470_v48 = vpop.f32.mrf.mxu2 }
0x10bc   :  { %v3456_v41 = vpop.eup %3455  ;;  %v2474_v12 = vadd.f32 %v2470_v48, %v2108_v34 }
0x10bd   :  { %v2477_v45 = vmul.f32 %v3456_v41, %v4681_v5 }
0x10be   :  { %3457 = vtanh.f32 %v2474_v12 }
0x10bf   :  { %v2479_v50 = vadd.f32 %v2477_v45, %v4770_v2 }
0x10c1   :  { %2485 = vrot.lane.b32.xlu1 %v2479_v50, %s3670_s26  ;;  %v2481_v35 = vmul.f32 %v2479_v50, %v2424_v39 }
0x10c4   :  { %v3458_v38 = vpop.eup %3457 }
0x10c5   :  { %v2478_v31 = vmul.f32 %v3458_v38, %v4681_v5 }
0x10c7   :  { %v2480_v19 = vadd.f32 %v2478_v31, %v4770_v2 }
0x10c9   :  { %2487 = vrot.lane.b32.xlu2 %v2480_v19, %s3670_s26  ;;  %v2482_v29 = vmul.f32 %v2480_v19, %v2425_v1 }
0x1123   :  { %v2488_v7 = vpop.permute.xlu2 %2487 }
0x1124   :  { %v2492_v26 = vmul.f32 %v2488_v7, %v2480_v19 }
0x1126   :  { %2497 = vrot.lane.b32.xlu1 %v2492_v26, %s3678_s10 }
0x1133   :  { %v2486_v47 = vpop.permute.xlu1 %2485 }
0x1134   :  { %v2491_v20 = vmul.f32 %v2486_v47, %v2479_v50 }
0x1136   :  { %2495 = vrot.lane.b32.xlu0 %v2491_v20, %s3678_s10 }
0x1198   :  { %v2498_v21 = vpop.permute.xlu1 %2497 }
0x1199   :  { %v2502_v14 = vadd.f32 %v2498_v21, %v2482_v29 }
0x119b   :  { %3459 = vtanh.f32 %v2502_v14 }
0x11a1   :  { %v3460_v57 = vpop.eup %3459 }
0x11a2   :  { %2509 = vrot.lane.b32.xlu0 %v3460_v57, %s3670_s26 }
0x11a8   :  { %v2496_v28 = vpop.permute.xlu0 %2495 }
0x11a9   :  { %v2501_v61 = vadd.f32 %v2496_v28, %v2481_v35 }
0x11ab   :  { %3461 = vtanh.f32 %v2501_v61 }
0x11b1   :  { %v3462_v3 = vpop.eup %3461 }
0x11b2   :  { %2507 = vrot.lane.b32.xlu2 %v3462_v3, %s3670_s26 }
0x120c   :  { %v2508_v60 = vpop.permute.xlu2 %2507 }
0x120d   :  { %v4879_v15 = vmul.f32 %v2508_v60, %v2479_v50 }
0x1214   :  { %v2510_v4 = vpop.permute.xlu0 %2509 }
0x1215   :  { %v4881_v23 = vmul.f32 %v2510_v4, %v2480_v19  ;;  %v2089_v19 = vpop.f32.mrf.mxu1 }
0x1216   :  { %v2090_v7 = vadd.f32 %v4761_v52, %v2089_v19  ;;  %v3185_v19 = vld [vmem:[#allocation15 + $0x8] sm:$0xff] }
0x1217   :  { %v2529_v63 = vpack.c.bf16 %v4881_v23, %v4879_v15  ;;  %2831 = vmatpush.bf16.msrb.mxu2 %v3185_v19 }
0x1218   :  { %v2111_v26 = vmul.f32 %v2090_v7, %v4681_v5  ;;  %v3184_v7 = vld [vmem:[#allocation15] sm:$0xff] }
0x1219   :  { %2531 = vrot.lane.b32.xlu1 %v2529_v63, %s3678_s10 }
0x121b   :  { %2832 = vmatpush.bf16.msrb.mxu2 %v3184_v7 }
0x121d   :  { %v2091_v47 = vpop.f32.mrf.mxu1 }
0x121e   :  { %v2092_v21 = vadd.f32 %v4761_v52, %v2091_v47 }
0x128b   :  { %v2532_v22 = vpop.permute.xlu1 %2531 }
0x128c   :  { %3128 = vmatmul.msk.bf16.vlgmr.msra.gmra.mxu3 %vm387_vm1, %v2532_v22 }
0x130f   :  { %v2545_v49 = vpop.f32.mrf.mxu3 }
0x1310   :  { %v2550_v6 = vadd.f32 %v2545_v49, %v2109_v24 }
0x1312   :  { %3463 = vtanh.f32 %v2550_v6 }
0x1317   :  { %v2547_v30 = vpop.f32.mrf.mxu3 }
0x1318   :  { %v3464_v39 = vpop.eup %3463  ;;  %v2551_v9 = vadd.f32 %v2547_v30, %v2110_v58 }
0x1319   :  { %v2554_v16 = vmul.f32 %v3464_v39, %v4681_v5 }
0x131a   :  { %3465 = vtanh.f32 %v2551_v9 }
0x131b   :  { %v2556_v51 = vadd.f32 %v2554_v16, %v4770_v2 }
0x131d   :  { %2562 = vrot.lane.b32.xlu2 %v2556_v51, %s3670_s26  ;;  %v2558_v13 = vmul.f32 %v2556_v51, %v2501_v61 }
0x1320   :  { %v3466_v1 = vpop.eup %3465 }
0x1321   :  { %v2555_v33 = vmul.f32 %v3466_v1, %v4681_v5 }
0x1323   :  { %v2557_v59 = vadd.f32 %v2555_v33, %v4770_v2 }
0x1325   :  { %2564 = vrot.lane.b32.xlu0 %v2557_v59, %s3670_s26  ;;  %v2559_v46 = vmul.f32 %v2557_v59, %v2502_v14  ;;  %v2112_v14 = vmul.f32 %v2092_v21, %v4681_v5 }
0x1377   :  { %v2563_v54 = vpop.permute.xlu2 %2562 }
0x1378   :  { %v2568_v62 = vmul.f32 %v2563_v54, %v2556_v51 }
0x137a   :  { %2572 = vrot.lane.b32.xlu1 %v2568_v62, %s3678_s10 }
0x1397   :  { %v2565_v11 = vpop.permute.xlu0 %2564 }
0x1398   :  { %v2569_v37 = vmul.f32 %v2565_v11, %v2557_v59 }
0x139a   :  { %2574 = vrot.lane.b32.xlu2 %v2569_v37, %s3678_s10 }
0x13ec   :  { %v2573_v56 = vpop.permute.xlu1 %2572 }
0x13ed   :  { %v2578_v40 = vadd.f32 %v2573_v56, %v2558_v13 }
0x13ef   :  { %3467 = vtanh.f32 %v2578_v40 }
0x13f4   :  { %v2575_v8 = vpop.permute.xlu2 %2574 }
0x13f5   :  { %v3468_v10 = vpop.eup %3467  ;;  %v2579_v34 = vadd.f32 %v2575_v8, %v2559_v46 }
0x13f6   :  { %2584 = vrot.lane.b32.xlu0 %v3468_v10, %s3670_s26 }
0x13f7   :  { %3469 = vtanh.f32 %v2579_v34 }
0x13fd   :  { %v3470_v48 = vpop.eup %3469 }
0x13fe   :  { %2586 = vrot.lane.b32.xlu1 %v3470_v48, %s3670_s26 }
0x1468   :  { %v2585_v41 = vpop.permute.xlu0 %2584 }
0x1469   :  { %v4901_v45 = vmul.f32 %v2585_v41, %v2556_v51 }
0x1470   :  { %v2587_v12 = vpop.permute.xlu1 %2586 }
0x1471   :  { %v4903_v50 = vmul.f32 %v2587_v12, %v2557_v59 }
0x1473   :  { %v2606_v38 = vpack.c.bf16 %v4903_v50, %v4901_v45 }
0x1475   :  { %2608 = vrot.lane.b32.xlu2 %v2606_v38, %s3678_s10 }
0x14cf   :  { %v2609_v31 = vpop.permute.xlu2 %2608 }
0x14d0   :  { %3129 = vmatmul.msk.bf16.vlgmr.msra.gmra.mxu2 %vm387_vm1, %v2609_v31 }
0x1553   :  { %v2622_v20 = vpop.f32.mrf.mxu2 }
0x1554   :  { %v2627_v29 = vadd.f32 %v2622_v20, %v2111_v26 }
0x1556   :  { %3471 = vtanh.f32 %v2627_v29 }
0x155b   :  { %v2624_v57 = vpop.f32.mrf.mxu2 }
0x155c   :  { %v3472_v35 = vpop.eup %3471  ;;  %v2628_v28 = vadd.f32 %v2624_v57, %v2112_v14 }
0x155d   :  { %v2631_v61 = vmul.f32 %v3472_v35, %v4681_v5 }
0x155e   :  { %3473 = vtanh.f32 %v2628_v28 }
0x155f   :  { %v2633_v3 = vadd.f32 %v2631_v61, %v4770_v2 }
0x1561   :  { %2639 = vrot.lane.b32.xlu0 %v2633_v3, %s3670_s26  ;;  %v2635_v42 = vmul.f32 %v2633_v3, %v2578_v40 }
0x1564   :  { %v3474_v60 = vpop.eup %3473 }
0x1565   :  { %v2632_v4 = vmul.f32 %v3474_v60, %v4681_v5 }
0x1567   :  { %v2634_v63 = vadd.f32 %v2632_v4, %v4770_v2 }
0x1569   :  { %2641 = vrot.lane.b32.xlu1 %v2634_v63, %s3670_s26  ;;  %v2636_v58 = vmul.f32 %v2634_v63, %v2579_v34 }
0x15d3   :  { %v2640_v22 = vpop.permute.xlu0 %2639 }
0x15d4   :  { %v2645_v32 = vmul.f32 %v2640_v22, %v2633_v3 }
0x15d6   :  { %2649 = vrot.lane.b32.xlu2 %v2645_v32, %s3678_s10 }
0x15db   :  { %v2642_v43 = vpop.permute.xlu1 %2641 }
0x15dc   :  { %v2646_v24 = vmul.f32 %v2642_v43, %v2634_v63 }
0x15de   :  { %2651 = vrot.lane.b32.xlu0 %v2646_v24, %s3678_s10 }
0x1630   :  { %v2650_v49 = vpop.permute.xlu2 %2649 }
0x1631   :  { %v4921_v6 = vadd.f32 %v2650_v49, %v2635_v42 }
0x1633   :  { %3475 = vtanh.f32 %v4921_v6 }
0x1639   :  { %v3476_v17 = vpop.eup %3475 }
0x163a   :  { %2661 = vrot.lane.b32.xlu1 %v3476_v17, %s3670_s26 }
0x1650   :  { %v2652_v30 = vpop.permute.xlu0 %2651 }
0x1651   :  { %v4925_v39 = vadd.f32 %v2652_v30, %v2636_v58 }
0x1653   :  { %3477 = vtanh.f32 %v4925_v39 }
0x1659   :  { %v3478_v9 = vpop.eup %3477 }
0x165a   :  { %2663 = vrot.lane.b32.xlu2 %v3478_v9, %s3670_s26 }
0x16ac   :  { %v2662_v16 = vpop.permute.xlu1 %2661 }
0x16ad   :  { %v4929_v1 = vmul.f32 %v2662_v16, %v2633_v3 }
0x16b4   :  { %v2664_v51 = vpop.permute.xlu2 %2663 }
0x16b5   :  { %v2668_v33 = vmul.f32 %v2664_v51, %v2634_v63 }
0x16b7   :  { %v2683_v59 = vpack.c.bf16 %v2668_v33, %v4929_v1 }
0x16b9   :  { %2685 = vrot.lane.b32.xlu0 %v2683_v59, %s3678_s10 }
0x16c1   :  { %2210 = vrot.lane.b32.xlu0 %v4785_v53, %s3678_s10 }
0x16c9   :  { %2288 = vrot.lane.b32.xlu0 %v4811_v27, %s3678_s10  ;;  %v2094_v27 = vpop.f32.mrf.mxu1 }
0x16d1   :  { %2363 = vrot.lane.b32.xlu0 %v4833_v0, %s3678_s10  ;;  %v2095_v0 = vadd.f32 %v4761_v52, %v2094_v27  ;;  %v2096_v13 = vpop.f32.mrf.mxu1 }
0x16d2   :  { %v2097_v46 = vadd.f32 %v4761_v52, %v2096_v13 }
0x16d4   :  { %v2114_v8 = vmul.f32 %v2097_v46, %v4681_v5 }
0x16d9   :  { %2442 = vrot.lane.b32.xlu0 %v4859_v18, %s3678_s10  ;;  %v2113_v18 = vmul.f32 %v2095_v0, %v4681_v5 }
0x172b   :  { %v2686_v54 = vpop.permute.xlu0 %2685 }
0x172c   :  { %3130 = vmatmul.msk.bf16.vlgmr.msrb.gmra.mxu3 %vm387_vm1, %v2686_v54 }
0x1733   :  { %v2211_v62 = vpop.permute.xlu0 %2210 }
0x1734   :  { %2216 = vst.msk [vmem:[#allocation5] sm:$0xff] %vm387_vm1, %v2211_v62 }
0x173b   :  { %v2289_v11 = vpop.permute.xlu0 %2288  ;;  %v2757_v20 = vld [vmem:[#allocation5] sm:$0xff] }
0x173c   :  { %2294 = vst.msk [vmem:[#allocation5 + $0x18] sm:$0xff] %vm387_vm1, %v2289_v11 }
0x1743   :  { %v2364_v37 = vpop.permute.xlu0 %2363  ;;  %v2760_v21 = vld [vmem:[#allocation5 + $0x18] sm:$0xff] }
0x1744   :  { %2370 = vst.msk [vmem:[#allocation5 + $0x20] sm:$0xff] %vm387_vm1, %v2364_v37 }
0x174b   :  { %v2443_v53 = vpop.permute.xlu0 %2442  ;;  %v2761_v24 = vld [vmem:[#allocation5 + $0x20] sm:$0xff] }
0x174c   :  { %2448 = vst.msk [vmem:[#allocation5 + $0x38] sm:$0xff] %vm387_vm1, %v2443_v53 }
0x1753   :  { %v2764_v17 = vld [vmem:[#allocation5 + $0x38] sm:$0xff] }
0x17af   :  { %v2699_v56 = vpop.f32.mrf.mxu3 }
0x17b0   :  { %v2704_v40 = vadd.f32 %v2699_v56, %v2113_v18 }
0x17b2   :  { %3479 = vtanh.f32 %v2704_v40 }
0x17b7   :  { %v2701_v10 = vpop.f32.mrf.mxu3 }
0x17b8   :  { %v3480_v34 = vpop.eup %3479  ;;  %v2705_v48 = vadd.f32 %v2701_v10, %v2114_v8 }
0x17b9   :  { %v2708_v41 = vmul.f32 %v3480_v34, %v4681_v5 }
0x17ba   :  { %3481 = vtanh.f32 %v2705_v48 }
0x17bb   :  { %v4952_v12 = vadd.f32 %v2708_v41, %v4770_v2 }
0x17bd   :  { %2716 = vrot.lane.b32.xlu1 %v4952_v12, %s3670_s26  ;;  %v2712_v60 = vmul.f32 %v4952_v12, %v4921_v6 }
0x17c0   :  { %v3482_v38 = vpop.eup %3481 }
0x17c1   :  { %v2709_v31 = vmul.f32 %v3482_v38, %v4681_v5 }
0x17c3   :  { %v4958_v52 = vadd.f32 %v2709_v31, %v4770_v2 }
0x17c5   :  { %2718 = vrot.lane.b32.xlu2 %v4958_v52, %s3670_s26  ;;  %2212 = vrot.lane.b32.xlu1 %v4787_v25, %s3678_s10 }
0x17cd   :  { %2286 = vrot.lane.b32.xlu2 %v4809_v55, %s3678_s10 }
0x181f   :  { %v2719_v26 = vpop.permute.xlu2 %2718 }
0x1820   :  { %v2723_v47 = vmul.f32 %v2719_v26, %v4958_v52 }
0x1822   :  { %2728 = vrot.lane.b32.xlu2 %v2723_v47, %s3678_s10 }
0x1827   :  { %v2287_v5 = vpop.permute.xlu2 %2286 }
0x1828   :  { %2293 = vst.msk [vmem:[#allocation5 + $0x10] sm:$0xff] %vm387_vm1, %v2287_v5 }
0x182a   :  { %2440 = vrot.lane.b32.xlu2 %v4857_v44, %s3678_s10 }
0x182f   :  { %v2717_v2 = vpop.permute.xlu1 %2716 }
0x1830   :  { %v2722_v25 = vmul.f32 %v2717_v2, %v4952_v12 }
0x1832   :  { %2519 = vrot.lane.b32.xlu2 %v4881_v23, %s3678_s10  ;;  %2726 = vrot.lane.b32.xlu1 %v2722_v25, %s3678_s10  ;;  %v2759_v23 = vld [vmem:[#allocation5 + $0x10] sm:$0xff] }
0x1833   :  { %v2774_v14 = vpack.c.bf16 %v2760_v21, %v2759_v23 }
0x1837   :  { %v2213_v55 = vpop.permute.xlu1 %2212 }
0x1838   :  { %2217 = vst.msk [vmem:[#allocation5 + $0x8] sm:$0xff] %vm387_vm1, %v2213_v55 }
0x183a   :  { %2594 = vrot.lane.b32.xlu2 %v4901_v45, %s3678_s10  ;;  %2365 = vrot.lane.b32.xlu1 %v4835_v36, %s3678_s10  ;;  %v2713_v45 = vmul.f32 %v4958_v52, %v4925_v39  ;;  %v5006_v39 = vld [vmem:[%s5054_s12] ss:$0 sm:$0xff]  ;;  %s3679_s12 = smov [#allocation17]  }
0x183b   :  { %s2910_s22 = sshll.u32 %s3679_s12, 4  ;;  %s2911_s22 = int_to_ptr.vmem [resolvable:$true] %s2910_s22 }
0x183f   :  { %v2758_v29 = vld [vmem:[#allocation5 + $0x8] sm:$0xff] }
0x1840   :  { %v2773_v44 = vpack.c.bf16 %v2758_v29, %v2757_v20 }
0x1842   :  { %2673 = vrot.lane.b32.xlu2 %v2668_v33, %s3678_s10  ;;  %2517 = vrot.lane.b32.xlu1 %v4879_v15, %s3678_s10 }
0x1843   :  { %3139 = vmatmul.msk.bf16.vlgmr.msrb.gmra.mxu2 %vm387_vm1, %v2773_v44 }
0x1853   :  { %3140 = vmatmul.msk.bf16.gmra.mxu2 %vm387_vm1, %v2774_v14 }
0x187c   :  { %v2729_v57 = vpop.permute.xlu2 %2728 }
0x187d   :  { %v2733_v36 = vadd.f32 %v2729_v57, %v2713_v45 }
0x187f   :  { %3483 = vtanh.f32 %v2733_v36 }
0x1884   :  { %v2441_v35 = vpop.permute.xlu2 %2440 }
0x1885   :  { %v3484_v28 = vpop.eup %3483  ;;  %2447 = vst.msk [vmem:[#allocation5 + $0x30] sm:$0xff] %vm387_vm1, %v2441_v35 }
0x1886   :  { %2740 = vrot.lane.b32.xlu1 %v3484_v28, %s3670_s26 }
0x188c   :  { %v2520_v15 = vpop.permute.xlu2 %2519  ;;  %v2763_v6 = vld [vmem:[#allocation5 + $0x30] sm:$0xff] }
0x188d   :  { %2525 = vst.msk [vmem:[#allocation5 + $0x48] sm:$0xff] %vm387_vm1, %v2520_v15  ;;  %v2776_v58 = vpack.c.bf16 %v2764_v17, %v2763_v6 }
0x188e   :  { %2671 = vrot.lane.b32.xlu1 %v4929_v1, %s3678_s10 }
0x1894   :  { %v2595_v61 = vpop.permute.xlu2 %2594  ;;  %v2766_v33 = vld [vmem:[#allocation5 + $0x48] sm:$0xff] }
0x1895   :  { %2601 = vst.msk [vmem:[#allocation5 + $0x50] sm:$0xff] %vm387_vm1, %v2595_v61 }
0x189c   :  { %v2674_v3 = vpop.permute.xlu2 %2673  ;;  %v2767_v46 = vld [vmem:[#allocation5 + $0x50] sm:$0xff] }
0x189d   :  { %2679 = vst.msk [vmem:[#allocation5 + $0x68] sm:$0xff] %vm387_vm1, %v2674_v3 }
0x18a4   :  { %v2727_v4 = vpop.permute.xlu1 %2726  ;;  %v2770_v41 = vld [vmem:[#allocation5 + $0x68] sm:$0xff] }
0x18a5   :  { %v2732_v63 = vadd.f32 %v2727_v4, %v2712_v60 }
0x18a7   :  { %3485 = vtanh.f32 %v2732_v63 }
0x18ac   :  { %v2366_v22 = vpop.permute.xlu1 %2365 }
0x18ad   :  { %v3486_v32 = vpop.eup %3485  ;;  %2371 = vst.msk [vmem:[#allocation5 + $0x28] sm:$0xff] %vm387_vm1, %v2366_v22 }
0x18ae   :  { %2738 = vrot.lane.b32.xlu0 %v3486_v32, %s3670_s26 }
0x18b4   :  { %v2518_v43 = vpop.permute.xlu1 %2517  ;;  %v2762_v42 = vld [vmem:[#allocation5 + $0x28] sm:$0xff] }
0x18b5   :  { %2524 = vst.msk [vmem:[#allocation5 + $0x40] sm:$0xff] %vm387_vm1, %v2518_v43  ;;  %v2775_v49 = vpack.c.bf16 %v2762_v42, %v2761_v24 }
0x18b6   :  { %2596 = vrot.lane.b32.xlu0 %v4903_v50, %s3678_s10 }
0x18b7   :  { %3141 = vmatmul.msk.bf16.gmra.mxu2 %vm387_vm1, %v2775_v49 }
0x18bc   :  { %v2765_v50 = vld [vmem:[#allocation5 + $0x40] sm:$0xff] }
0x18bd   :  { %v2777_v59 = vpack.c.bf16 %v2766_v33, %v2765_v50 }
0x18c6   :  { %v2834_v30 = vpop.f32.mrf.mxu2 }
0x18c7   :  { %3142 = vmatmul.msk.bf16.gmra.mxu2 %vm387_vm1, %v2776_v58  ;;  %v2835_v16 = vadd.f32 %v5006_v39, %v2834_v30 }
0x18ce   :  { %v2836_v9 = vpop.f32.mrf.mxu2 }
0x18cf   :  { %v2837_v51 = vadd.f32 %v5006_v39, %v2836_v9 }
0x18d1   :  { %v3197_v1 = vpack.c.bf16 %v2837_v51, %v2835_v16 }
0x18d3   :  { %3198 = vst [vmem:[#allocation17] sm:$0xff] %v3197_v1  }
0x18d6   :  { %v2839_v54 = vpop.f32.mrf.mxu2 }
0x18d7   :  { %3143 = vmatmul.msk.bf16.gmra.mxu2 %vm387_vm1, %v2777_v59  ;;  %v2840_v11 = vadd.f32 %v5006_v39, %v2839_v54 }
0x18de   :  { %v2841_v62 = vpop.f32.mrf.mxu2 }
0x18df   :  { %v2842_v37 = vadd.f32 %v5006_v39, %v2841_v62 }
0x18e1   :  { %v3202_v53 = vpack.c.bf16 %v2842_v37, %v2840_v11 }
0x18e3   :  { %3235 = vst [vmem:[#allocation17 + $0x8] sm:$0xff] %v3202_v53  }
0x18f8   :  { %v2741_v27 = vpop.permute.xlu1 %2740 }
0x18f9   :  { %v2745_v0 = vmul.f32 %v2741_v27, %v4958_v52 }
0x18fb   :  { %2750 = vrot.lane.b32.xlu1 %v2745_v0, %s3678_s10 }
0x1900   :  { %v2672_v18 = vpop.permute.xlu1 %2671 }
0x1901   :  { %2678 = vst.msk [vmem:[#allocation5 + $0x60] sm:$0xff] %vm387_vm1, %v2672_v18 }
0x1908   :  { %v2769_v48 = vld [vmem:[#allocation5 + $0x60] sm:$0xff] }
0x1909   :  { %v2779_v38 = vpack.c.bf16 %v2770_v41, %v2769_v48 }
0x1920   :  { %v2739_v13 = vpop.permute.xlu0 %2738 }
0x1921   :  { %v2744_v56 = vmul.f32 %v2739_v13, %v4952_v12 }
0x1923   :  { %2748 = vrot.lane.b32.xlu0 %v2744_v56, %s3678_s10 }
0x1928   :  { %v2597_v40 = vpop.permute.xlu0 %2596 }
0x1929   :  { %2602 = vst.msk [vmem:[#allocation5 + $0x58] sm:$0xff] %vm387_vm1, %v2597_v40 }
0x1930   :  { %v2768_v8 = vld [vmem:[#allocation5 + $0x58] sm:$0xff] }
0x1931   :  { %v2778_v10 = vpack.c.bf16 %v2768_v8, %v2767_v46 }
0x1933   :  { %3144 = vmatmul.msk.bf16.gmra.mxu2 %vm387_vm1, %v2778_v10 }
0x193a   :  { %v2844_v34 = vpop.f32.mrf.mxu2 }
0x193b   :  { %v2845_v52 = vadd.f32 %v5006_v39, %v2844_v34 }
0x1942   :  { %v2846_v31 = vpop.f32.mrf.mxu2 }
0x1943   :  { %v2847_v19 = vadd.f32 %v5006_v39, %v2846_v31  ;;  %3145 = vmatmul.msk.bf16.gmra.mxu2 %vm387_vm1, %v2779_v38 }
0x1945   :  { %v3207_v12 = vpack.c.bf16 %v2847_v19, %v2845_v52 }
0x1947   :  { %3236 = vst [vmem:[#allocation17 + $0x10] sm:$0xff] %v3207_v12  }
0x194a   :  { %v2849_v7 = vpop.f32.mrf.mxu2 }
0x194b   :  { %v2850_v47 = vadd.f32 %v5006_v39, %v2849_v7 }
0x1952   :  { %v2851_v26 = vpop.f32.mrf.mxu2 }
0x1953   :  { %v2852_v5 = vadd.f32 %v5006_v39, %v2851_v26 }
0x1955   :  { %v3212_v2 = vpack.c.bf16 %v2852_v5, %v2850_v47 }
0x1957   :  { %3237 = vst [vmem:[#allocation17 + $0x18] sm:$0xff] %v3212_v2  }
0x195a   :  { %v2854_v25 = vpop.f32.mrf.mxu2 }
0x195b   :  { %v2855_v20 = vadd.f32 %v5006_v39, %v2854_v25 }
0x1962   :  { %v2856_v55 = vpop.f32.mrf.mxu2 }
0x1963   :  { %v2857_v29 = vadd.f32 %v5006_v39, %v2856_v55 }
0x1965   :  { %v3217_v44 = vpack.c.bf16 %v2857_v29, %v2855_v20 }
0x1967   :  { %3238 = vst [vmem:[#allocation17 + $0x20] sm:$0xff] %v3217_v44  }
0x196d   :  { %v2751_v23 = vpop.permute.xlu1 %2750 }
0x196e   :  { %2756 = vst.msk [vmem:[#allocation5 + $0x78] sm:$0xff] %vm387_vm1, %v2751_v23 }
0x1975   :  { %v2772_v45 = vld [vmem:[#allocation5 + $0x78] sm:$0xff] }
0x1995   :  { %v2749_v21 = vpop.permute.xlu0 %2748 }
0x1996   :  { %2755 = vst.msk [vmem:[#allocation5 + $0x70] sm:$0xff] %vm387_vm1, %v2749_v21 }
0x199d   :  { %v2771_v14 = vld [vmem:[#allocation5 + $0x70] sm:$0xff] }
0x199e   :  { %v2780_v57 = vpack.c.bf16 %v2772_v45, %v2771_v14 }
0x19a0   :  { %3146 = vmatmul.msk.bf16.gmra.mxu2 %vm387_vm1, %v2780_v57 }
0x19b6   :  { %v2859_v36 = vpop.f32.mrf.mxu2 }
0x19b7   :  { %v2860_v28 = vadd.f32 %v5006_v39, %v2859_v36 }
0x19be   :  { %v2861_v35 = vpop.f32.mrf.mxu2 }
0x19bf   :  { %v2862_v15 = vadd.f32 %v5006_v39, %v2861_v35 }
0x19c1   :  { %v3222_v61 = vpack.c.bf16 %v2862_v15, %v2860_v28 }
0x19c3   :  { %3239 = vst [vmem:[#allocation17 + $0x28] sm:$0xff] %v3222_v61  }
0x19c6   :  { %v2864_v3 = vpop.f32.mrf.mxu2 }
0x19c7   :  { %v2865_v4 = vadd.f32 %v5006_v39, %v2864_v3 }
0x19ce   :  { %v2866_v60 = vpop.f32.mrf.mxu2 }
0x19cf   :  { %v2867_v63 = vadd.f32 %v5006_v39, %v2866_v60 }
0x19d1   :  { %v3227_v22 = vpack.c.bf16 %v2867_v63, %v2865_v4 }
0x19d3   :  { %3240 = vst [vmem:[#allocation17 + $0x30] sm:$0xff] %v3227_v22  }
0x1a23   :  { %v2869_v32 = vpop.f32.mrf.mxu2 }
0x1a24   :  { %v2870_v24 = vadd.f32 %v5006_v39, %v2869_v32 }
0x1a2b   :  { %v2871_v43 = vpop.f32.mrf.mxu2 }
0x1a2c   :  { %v2872_v42 = vadd.f32 %v5006_v39, %v2871_v43 }
0x1a2e   :  { %v3232_v49 = vpack.c.bf16 %v2872_v42, %v2870_v24 }
0x1a30   :  { %3241 = vst [vmem:[#allocation17 + $0x38] sm:$0xff] %v3232_v49  }
0x1a31   :  { %2918 = dma.vmem_to_hbm [thread:$0]  %s2911_s22, 1024, %s2913_s16, [#allocation8], %s3670_s26, %s3670_s26, %s3671_s28  }
0x1a32   :  { %3663 = dma.done.wait [#allocation8], 1024  }
0x1a33   :  { %3664 = vsyncadd [#allocation8], 4294966272 }
0x1a34   :  { %2923 = vsyncpa [#allocation7], 1 }
0x1a35   :  { %2924 = vsyncpa [#allocation10], 1 }
0x1a36   :  { %2925 = vsyncpa [#allocation13], 1 }
0x1a37   :  { %2926 = vsyncpa [#allocation16], 1 }
0x1a38   :  { %2927 = vsyncpa [#allocation8], 1 }

</bundles_post_ra>
